<compile_context>
chip_gen: v7x
topology: tpu7x:2x2x1
jax: 0.10.0
libtpu: 0.0.40
codegen_flags: <defaults>
</compile_context>

<pallas_src>
import functools

import jax
import jax.numpy as jnp
from jax.experimental import pallas as pl
from jax.experimental.pallas import tpu as pltpu

_LOG_STD_MIN = -20.0
_LOG_STD_MAX = 2.0
_HALF_LOG_2PI = 0.5 * float(jnp.log(2.0 * jnp.pi))
_LOG2 = float(jnp.log(2.0))
_HP = jax.lax.Precision.HIGHEST


def _round_up(x: int, m: int) -> int:
    return ((x + m - 1) // m) * m


def _policy_kernel(scal_ref, obs_ref, w1_ref, b1_ref, w2_ref, b2_ref,
                   wm_ref, bm_ref, ws_ref, bs_ref, *rest,
                   deterministic: bool):
    # scal_ref (SMEM, f32[3]) = [log_std_multiplier, log_std_offset, max_action]
    if deterministic:
        act_ref, logp_ref = rest
    else:
        eps_ref, act_ref, logp_ref = rest

    mult = scal_ref[0]
    offset = scal_ref[1]
    max_action = scal_ref[2]

    x = obs_ref[...]  # (TB, S)

    # Base MLP (two hidden layers + ReLU), then the two heads of the final
    # Linear(256, 2*A) (torch.split along dim=-1 → separate weight columns).
    h1 = jnp.maximum(
        jnp.dot(x, w1_ref[...], preferred_element_type=jnp.float32,
                precision=_HP) + b1_ref[...], 0.0)
    h2 = jnp.maximum(
        jnp.dot(h1, w2_ref[...], preferred_element_type=jnp.float32,
                precision=_HP) + b2_ref[...], 0.0)
    mean = jnp.dot(h2, wm_ref[...], preferred_element_type=jnp.float32,
                   precision=_HP) + bm_ref[...]
    log_std_raw = jnp.dot(h2, ws_ref[...], preferred_element_type=jnp.float32,
                          precision=_HP) + bs_ref[...]

    log_std = jnp.clip(mult * log_std_raw + offset, _LOG_STD_MIN, _LOG_STD_MAX)

    if deterministic:
        # eps == 0: pre_tanh = mean, Normal.log_prob term loses the eps^2 part.
        pre_tanh = mean
        normal_lp = -log_std - _HALF_LOG_2PI
    else:
        eps = eps_ref[...]
        std = jnp.exp(log_std)
        pre_tanh = mean + std * eps                    # rsample() pre-tanh value
        normal_lp = -0.5 * eps * eps - log_std - _HALF_LOG_2PI

    action = jnp.tanh(pre_tanh)

    # TanhTransform.log_abs_det_jacobian(x, y) = 2*(log2 - x - softplus(-2x)).
    z = -2.0 * pre_tanh
    softplus = jnp.maximum(z, 0.0) + jnp.log(1.0 + jnp.exp(-jnp.abs(z)))
    lp = normal_lp - 2.0 * (_LOG2 - pre_tanh - softplus)

    act_ref[...] = (max_action * action).astype(act_ref.dtype)
    logp_ref[...] = jnp.sum(lp, axis=-1, keepdims=True).astype(logp_ref.dtype)


def tanh_gaussian_policy_forward(observations, params, *,
                                 log_std_multiplier=1.0, log_std_offset=-1.0,
                                 max_action=1.0, deterministic=False,
                                 eps=None, repeat=None):
    """Pallas equivalent of TanhGaussianPolicy.forward.

    params: dict with
        w1 (S, 256), b1 (256,), w2 (256, 256), b2 (256,),
        w_out (256, 2*A), b_out (2*A,)        # the final Linear(256, 2*A)
    eps: standard-normal noise with the action-output shape
         (required when deterministic=False).
    Returns (max_action * actions, log_probs).
    """
    if repeat is not None:  # extend_and_repeat(observations, 1, repeat)
        observations = jnp.repeat(jnp.expand_dims(observations, 1), repeat, axis=1)

    S = observations.shape[-1]
    w_out = params["w_out"].astype(jnp.float32)
    b_out = params["b_out"].astype(jnp.float32)
    A = w_out.shape[-1] // 2
    lead_shape = observations.shape[:-1]

    obs2 = observations.reshape((-1, S)).astype(jnp.float32)
    Btot = obs2.shape[0]

    # Batch tiling: multiple of 8 sublanes, capped so per-block VMEM stays small.
    TB = min(256, _round_up(Btot, 8))
    Bp = _round_up(Btot, TB)
    if Bp != Btot:
        obs2 = jnp.pad(obs2, ((0, Bp - Btot), (0, 0)))

    H1 = params["w1"].shape[-1]
    H2 = params["w2"].shape[-1]
    b1 = params["b1"].reshape(1, H1).astype(jnp.float32)
    b2 = params["b2"].reshape(1, H2).astype(jnp.float32)
    # torch.split of the last Linear along dim=-1 → column split (free in XLA).
    wm, ws = w_out[:, :A], w_out[:, A:]
    bm = b_out[:A].reshape(1, A)
    bs = b_out[A:].reshape(1, A)

    scalars = jnp.asarray([log_std_multiplier, log_std_offset, max_action],
                          dtype=jnp.float32)

    grid = (Bp // TB,)
    bcast = lambda i: (0, 0)
    batch_map = lambda i: (i, 0)

    in_specs = [
        pl.BlockSpec(memory_space=pltpu.MemorySpace.SMEM),  # scalars
        pl.BlockSpec((TB, S), batch_map),                   # observations
        pl.BlockSpec((S, H1), bcast),                       # w1
        pl.BlockSpec((1, H1), bcast),                       # b1
        pl.BlockSpec((H1, H2), bcast),                      # w2
        pl.BlockSpec((1, H2), bcast),                       # b2
        pl.BlockSpec((H2, A), bcast),                       # wm
        pl.BlockSpec((1, A), bcast),                        # bm
        pl.BlockSpec((H2, A), bcast),                       # ws
        pl.BlockSpec((1, A), bcast),                        # bs
    ]
    args = [scalars, obs2, params["w1"].astype(jnp.float32), b1,
            params["w2"].astype(jnp.float32), b2, wm, bm, ws, bs]

    if not deterministic:
        if eps is None:
            raise ValueError("eps is required when deterministic=False")
        eps2 = eps.reshape((-1, A)).astype(jnp.float32)
        if Bp != Btot:
            eps2 = jnp.pad(eps2, ((0, Bp - Btot), (0, 0)))
        in_specs.append(pl.BlockSpec((TB, A), batch_map))   # eps
        args.append(eps2)

    actions, logp = pl.pallas_call(
        functools.partial(_policy_kernel, deterministic=bool(deterministic)),
        out_shape=(jax.ShapeDtypeStruct((Bp, A), jnp.float32),
                   jax.ShapeDtypeStruct((Bp, 1), jnp.float32)),
        grid=grid,
        in_specs=in_specs,
        out_specs=(pl.BlockSpec((TB, A), batch_map),
                   pl.BlockSpec((TB, 1), batch_map)),
        compiler_params=pltpu.CompilerParams(
            dimension_semantics=("parallel",),   # batch tiles shard across TCs (v7x)
            vmem_limit_bytes=32 * 1024 * 1024,
        ),
    )(*args)

    actions = actions[:Btot].reshape(lead_shape + (A,))
    log_probs = logp[:Btot, 0].reshape(lead_shape)
    return actions, log_probs


def _reference_forward(obs, params, *, log_std_multiplier, log_std_offset,
                       max_action, deterministic, eps):
    """Pure-JAX reference mirroring the torch module (for validation)."""
    A = params["w_out"].shape[-1] // 2
    h1 = jax.nn.relu(jnp.dot(obs, params["w1"], precision=_HP) + params["b1"])
    h2 = jax.nn.relu(jnp.dot(h1, params["w2"], precision=_HP) + params["b2"])
    out = jnp.dot(h2, params["w_out"], precision=_HP) + params["b_out"]
    mean, log_std_raw = out[..., :A], out[..., A:]
    log_std = jnp.clip(log_std_multiplier * log_std_raw + log_std_offset,
                       _LOG_STD_MIN, _LOG_STD_MAX)
    std = jnp.exp(log_std)
    eps_eff = jnp.zeros_like(mean) if deterministic else eps
    x = mean + std * eps_eff
    y = jnp.tanh(x)
    normal_lp = -0.5 * eps_eff ** 2 - log_std - _HALF_LOG_2PI
    z = -2.0 * x
    softplus = jnp.maximum(z, 0.0) + jnp.log(1.0 + jnp.exp(-jnp.abs(z)))
    lp = normal_lp - 2.0 * (_LOG2 - x - softplus)
    return max_action * y, jnp.sum(lp, axis=-1)


if __name__ == "__main__":
    # HalfCheetah-like sizes, small batch.
    state_dim, action_dim, hidden, batch = 17, 6, 256, 8
    key = jax.random.PRNGKey(0)
    k1, k2, k3, ke, ko = jax.random.split(key, 5)

    params = {
        "w1": 0.1 * jax.random.normal(k1, (state_dim, hidden), jnp.float32),
        "b1": jnp.zeros((hidden,), jnp.float32),
        "w2": 0.1 * jax.random.normal(k2, (hidden, hidden), jnp.float32),
        "b2": jnp.zeros((hidden,), jnp.float32),
        "w_out": 0.01 * jax.random.normal(k3, (hidden, 2 * action_dim), jnp.float32),
        "b_out": jnp.zeros((2 * action_dim,), jnp.float32),
    }
    obs = jax.random.normal(ko, (batch, state_dim), jnp.float32)
    eps = jax.random.normal(ke, (batch, action_dim), jnp.float32)
    cfg = dict(log_std_multiplier=1.0, log_std_offset=-1.0, max_action=1.0)

    # Deterministic path (actions = max_action * tanh(mean)).
    a_det, lp_det = tanh_gaussian_policy_forward(
        obs, params, deterministic=True, **cfg)
    # Stochastic path (reparameterized sample with externally supplied eps).
    # TODO(synk): torch's rsample() draws noise internally; here the N(0,1)
    # noise is generated with jax.random in the wrapper and passed in.
    a_sto, lp_sto = tanh_gaussian_policy_forward(
        obs, params, deterministic=False, eps=eps, **cfg)
    jax.block_until_ready((a_det, lp_det, a_sto, lp_sto))

    ra_det, rlp_det = _reference_forward(obs, params, deterministic=True,
                                         eps=eps, **cfg)
    ra_sto, rlp_sto = _reference_forward(obs, params, deterministic=False,
                                         eps=eps, **cfg)

    assert a_det.shape == (batch, action_dim) and lp_det.shape == (batch,)
    assert jnp.allclose(a_det, ra_det, atol=1e-3, rtol=1e-3)
    assert jnp.allclose(lp_det, rlp_det, atol=1e-3, rtol=1e-3)
    assert jnp.allclose(a_sto, ra_sto, atol=1e-3, rtol=1e-3)
    assert jnp.allclose(lp_sto, rlp_sto, atol=1e-3, rtol=1e-3)

    print("KERNEL_OK")
</pallas_src>

<mosaic_0001>
module attributes {stable_mosaic.version = 11 : i64} {
  func.func @_policy_kernel(%arg0: i32, %arg1: memref<3xf32, #tpu.memory_space<smem>>, %arg2: memref<8x17xf32, #tpu.memory_space<vmem>>, %arg3: memref<17x256xf32, #tpu.memory_space<vmem>>, %arg4: memref<1x256xf32, #tpu.memory_space<vmem>>, %arg5: memref<256x256xf32, #tpu.memory_space<vmem>>, %arg6: memref<1x256xf32, #tpu.memory_space<vmem>>, %arg7: memref<256x6xf32, #tpu.memory_space<vmem>>, %arg8: memref<1x6xf32, #tpu.memory_space<vmem>>, %arg9: memref<256x6xf32, #tpu.memory_space<vmem>>, %arg10: memref<1x6xf32, #tpu.memory_space<vmem>>, %arg11: memref<8x6xf32, #tpu.memory_space<vmem>>, %arg12: memref<8x1xf32, #tpu.memory_space<vmem>>) attributes {dimension_semantics = [#tpu.dimension_semantics<parallel>], iteration_bounds = array<i64: 1>, scalar_prefetch = 0 : i64, scratch_operands = 0 : i64, tpu.core_type = #tpu.core_type<tc>, window_params = [{transform_indices = @transform_0, window_bounds = array<i64: 3>}, {transform_indices = @transform_1, window_bounds = array<i64: 8, 17>}, {pipeline_mode = #tpu.pipeline_mode<synchronous>, transform_indices = @transform_2, window_bounds = array<i64: 17, 256>}, {pipeline_mode = #tpu.pipeline_mode<synchronous>, transform_indices = @transform_3, window_bounds = array<i64: 1, 256>}, {pipeline_mode = #tpu.pipeline_mode<synchronous>, transform_indices = @transform_4, window_bounds = array<i64: 256, 256>}, {pipeline_mode = #tpu.pipeline_mode<synchronous>, transform_indices = @transform_5, window_bounds = array<i64: 1, 256>}, {pipeline_mode = #tpu.pipeline_mode<synchronous>, transform_indices = @transform_6, window_bounds = array<i64: 256, 6>}, {pipeline_mode = #tpu.pipeline_mode<synchronous>, transform_indices = @transform_7, window_bounds = array<i64: 1, 6>}, {pipeline_mode = #tpu.pipeline_mode<synchronous>, transform_indices = @transform_8, window_bounds = array<i64: 256, 6>}, {pipeline_mode = #tpu.pipeline_mode<synchronous>, transform_indices = @transform_9, window_bounds = array<i64: 1, 6>}, {transform_indices = @transform_10, window_bounds = array<i64: 8, 6>}, {transform_indices = @transform_11, window_bounds = array<i64: 8, 1>}]} {
    %c0 = arith.constant 0 : index
    %0 = memref.load %arg1[%c0] : memref<3xf32, #tpu.memory_space<smem>>
    %c1 = arith.constant 1 : index
    %1 = memref.load %arg1[%c1] : memref<3xf32, #tpu.memory_space<smem>>
    %c2 = arith.constant 2 : index
    %2 = memref.load %arg1[%c2] : memref<3xf32, #tpu.memory_space<smem>>
    %c0_0 = arith.constant 0 : index
    %c0_1 = arith.constant 0 : index
    %3 = vector.load %arg2[%c0_0, %c0_1] : memref<8x17xf32, #tpu.memory_space<vmem>>, vector<8x17xf32>
    %c0_2 = arith.constant 0 : index
    %c0_3 = arith.constant 0 : index
    %4 = vector.load %arg3[%c0_2, %c0_3] : memref<17x256xf32, #tpu.memory_space<vmem>>, vector<17x256xf32>
    %cst = arith.constant dense<0.000000e+00> : vector<8x256xf32>
    %5 = tpu.matmul %3, %4, %cst {dimension_numbers = #tpu.dot_dimension_numbers<[1], [0], [0], [1], [0, 0, 1, 1], [], []>, precision = #tpu.contract_precision<fp32>} : vector<8x17xf32>, vector<17x256xf32>, vector<8x256xf32> -> vector<8x256xf32>
    %c0_4 = arith.constant 0 : index
    %c0_5 = arith.constant 0 : index
    %6 = vector.load %arg4[%c0_4, %c0_5] : memref<1x256xf32, #tpu.memory_space<vmem>>, vector<1x256xf32>
    %7 = vector.broadcast %6 : vector<1x256xf32> to vector<8x256xf32>
    %8 = arith.addf %5, %7 : vector<8x256xf32>
    %cst_6 = arith.constant 0.000000e+00 : f32
    %9 = vector.broadcast %cst_6 : f32 to vector<8x256xf32>
    %10 = arith.maximumf %8, %9 : vector<8x256xf32>
    %c0_7 = arith.constant 0 : index
    %c0_8 = arith.constant 0 : index
    %11 = vector.load %arg5[%c0_7, %c0_8] : memref<256x256xf32, #tpu.memory_space<vmem>>, vector<256x256xf32>
    %cst_9 = arith.constant dense<0.000000e+00> : vector<8x256xf32>
    %12 = tpu.matmul %10, %11, %cst_9 {dimension_numbers = #tpu.dot_dimension_numbers<[1], [0], [0], [1], [0, 0, 1, 1], [], []>, precision = #tpu.contract_precision<fp32>} : vector<8x256xf32>, vector<256x256xf32>, vector<8x256xf32> -> vector<8x256xf32>
    %c0_10 = arith.constant 0 : index
    %c0_11 = arith.constant 0 : index
    %13 = vector.load %arg6[%c0_10, %c0_11] : memref<1x256xf32, #tpu.memory_space<vmem>>, vector<1x256xf32>
    %14 = vector.broadcast %13 : vector<1x256xf32> to vector<8x256xf32>
    %15 = arith.addf %12, %14 : vector<8x256xf32>
    %cst_12 = arith.constant 0.000000e+00 : f32
    %16 = vector.broadcast %cst_12 : f32 to vector<8x256xf32>
    %17 = arith.maximumf %15, %16 : vector<8x256xf32>
    %c0_13 = arith.constant 0 : index
    %c0_14 = arith.constant 0 : index
    %18 = vector.load %arg7[%c0_13, %c0_14] : memref<256x6xf32, #tpu.memory_space<vmem>>, vector<256x6xf32>
    %cst_15 = arith.constant dense<0.000000e+00> : vector<8x6xf32>
    %19 = tpu.matmul %17, %18, %cst_15 {dimension_numbers = #tpu.dot_dimension_numbers<[1], [0], [0], [1], [0, 0, 1, 1], [], []>, precision = #tpu.contract_precision<fp32>} : vector<8x256xf32>, vector<256x6xf32>, vector<8x6xf32> -> vector<8x6xf32>
    %c0_16 = arith.constant 0 : index
    %c0_17 = arith.constant 0 : index
    %20 = vector.load %arg8[%c0_16, %c0_17] : memref<1x6xf32, #tpu.memory_space<vmem>>, vector<1x6xf32>
    %21 = vector.broadcast %20 : vector<1x6xf32> to vector<8x6xf32>
    %22 = arith.addf %19, %21 : vector<8x6xf32>
    %c0_18 = arith.constant 0 : index
    %c0_19 = arith.constant 0 : index
    %23 = vector.load %arg9[%c0_18, %c0_19] : memref<256x6xf32, #tpu.memory_space<vmem>>, vector<256x6xf32>
    %cst_20 = arith.constant dense<0.000000e+00> : vector<8x6xf32>
    %24 = tpu.matmul %17, %23, %cst_20 {dimension_numbers = #tpu.dot_dimension_numbers<[1], [0], [0], [1], [0, 0, 1, 1], [], []>, precision = #tpu.contract_precision<fp32>} : vector<8x256xf32>, vector<256x6xf32>, vector<8x6xf32> -> vector<8x6xf32>
    %c0_21 = arith.constant 0 : index
    %c0_22 = arith.constant 0 : index
    %25 = vector.load %arg10[%c0_21, %c0_22] : memref<1x6xf32, #tpu.memory_space<vmem>>, vector<1x6xf32>
    %26 = vector.broadcast %25 : vector<1x6xf32> to vector<8x6xf32>
    %27 = arith.addf %24, %26 : vector<8x6xf32>
    %28 = vector.broadcast %0 : f32 to vector<8x6xf32>
    %29 = arith.mulf %28, %27 : vector<8x6xf32>
    %30 = vector.broadcast %1 : f32 to vector<8x6xf32>
    %31 = arith.addf %29, %30 : vector<8x6xf32>
    %cst_23 = arith.constant -2.000000e+01 : f32
    %cst_24 = arith.constant 2.000000e+00 : f32
    %32 = vector.broadcast %cst_23 : f32 to vector<8x6xf32>
    %33 = arith.maximumf %32, %31 : vector<8x6xf32>
    %34 = vector.broadcast %cst_24 : f32 to vector<8x6xf32>
    %35 = arith.minimumf %34, %33 : vector<8x6xf32>
    %cst_25 = arith.constant 0.000000e+00 : f32
    %36 = vector.broadcast %cst_25 : f32 to vector<8x6xf32>
    %37 = arith.subf %36, %35 : vector<8x6xf32>
    %cst_26 = arith.constant 0.918938517 : f32
    %38 = vector.broadcast %cst_26 : f32 to vector<8x6xf32>
    %39 = arith.subf %37, %38 : vector<8x6xf32>
    %40 = math.tanh %22 : vector<8x6xf32>
    %cst_27 = arith.constant -2.000000e+00 : f32
    %41 = vector.broadcast %cst_27 : f32 to vector<8x6xf32>
    %42 = arith.mulf %41, %22 : vector<8x6xf32>
    %cst_28 = arith.constant 0.000000e+00 : f32
    %43 = vector.broadcast %cst_28 : f32 to vector<8x6xf32>
    %44 = arith.maximumf %42, %43 : vector<8x6xf32>
    %45 = math.absf %42 : vector<8x6xf32>
    %cst_29 = arith.constant 0.000000e+00 : f32
    %46 = vector.broadcast %cst_29 : f32 to vector<8x6xf32>
    %47 = arith.subf %46, %45 : vector<8x6xf32>
    %48 = math.exp %47 : vector<8x6xf32>
    %cst_30 = arith.constant 1.000000e+00 : f32
    %49 = vector.broadcast %cst_30 : f32 to vector<8x6xf32>
    %50 = arith.addf %49, %48 : vector<8x6xf32>
    %51 = math.log %50 : vector<8x6xf32>
    %52 = arith.addf %44, %51 : vector<8x6xf32>
    %cst_31 = arith.constant 0.693147182 : f32
    %53 = vector.broadcast %cst_31 : f32 to vector<8x6xf32>
    %54 = arith.subf %53, %22 : vector<8x6xf32>
    %55 = arith.subf %54, %52 : vector<8x6xf32>
    %cst_32 = arith.constant 2.000000e+00 : f32
    %56 = vector.broadcast %cst_32 : f32 to vector<8x6xf32>
    %57 = arith.mulf %56, %55 : vector<8x6xf32>
    %58 = arith.subf %39, %57 : vector<8x6xf32>
    %59 = vector.broadcast %2 : f32 to vector<8x6xf32>
    %60 = arith.mulf %59, %40 : vector<8x6xf32>
    %c0_33 = arith.constant 0 : index
    %c0_34 = arith.constant 0 : index
    %61 = vector.load %arg11[%c0_33, %c0_34] : memref<8x6xf32, #tpu.memory_space<vmem>>, vector<8x6xf32>
    tpu.vector_store %arg11[%c0_33, %c0_34], %60 {strides = array<i32>} : memref<8x6xf32, #tpu.memory_space<vmem>>, vector<8x6xf32>,
    %cst_35 = arith.constant dense<0.000000e+00> : vector<8xf32>
    %62 = vector.multi_reduction <add>, %58, %cst_35 [1] : vector<8x6xf32> to vector<8xf32>
    %63 = vector.shape_cast %62 : vector<8xf32> to vector<8x1xf32>
    %c0_36 = arith.constant 0 : index
    %c0_37 = arith.constant 0 : index
    %64 = vector.load %arg12[%c0_36, %c0_37] : memref<8x1xf32, #tpu.memory_space<vmem>>, vector<8x1xf32>
    tpu.vector_store %arg12[%c0_36, %c0_37], %63 {strides = array<i32>} : memref<8x1xf32, #tpu.memory_space<vmem>>, vector<8x1xf32>,
    return
  }
  func.func @transform_0(%arg0: i32) -> i32 {
    %c0_i32 = arith.constant 0 : i32
    %c0_i32_0 = arith.constant 0 : i32
    return %c0_i32 : i32
  }
  func.func @transform_1(%arg0: i32) -> (i32, i32) {
    %c0_i32 = arith.constant 0 : i32
    %c0_i32_0 = arith.constant 0 : i32
    return %arg0, %c0_i32 : i32, i32
  }
  func.func @transform_2(%arg0: i32) -> (i32, i32) {
    %c0_i32 = arith.constant 0 : i32
    %c0_i32_0 = arith.constant 0 : i32
    %c0_i32_1 = arith.constant 0 : i32
    return %c0_i32, %c0_i32_0 : i32, i32
  }
  func.func @transform_3(%arg0: i32) -> (i32, i32) {
    %c0_i32 = arith.constant 0 : i32
    %c0_i32_0 = arith.constant 0 : i32
    %c0_i32_1 = arith.constant 0 : i32
    return %c0_i32, %c0_i32_0 : i32, i32
  }
  func.func @transform_4(%arg0: i32) -> (i32, i32) {
    %c0_i32 = arith.constant 0 : i32
    %c0_i32_0 = arith.constant 0 : i32
    %c0_i32_1 = arith.constant 0 : i32
    return %c0_i32, %c0_i32_0 : i32, i32
  }
  func.func @transform_5(%arg0: i32) -> (i32, i32) {
    %c0_i32 = arith.constant 0 : i32
    %c0_i32_0 = arith.constant 0 : i32
    %c0_i32_1 = arith.constant 0 : i32
    return %c0_i32, %c0_i32_0 : i32, i32
  }
  func.func @transform_6(%arg0: i32) -> (i32, i32) {
    %c0_i32 = arith.constant 0 : i32
    %c0_i32_0 = arith.constant 0 : i32
    %c0_i32_1 = arith.constant 0 : i32
    return %c0_i32, %c0_i32_0 : i32, i32
  }
  func.func @transform_7(%arg0: i32) -> (i32, i32) {
    %c0_i32 = arith.constant 0 : i32
    %c0_i32_0 = arith.constant 0 : i32
    %c0_i32_1 = arith.constant 0 : i32
    return %c0_i32, %c0_i32_0 : i32, i32
  }
  func.func @transform_8(%arg0: i32) -> (i32, i32) {
    %c0_i32 = arith.constant 0 : i32
    %c0_i32_0 = arith.constant 0 : i32
    %c0_i32_1 = arith.constant 0 : i32
    return %c0_i32, %c0_i32_0 : i32, i32
  }
  func.func @transform_9(%arg0: i32) -> (i32, i32) {
    %c0_i32 = arith.constant 0 : i32
    %c0_i32_0 = arith.constant 0 : i32
    %c0_i32_1 = arith.constant 0 : i32
    return %c0_i32, %c0_i32_0 : i32, i32
  }
  func.func @transform_10(%arg0: i32) -> (i32, i32) {
    %c0_i32 = arith.constant 0 : i32
    %c0_i32_0 = arith.constant 0 : i32
    return %arg0, %c0_i32 : i32, i32
  }
  func.func @transform_11(%arg0: i32) -> (i32, i32) {
    %c0_i32 = arith.constant 0 : i32
    %c0_i32_0 = arith.constant 0 : i32
    return %arg0, %c0_i32 : i32, i32
  }
}

</mosaic_0001>

<bundles_post_ra>
// kernel: tpu_custom_call.1
= control target key start
LH: loop header
LB: loop body
LE: loop exit
PB: predicated region body
PF: predicated region fallthrough
CT: control target
= control target key end

     0   :  { %17 = vsyncpa [#allocation5], 0  ;;  %s7773_s0 = inlined_call_operand.vmem [shape: f32[3], index: 0, kind: input, shape index: {}]   ;;  %s7774_s1 = inlined_call_operand.vmem [shape: f32[8,17], index: 1, kind: input, shape index: {}]   ;;  %s7775_s2 = inlined_call_operand.hbm [shape: f32[17,256], index: 2, kind: input, shape index: {}]   ;;  %s7776_s3 = inlined_call_operand.vmem [shape: f32[1,256], index: 3, kind: input, shape index: {}]   ;;  %s7777_s4 = inlined_call_operand.vmem [shape: f32[256,256], index: 4, kind: input, shape index: {}]   ;;  %s7778_s5 = inlined_call_operand.vmem [shape: f32[1,256], index: 5, kind: input, shape index: {}]   ;;  %s7779_s6 = inlined_call_operand.vmem [shape: f32[256,6], index: 6, kind: input, shape index: {}]   ;;  %s7780_s7 = inlined_call_operand.vmem [shape: f32[1,6], index: 7, kind: input, shape index: {}]   ;;  %s7781_s8 = inlined_call_operand.vmem [shape: f32[256,6], index: 8, kind: input, shape index: {}]   ;;  %s7782_s9 = inlined_call_operand.vmem [shape: f32[1,6], index: 9, kind: input, shape index: {}]   ;;  %s7783_s10 = inlined_call_operand.hbm [shape: f32[8,6], index: 10, kind: output, shape index: {0}]   ;;  %s7784_s11 = inlined_call_operand.vmem [shape: f32[8,1], index: 11, kind: output, shape index: {1}]  }
   0x1   :  { %18 = vsyncpa [#allocation3], 0 }
   0x2   :  { %19 = vsyncpa [#allocation4], 0  ;;  %s26_s19 = sshll.u32 %s7773_s0, 4  ;;  %s27_s19 = int_to_ptr.vmem [resolvable:$true] %s26_s19 }
   0x3   :  { %s5086_s20 = scalar_lea.vmem %s27_s19, 16  ;;  %p5091_p1 = scmp.lt.s32.totalorder %s27_s19, %s27_s19 }
   0x4   :  { %p5087_p0 = scmp.ne.s32.totalorder %s27_s19, %s5086_s20  ;;  %p5092_p2 = scmp.lt.s32.totalorder %s5086_s20, %s5086_s20 }
   0x6   :  { %p5093_p3 = por %p5092_p2, %p5091_p1 }
   0x8   :  { %p5094_p4 = pnand %p5093_p3, %p5087_p0 }
   0xa   :  { %5097 = shalt.err (!%p5094_p4)
}
   0xb   :  { %s5148_s21 = smov [#allocation2]   ;;  %s5149_s22 = smov [#allocation6]  }
   0xc   :  { %29 = dma.vmem_to_smem %s27_s19, 16, %s5148_s21, [#allocation5]  }
   0xd   :  { %s37_s23 = sshll.u32 %s5149_s22, 4  ;;  %s5098_s26 = scalar_lea.hbm %s7775_s2, 768  ;;  %s38_s23 = int_to_ptr.vmem [resolvable:$true] %s37_s23 }
   0xe   :  { %p5099_p5 = scmp.ne.s32.totalorder %s7775_s2, %s5098_s26  ;;  %p5102_p6 = scmp.lt.u32.totalorder %s5098_s26, %s7775_s2 }
  0x10   :  { %p5104_p7 = pnand %p5102_p6, %p5099_p5 }
  0x12   :  { %5107 = shalt.err (!%p5104_p7)
}
  0x13   :  { %s5108_s30 = scalar_lea.vmem %s38_s23, 768  ;;  %p5113_p9 = scmp.lt.s32.totalorder %s38_s23, %s38_s23 }
  0x14   :  { %p5109_p8 = scmp.ne.s32.totalorder %s38_s23, %s5108_s30  ;;  %p5114_p10 = scmp.lt.s32.totalorder %s5108_s30, %s5108_s30 }
  0x16   :  { %p5115_p11 = por %p5114_p10, %p5113_p9 }
  0x18   :  { %p5116_p12 = pnand %p5115_p11, %p5109_p8 }
  0x1a   :  { %5119 = shalt.err (!%p5116_p12)
}
  0x1b   :  { %s5150_s12 = smov 256   ;;  %s5151_s13 = smov 16  }
  0x1c   :  { %43 = dma.hbm_to_vmem [thread:$0]  %s7775_s2, 768, %s38_s23, [#allocation3], %s5150_s12, %s5150_s12, %s5151_s13  }
  0x1d   :  { %5142 = dma.done.wait [#allocation5], 16  }
  0x1e   :  { %5143 = vsyncadd [#allocation5], 4294967280 }
  0x1f   :  { %5144 = dma.done.wait [#allocation3], 768  }
  0x20   :  { %5145 = vsyncadd [#allocation3], 4294966528 }
  0x21   :  { %64 = sfence }
  0x22   :  { %v70_v0 = vld [vmem:[#allocation6 + $0x8] sm:$0xff]  ;;  %v72_v1 = vld [vmem:[#allocation6 + $0x18] sm:$0xff]  ;;  %v69_v2 = vld [vmem:[#allocation6] sm:$0xff]  ;;  %vm91_vm0 = vcmask 1040384   ;;  %v7793_v8 = vmov 0.0   ;;  %vm87_vm1 = vcmask 138240  }
  0x23   :  { %v98_v3 = vand.u32 4294901760, %v70_v0  ;;  %v102_v4 = vand.u32 4294901760, %v72_v1  ;;  %v71_v5 = vld [vmem:[#allocation6 + $0x10] sm:$0xff]  ;;  %v100_v6 = vand.u32 4294901760, %v69_v2  ;;  %v74_v7 = vld [vmem:[#allocation6 + $0x28] sm:$0x1]  ;;  %168 = vmatprep.mubr.f32.mxu0 %v7793_v8 }
  0x24   :  { %v104_v9 = vand.u32 4294901760, %v71_v5  ;;  %v96_v10 = vsel %vm91_vm0, %v74_v7, 0  ;;  %v73_v11 = vld [vmem:[#allocation6 + $0x20] sm:$0x1]  ;;  %v618_v39 = vld [vmem:[%s7777_s4 + $0x8] sm:$0xff]  ;;  %v620_v44 = vld [vmem:[%s7777_s4 + $0x18] sm:$0xff] }
  0x25   :  { %v68_v12 = vld [vmem:[%s7774_s1] sm:$0xff]  ;;  %v5234_v13 = vpack.c.bf16 %v102_v4, %v98_v3  ;;  %v5236_v14 = vsub.f32 %v70_v0, %v98_v3  ;;  %v5238_v15 = vsub.f32 %v72_v1, %v102_v4  ;;  %v5240_v16 = vsub.f32 %v69_v2, %v100_v6  ;;  %v619_v46 = vld [vmem:[%s7777_s4 + $0x10] sm:$0xff]  ;;  %v622_v49 = vld [vmem:[%s7777_s4 + $0x28] sm:$0xff]  ;;  %s3833_s23 = sld [smem:[#allocation2 + $0x1]]  ;;  %s5153_s24 = smov [#allocation7]  }
  0x26   :  { %v5242_v17 = vpack.c.bf16 %v104_v9, %v100_v6  ;;  %v5244_v18 = vsub.f32 %v71_v5, %v104_v9  ;;  %v5246_v19 = vand.u32 4294901760, %v96_v10  ;;  %v93_v20 = vsel %vm91_vm0, %v73_v11, 0  ;;  %v617_v45 = vld [vmem:[%s7777_s4] sm:$0xff]  ;;  %v624_v50 = vld [vmem:[%s7777_s4 + $0x38] sm:$0xff]  ;;  %v623_v0 = vld [vmem:[%s7777_s4 + $0x30] sm:$0xff]  ;;  %s3819_s25 = sshll.u32 %s5153_s24, 4  ;;  %s3820_s25 = int_to_ptr.vmem [resolvable:$true] %s3819_s25 }
  0x27   :  { %4259 = vmatprep.subr.bf16.mxu0 %v5234_v13  ;;  %v5250_v21 = vand.u32 4294901760, %v93_v20  ;;  %v89_v22 = vsel %vm87_vm1, %v68_v12, 0  ;;  %v7791_v23 = vand.u32 4294901760, %v5236_v14  ;;  %v7790_v24 = vand.u32 4294901760, %v5238_v15  ;;  %v621_v59 = vld [vmem:[%s7777_s4 + $0x20] sm:$0xff]  ;;  %v626_v1 = vld [vmem:[%s7777_s4 + $0x48] sm:$0xff]  ;;  %p5125_p0 = scmp.lt.s32.totalorder %s3820_s25, %s3820_s25 }
  0x28   :  { %4261 = vmatpush1.bf16.msra.mxu0 %v5242_v17  ;;  %v5255_v25 = vand.u32 4294901760, %v89_v22  ;;  %v7789_v26 = vand.u32 4294901760, %v5240_v16  ;;  %v7788_v27 = vand.u32 4294901760, %v5244_v18  ;;  %v5260_v28 = vsub.f32 %v96_v10, %v5246_v19  ;;  %v628_v2 = vld [vmem:[%s7777_s4 + $0x58] sm:$0xff]  ;;  %v625_v7 = vld [vmem:[%s7777_s4 + $0x40] sm:$0xff]  ;;  %v627_v9 = vld [vmem:[%s7777_s4 + $0x50] sm:$0xff] }
  0x29   :  { %107 = vmatprep.subr.mxu0 %v5246_v19  ;;  %v5264_v29 = vsub.f32 %v93_v20, %v5250_v21  ;;  %v183_v30 = vsub.f32 %v5236_v14, %v7791_v23  ;;  %v195_v31 = vsub.f32 %v5238_v15, %v7790_v24  ;;  %v693_v54 = vand.u32 4294901760, %v618_v39  ;;  %v630_v10 = vld [vmem:[%s7777_s4 + $0x68] sm:$0xff]  ;;  %v5498_v23 = vld [vmem:[%s7777_s4 + $0xe0] sm:$0xff]  ;;  %s5120_s26 = scalar_lea.vmem %s3820_s25, 128 }
  0x2a   :  { %v5273_v32 = vsub.f32 %v89_v22, %v5255_v25  ;;  %v189_v33 = vsub.f32 %v5240_v16, %v7789_v26  ;;  %v201_v34 = vsub.f32 %v5244_v18, %v7788_v27  ;;  %v7786_v35 = vand.u32 4294901760, %v5260_v28  ;;  %v5470_v27 = vld [vmem:[%s7777_s4 + $0xd0] sm:$0xff]  ;;  %v5475_v26 = vld [vmem:[%s7777_s4 + $0xe8] sm:$0xff]  ;;  %p5121_p13 = scmp.ne.s32.totalorder %s3820_s25, %s5120_s26  ;;  %p5126_p1 = scmp.lt.s32.totalorder %s5120_s26, %s5120_s26 }
  0x2b   :  { %v184_v36 = vand.u32 4294901760, %v183_v30  ;;  %v196_v37 = vand.u32 4294901760, %v195_v31  ;;  %v7785_v38 = vand.u32 4294901760, %v5264_v29  ;;  %v697_v56 = vand.u32 4294901760, %v620_v44  ;;  %v632_v30 = vld [vmem:[%s7777_s4 + $0x78] sm:$0xff] }
  0x2c   :  { %109 = vmatpush1.msra.mxu0 %v5250_v21  ;;  %v7787_v40 = vand.u32 4294901760, %v5273_v32  ;;  %v190_v41 = vand.u32 4294901760, %v189_v33  ;;  %v202_v42 = vand.u32 4294901760, %v201_v34  ;;  %v207_v43 = vsub.f32 %v5260_v28, %v7786_v35  ;;  %p5127_p2 = por %p5126_p1, %p5125_p0 }
  0x2d   :  { %v4262_v47 = vpack.c.bf16 %v196_v37, %v184_v36  ;;  %v213_v48 = vsub.f32 %v5264_v29, %v7785_v38  ;;  %v695_v57 = vand.u32 4294901760, %v617_v45  ;;  %v699_v58 = vand.u32 4294901760, %v619_v46 }
  0x2e   :  { %v172_v51 = vsub.f32 %v5273_v32, %v7787_v40  ;;  %v4264_v52 = vpack.c.bf16 %v202_v42, %v190_v41  ;;  %v208_v53 = vand.u32 4294901760, %v207_v43  ;;  %v5315_v61 = vsub.f32 %v618_v39, %v693_v54  ;;  %p5128_p3 = pnand %p5127_p2, %p5121_p13 }
  0x2f   :  { %4263 = vmatprep.subr.bf16.mxu0 %v4262_v47  ;;  %v214_v55 = vand.u32 4294901760, %v213_v48  ;;  %v701_v62 = vand.u32 4294901760, %v622_v49  ;;  %v705_v63 = vand.u32 4294901760, %v624_v50  ;;  %v5326_v3 = vpack.c.bf16 %v697_v56, %v693_v54  ;;  %v629_v47 = vld [vmem:[%s7777_s4 + $0x60] sm:$0xff]  ;;  %v631_v48 = vld [vmem:[%s7777_s4 + $0x70] sm:$0xff]  ;;  %v636_v54 = vld [vmem:[%s7777_s4 + $0x98] sm:$0xff] }
  0x30   :  { %v173_v60 = vand.u32 4294901760, %v172_v51  ;;  %v5328_v4 = vsub.f32 %v620_v44, %v697_v56  ;;  %v5330_v5 = vpack.c.bf16 %v699_v58, %v695_v57  ;;  %v5332_v6 = vsub.f32 %v617_v45, %v695_v57  ;;  %v5389_v56 = vld [vmem:[%s7777_s4 + $0x80] sm:$0xff] }
  0x31   :  { %8198 = vst [vmem:[#allocation11_spill] sm:$0xff] %v5326_v3  ;;  %v5343_v11 = vsub.f32 %v619_v46, %v699_v58  ;;  %v5345_v12 = vpack.c.bf16 %v705_v63, %v701_v62  ;;  %v5347_v20 = vsub.f32 %v622_v49, %v701_v62  ;;  %v5349_v22 = vsub.f32 %v624_v50, %v705_v63  ;;  %v5402_v62 = vld [vmem:[%s7777_s4 + $0x90] sm:$0xff]  ;;  %v5407_v63 = vld [vmem:[%s7777_s4 + $0xa8] sm:$0xff] }
  0x32   :  { %8199 = vst [vmem:[#allocation12_spill] sm:$0xff] %v5330_v5  ;;  %174 = vmatmul.mubr.f32.vlgmr.msra.gmra.mrb[0].mxu0 %v173_v60  ;;  %v703_v31 = vand.u32 4294901760, %v621_v59  ;;  %v707_v33 = vand.u32 4294901760, %v623_v0  ;;  %v709_v34 = vand.u32 4294901760, %v626_v1  ;;  %v713_v36 = vand.u32 4294901760, %v628_v2  ;;  %4283 = vmatprep.subr.bf16.mxu1 %v5326_v3  ;;  %v5535_v3 = vld [vmem:[%s7777_s4 + $0x118] sm:$0xff] }
  0x33   :  { %8200 = vst [vmem:[#allocation13_spill] sm:$0xff] %v5345_v12  ;;  %8201 = vst [vmem:[#allocation14_spill] sm:$0xff] %v5349_v22  ;;  %4265 = vmatpush1.bf16.msra.mxu0 %v4264_v52  ;;  %274 = vmatprep.mubr.f32.mxu0 %v7793_v8  ;;  %v4266_v37 = vpack.c.bf16 %v5238_v15, %v5236_v14  ;;  %v711_v39 = vand.u32 4294901760, %v625_v7  ;;  %v715_v41 = vand.u32 4294901760, %v627_v9  ;;  %v717_v42 = vand.u32 4294901760, %v630_v10 }
  0x34   :  { %209 = vmatprep.subr.mxu0 %v208_v53  ;;  %4285 = vmatpush1.bf16.msra.mxu1 %v5330_v5  ;;  %v5359_v43 = vpack.c.bf16 %v707_v33, %v703_v31  ;;  %v5361_v44 = vsub.f32 %v621_v59, %v703_v31  ;;  %v5363_v45 = vsub.f32 %v623_v0, %v707_v33  ;;  %v721_v46 = vand.u32 4294901760, %v632_v30  ;;  %v634_v53 = vld [vmem:[%s7777_s4 + $0x88] sm:$0xff]  ;;  %v5426_v33 = vld [vmem:[%s7777_s4 + $0xb0] sm:$0xff] }
  0x35   :  { %4287 = vmatprep.subr.bf16.mxu1 %v5345_v12  ;;  %v5372_v49 = vpack.c.bf16 %v713_v36, %v709_v34  ;;  %v5374_v50 = vsub.f32 %v626_v1, %v709_v34  ;;  %v5376_v51 = vsub.f32 %v628_v2, %v713_v36  ;;  %v5378_v52 = vsub.f32 %v625_v7, %v711_v39  ;;  %v640_v2 = vld [vmem:[%s7777_s4 + $0xb8] sm:$0xff]  ;;  %v5417_v7 = vld [vmem:[%s7777_s4 + $0xa0] sm:$0xff] }
  0x36   :  { %8202 = vst [vmem:[#allocation15_spill] sm:$0xff] %v5359_v43  ;;  %8203 = vst [vmem:[#allocation16_spill] sm:$0xff] %v5361_v44  ;;  %v4268_v57 = vpack.c.bf16 %v5244_v18, %v5240_v16  ;;  %v5393_v58 = vsub.f32 %v627_v9, %v715_v41  ;;  %v5395_v59 = vsub.f32 %v630_v10, %v717_v42  ;;  %v719_v0 = vand.u32 4294901760, %v629_v47 }
  0x37   :  { %8204 = vst [vmem:[#allocation17_spill] sm:$0xff] %v5363_v45  ;;  %8205 = vst [vmem:[#allocation18_spill] sm:$0xff] %v5372_v49  ;;  %215 = vmatpush1.msra.mxu0 %v214_v55  ;;  %v5397_v60 = vsub.f32 %v632_v30, %v721_v46  ;;  %v5409_v55 = vpack.c.bf16 %v715_v41, %v711_v39  ;;  %v723_v1 = vand.u32 4294901760, %v631_v48  ;;  %v725_v10 = vand.u32 4294901760, %v634_v53 }
  0x38   :  { %8206 = vst [vmem:[#allocation19_spill] sm:$0xff] %v5374_v50  ;;  %8207 = vst [vmem:[#allocation20_spill] sm:$0xff] %v5376_v51  ;;  %4267 = vmatprep.subr.bf16.mxu0 %v4266_v37  ;;  %4289 = vmatpush1.bf16.msra.mxu1 %v5359_v43  ;;  %v5420_v9 = vpack.c.bf16 %v721_v46, %v717_v42  ;;  %v729_v30 = vand.u32 4294901760, %v636_v54  ;;  %v727_v31 = vand.u32 4294901760, %v5389_v56  ;;  %v731_v37 = vand.u32 4294901760, %v5402_v62 }
  0x39   :  { %8208 = vst [vmem:[#allocation21_spill] sm:$0xff] %v5378_v52  ;;  %8209 = vst [vmem:[#allocation22_spill] sm:$0xff] %v5393_v58  ;;  %4291 = vmatprep.subr.bf16.mxu1 %v5372_v49  ;;  %v5430_v34 = vsub.f32 %v629_v47, %v719_v0  ;;  %v5432_v36 = vsub.f32 %v631_v48, %v723_v1  ;;  %v733_v39 = vand.u32 4294901760, %v5407_v63  ;;  %v737_v46 = vand.u32 4294901760, %v640_v2  ;;  %v5445_v47 = vld [vmem:[%s7777_s4 + $0xc8] sm:$0xff]  ;;  %v5450_v48 = vld [vmem:[%s7777_s4 + $0xd8] sm:$0xff] }
  0x3a   :  { %8210 = vst [vmem:[#allocation23_spill] sm:$0xff] %v5395_v59  ;;  %8211 = vst [vmem:[#allocation24_spill] sm:$0xff] %v5397_v60  ;;  %276 = vmatmul.mubr.f32.vlgmr.msra.gmra.mrb[0].mxu0 %v5255_v25  ;;  %v5437_v41 = vsub.f32 %v634_v53, %v725_v10  ;;  %v5439_v42 = vsub.f32 %v636_v54, %v729_v30  ;;  %v7792_v38 = vand.u32 4294901760, %v5417_v7  ;;  %v5455_v53 = vld [vmem:[%s7777_s4 + $0xc0] sm:$0xff]  ;;  %v739_v40 = vand.u32 4294901760, %v5426_v33 }
  0x3b   :  { %8212 = vst [vmem:[#allocation25_spill] sm:$0xff] %v5409_v55  ;;  %8213 = vst [vmem:[#allocation26_spill] sm:$0xff] %v5420_v9  ;;  %4269 = vmatpush1.bf16.msra.mxu0 %v4268_v57  ;;  %358 = vmatprep.mubr.f32.mxu0 %v7793_v8  ;;  %v5458_v54 = vpack.c.bf16 %v723_v1, %v719_v0  ;;  %v5461_v57 = vsub.f32 %v5389_v56, %v727_v31  ;;  %v5480_v56 = vld [vmem:[%s7777_s4 + $0xf8] sm:$0xff]  ;;  %v749_v8 = vand.u32 4294901760, %v5475_v26  ;;  %vm3806_vm2 = vcmask 48128  }
  0x3c   :  { %8214 = vst [vmem:[#allocation27_spill] sm:$0xff] %v5430_v34  ;;  %8215 = vst [vmem:[#allocation28_spill] sm:$0xff] %v5432_v36  ;;  %296 = vmatprep.subr.mxu0 %v5260_v28  ;;  %v5464_v35 = vsub.f32 %v5402_v62, %v731_v37  ;;  %4293 = vmatpush1.bf16.msra.mxu1 %v5409_v55  ;;  %v5483_v62 = vpack.c.bf16 %v729_v30, %v725_v10  ;;  %v743_v30 = vand.u32 4294901760, %v5455_v53 }
  0x3d   :  { %8216 = vst [vmem:[#allocation29_spill] sm:$0xff] %v5437_v41  ;;  %8217 = vst [vmem:[#allocation30_spill] sm:$0xff] %v5439_v42  ;;  %v5486_v0 = vsub.f32 %v5407_v63, %v733_v39  ;;  %v5488_v1 = vsub.f32 %v640_v2, %v737_v46  ;;  %v5493_v24 = vsub.f32 %v5417_v7, %v7792_v38  ;;  %4295 = vmatprep.subr.bf16.mxu1 %v5420_v9  ;;  %v5514_v9 = vld [vmem:[%s7777_s4 + $0xf0] sm:$0xff] }
  0x3e   :  { %8218 = vst [vmem:[#allocation31_spill] sm:$0xff] %v5458_v54  ;;  %8219 = vst [vmem:[#allocation32_spill] sm:$0xff] %v5461_v57  ;;  %v5502_v10 = vsub.f32 %v5426_v33, %v739_v40  ;;  %v741_v63 = vand.u32 4294901760, %v5445_v47  ;;  %v745_v2 = vand.u32 4294901760, %v5450_v48  ;;  %v747_v38 = vand.u32 4294901760, %v5470_v27  ;;  %v5519_v33 = vld [vmem:[%s7777_s4 + $0x108] sm:$0xff] }
  0x3f   :  { %8220 = vst [vmem:[#allocation33_spill] sm:$0xff] %v5464_v35  ;;  %8221 = vst [vmem:[#allocation34_spill] sm:$0xff] %v5483_v62  ;;  %299 = vmatpush1.msra.mxu0 %v5264_v29  ;;  %v753_v55 = vand.u32 4294901760, %v5480_v56  ;;  %v5529_v12 = vsub.f32 %v5455_v53, %v743_v30  ;;  %v5550_v53 = vpack.c.bf16 %v737_v46, %v733_v39  ;;  %v8236_v46 = vmov 0.0  }
  0x40   :  { %8222 = vst [vmem:[#allocation35_spill] sm:$0xff] %v5486_v0  ;;  %8223 = vst [vmem:[#allocation36_spill] sm:$0xff] %v5488_v1  ;;  %4271 = vmatprep.subr.bf16.mxu0 %v5234_v13  ;;  %v5523_v49 = vsub.f32 %v5445_v47, %v741_v63  ;;  %v5526_v43 = vsub.f32 %v5450_v48, %v745_v2  ;;  %v5545_v47 = vld [vmem:[%s7777_s4 + $0x110] sm:$0xff]  ;;  %4297 = vmatpush1.bf16.msra.mxu1 %v5458_v54  ;;  %v8237_v54 = vand.u32 4294901760, %v5236_v14 }
  0x41   :  { %8224 = vst [vmem:[#allocation37_spill] sm:$0xff] %v5493_v24  ;;  %8225 = vst [vmem:[#allocation38_spill] sm:$0xff] %v5502_v10  ;;  %v5540_v10 = vld [vmem:[%s7777_s4 + $0x100] sm:$0xff]  ;;  %v5548_v48 = vpack.c.bf16 %v731_v37, %v727_v31  ;;  %v5553_v5 = vsub.f32 %v5470_v27, %v747_v38  ;;  %4299 = vmatprep.subr.bf16.mxu1 %v5483_v62  ;;  %v5571_v27 = vsub.f32 %v5480_v56, %v753_v55 }
  0x42   :  { %8226 = vst [vmem:[#allocation39_spill] sm:$0xff] %v5523_v49  ;;  %8227 = vst [vmem:[#allocation40_spill] sm:$0xff] %v5526_v43  ;;  %v5561_v43 = vld [vmem:[%s7777_s4 + $0x128] sm:$0xff]  ;;  %v5566_v49 = vld [vmem:[%s7777_s4 + $0x138] sm:$0xff]  ;;  %361 = vmatmul.mubr.f32.vlgmr.msra.gmra.mrb[0].mxu0 %v5273_v32  ;;  %v8234_v31 = vand.u32 4294901760, %v5498_v23  ;;  %v8238_v62 = vand.u32 4294901760, %v5238_v15  ;;  %v5671_v24 = vpack.c.bf16 %v753_v55, %v749_v8 }
  0x43   :  { %8228 = vst [vmem:[#allocation41_spill] sm:$0xff] %v5529_v12  ;;  %8229 = vst [vmem:[#allocation42_spill] sm:$0xff] %v5548_v48  ;;  %v5556_v12 = vsub.f32 %v5475_v26, %v749_v8  ;;  %4273 = vmatpush1.bf16.msra.mxu0 %v5242_v17  ;;  %437 = vmatprep.mubr.f32.mxu0 %v8236_v46  ;;  %v761_v56 = vand.u32 4294901760, %v5535_v3  ;;  %v765_v15 = vand.u32 4294901760, %v5561_v43  ;;  %v8257_v8 = vand.u32 4294901760, %v5273_v32 }
  0x44   :  { %8230 = vst [vmem:[#allocation43_spill] sm:$0xff] %v5550_v53  ;;  %8231 = vst [vmem:[#allocation44_spill] sm:$0xff] %v5553_v5  ;;  %v5577_v37 = vsub.f32 %v5498_v23, %v8234_v31  ;;  %376 = vmatprep.subr.mxu0 %v5246_v19  ;;  %v8239_v31 = vand.u32 4294901760, %v5514_v9  ;;  %4301 = vmatpush1.bf16.msra.mxu1 %v5548_v48  ;;  %v658_v5 = vld [vmem:[%s7777_s4 + $0x148] sm:$0xff]  ;;  %v660_v48 = vld [vmem:[%s7777_s4 + $0x158] sm:$0xff]  ;;  %v8258_v32 = vand.u32 4294901760, %v5260_v28 }
  0x45   :  { %8232 = vst [vmem:[#allocation45_spill] sm:$0xff] %v5556_v12  ;;  %8233 = vst [vmem:[#allocation46_spill] sm:$0xff] %v5571_v27  ;;  %v4274_v12 = vpack.c.bf16 %v8238_v62, %v8237_v54  ;;  %v769_v54 = vand.u32 4294901760, %v5566_v49  ;;  %v5605_v62 = vld [vmem:[%s7777_s4 + $0x120] sm:$0xff]  ;;  %v5610_v27 = vld [vmem:[%s7777_s4 + $0x130] sm:$0xff]  ;;  %v5618_v26 = vsub.f32 %v5535_v3, %v761_v56  ;;  %4303 = vmatprep.subr.bf16.mxu1 %v5550_v53  ;;  %v8262_v28 = vand.u32 4294901760, %v5519_v33 }
  0x46   :  { %8235 = vst [vmem:[#allocation47_spill] sm:$0xff] %v5577_v37  ;;  %v5593_v39 = vsub.f32 %v5514_v9, %v8239_v31  ;;  %v8241_v37 = vand.u32 4294901760, %v5519_v33  ;;  %v8243_v31 = vand.u32 4294901760, %v5417_v7  ;;  %v5637_v3 = vpack.c.bf16 %v745_v2, %v741_v63  ;;  %v662_v63 = vld [vmem:[%s7777_s4 + $0x168] sm:$0xff]  ;;  %8256 = vst [vmem:[#allocation58_spill] sm:$0xff] %v5671_v24 }
  0x47   :  { %8245 = vst [vmem:[#allocation51_spill] sm:$0xff] %v5618_v26  ;;  %v8249_v7 = vand.u32 4294901760, %v5545_v47  ;;  %v659_v26 = vld [vmem:[%s7777_s4 + $0x150] sm:$0xff]  ;;  %378 = vmatpush1.msra.mxu0 %v5250_v21  ;;  %v8253_v2 = vand.u32 4294901760, %v5240_v16  ;;  %v773_v16 = vand.u32 4294901760, %v658_v5 }
  0x48   :  { %8240 = vst [vmem:[#allocation48_spill] sm:$0xff] %v5593_v39  ;;  %v5598_v14 = vsub.f32 %v5519_v33, %v8241_v37  ;;  %v5615_v37 = vpack.c.bf16 %v739_v40, %v8243_v31  ;;  %v5634_v40 = vld [vmem:[%s7777_s4 + $0x140] sm:$0xff]  ;;  %8248 = vst [vmem:[#allocation53_spill] sm:$0xff] %v5637_v3  ;;  %v5645_v31 = vsub.f32 %v5561_v43, %v765_v15  ;;  %4275 = vmatprep.subr.bf16.mxu0 %v4274_v12 }
  0x49   :  { %v5661_v43 = vpack.c.bf16 %v747_v38, %v743_v30  ;;  %v775_v38 = vand.u32 4294901760, %v5634_v40  ;;  %v663_v30 = vld [vmem:[%s7777_s4 + $0x170] sm:$0xff]  ;;  %v779_v1 = vand.u32 4294901760, %v659_v26  ;;  %v781_v12 = vand.u32 4294901760, %v662_v63 }
  0x4a   :  { %8242 = vst [vmem:[#allocation49_spill] sm:$0xff] %v5598_v14  ;;  %8244 = vst [vmem:[#allocation50_spill] sm:$0xff] %v5615_v37  ;;  %v8246_v14 = vand.u32 4294901760, %v5540_v10  ;;  %4305 = vmatpush1.bf16.msra.mxu1 %v5615_v37  ;;  %441 = vmatmul.mubr.f32.vlgmr.msra.gmra.mrb[0].mxu0 %v8257_v8  ;;  %v5687_v55 = vsub.f32 %v658_v5, %v773_v16  ;;  %v787_v37 = vand.u32 4294901760, %v663_v30 }
  0x4b   :  { %8251 = vst [vmem:[#allocation55_spill] sm:$0xff] %v5645_v31  ;;  %8255 = vst [vmem:[#allocation57_spill] sm:$0xff] %v5661_v43  ;;  %v664_v31 = vld [vmem:[%s7777_s4 + $0x178] sm:$0xff]  ;;  %4307 = vmatprep.subr.bf16.mxu1 %v5637_v3  ;;  %529 = vmatprep.mubr.f32.mxu0 %v8236_v46  ;;  %v5699_v8 = vsub.f32 %v662_v63, %v781_v12  ;;  %v8260_v3 = vand.u32 4294901760, %v5514_v9  ;;  %v5717_v63 = vpack.c.bf16 %v761_v56, %v8262_v28 }
  0x4c   :  { %v5623_v39 = vsub.f32 %v5540_v10, %v8246_v14  ;;  %v5642_v14 = vsub.f32 %v5545_v47, %v8249_v7  ;;  %v8254_v7 = vand.u32 4294901760, %v5244_v18  ;;  %v777_v18 = vand.u32 4294901760, %v660_v48  ;;  %v676_v28 = vld [vmem:[%s7777_s4 + $0x1d8] sm:$0xff] }
  0x4d   :  { %v785_v35 = vand.u32 4294901760, %v664_v31  ;;  %8263 = vst [vmem:[#allocation60_spill] sm:$0xff] %v5717_v63  ;;  %v8266_v9 = vand.u32 4294901760, %v5545_v47  ;;  %v5731_v33 = vpack.c.bf16 %v769_v54, %v765_v15 }
  0x4e   :  { %8247 = vst [vmem:[#allocation52_spill] sm:$0xff] %v5623_v39  ;;  %8250 = vst [vmem:[#allocation54_spill] sm:$0xff] %v5642_v14  ;;  %v5648_v39 = vsub.f32 %v5566_v49, %v769_v54  ;;  %v4276_v53 = vpack.c.bf16 %v8254_v7, %v8253_v2  ;;  %v767_v49 = vand.u32 4294901760, %v5605_v62  ;;  %v661_v14 = vld [vmem:[%s7777_s4 + $0x160] sm:$0xff]  ;;  %v5689_v0 = vsub.f32 %v660_v48, %v777_v18  ;;  %v670_v54 = vld [vmem:[%s7777_s4 + $0x1a8] sm:$0xff] }
  0x4f   :  { %v783_v57 = vand.u32 4294901760, %v661_v14  ;;  %v5701_v5 = vsub.f32 %v664_v31, %v785_v35  ;;  %4309 = vmatpush1.bf16.msra.mxu1 %v5661_v43  ;;  %v8264_v31 = vand.u32 4294901760, %v5264_v29  ;;  %8268 = vst [vmem:[#allocation62_spill] sm:$0xff] %v5731_v33  ;;  %v5740_v29 = vpack.c.bf16 %v777_v18, %v773_v16  ;;  %v669_v16 = vld [vmem:[%s7777_s4 + $0x1a0] sm:$0xff]  ;;  %v671_v18 = vld [vmem:[%s7777_s4 + $0x1b0] sm:$0xff] }
  0x50   :  { %8252 = vst [vmem:[#allocation56_spill] sm:$0xff] %v5648_v39  ;;  %v771_v39 = vand.u32 4294901760, %v5610_v27  ;;  %v5679_v2 = vsub.f32 %v5605_v62, %v767_v49  ;;  %4277 = vmatpush1.bf16.msra.mxu0 %v4276_v53  ;;  %v5693_v62 = vsub.f32 %v5634_v40, %v775_v38  ;;  %v8259_v53 = vand.u32 4294901760, %v5498_v23  ;;  %4311 = vmatprep.subr.bf16.mxu1 %v5671_v24 }
  0x51   :  { %466 = vmatprep.subr.mxu0 %v8258_v32  ;;  %v5703_v48 = vsub.f32 %v661_v14, %v783_v57  ;;  %v8265_v23 = vand.u32 4294901760, %v5540_v10  ;;  %8270 = vst [vmem:[#allocation64_spill] sm:$0xff] %v5740_v29  ;;  %v5744_v10 = vpack.c.bf16 %v779_v1, %v775_v38  ;;  %v797_v14 = vand.u32 4294901760, %v670_v54 }
  0x52   :  { %v5682_v7 = vsub.f32 %v5610_v27, %v771_v39  ;;  %v5695_v27 = vsub.f32 %v659_v26, %v779_v1  ;;  %v5710_v40 = vpack.c.bf16 %v8260_v3, %v8259_v53  ;;  %v5712_v26 = vsub.f32 %v663_v30, %v787_v37  ;;  %v674_v53 = vld [vmem:[%s7777_s4 + $0x1c8] sm:$0xff] }
  0x53   :  { %v5727_v3 = vpack.c.bf16 %v8266_v9, %v8265_v23  ;;  %8271 = vst [vmem:[#allocation65_spill] sm:$0xff] %v5744_v10  ;;  %v799_v38 = vand.u32 4294901760, %v669_v16  ;;  %v803_v30 = vand.u32 4294901760, %v671_v18  ;;  %v809_v23 = vand.u32 4294901760, %v676_v28  ;;  %v673_v9 = vld [vmem:[%s7777_s4 + $0x1c0] sm:$0xff] }
  0x54   :  { %8261 = vst [vmem:[#allocation59_spill] sm:$0xff] %v5710_v40  ;;  %470 = vmatpush1.msra.mxu0 %v8264_v31  ;;  %4313 = vmatpush1.bf16.msra.mxu1 %v5710_v40  ;;  %v805_v31 = vand.u32 4294901760, %v674_v53  ;;  %v7870_v40 = vand.u32 4294901760, %v5315_v61  ;;  %v7914_v24 = vand.u32 4294901760, %v5430_v34 }
  0x55   :  { %4279 = vmatprep.subr.bf16.mxu0 %v5234_v13  ;;  %8267 = vst [vmem:[#allocation61_spill] sm:$0xff] %v5727_v3  ;;  %531 = vmatmul.mubr.f32.vlgmr.msra.gmra.mrb[0].mxu0 %v5255_v25  ;;  %v5737_v13 = vpack.c.bf16 %v771_v39, %v767_v49  ;;  %v5787_v32 = vpack.c.bf16 %v803_v30, %v799_v38 }
  0x56   :  { %4315 = vmatprep.subr.bf16.mxu1 %v5717_v63  ;;  %4281 = vmatpush1.bf16.msra.mxu0 %v5242_v17  ;;  %v5748_v17 = vpack.c.bf16 %v785_v35, %v781_v12  ;;  %v665_v35 = vld [vmem:[%s7777_s4 + $0x180] sm:$0xff]  ;;  %v5821_v63 = vsub.f32 %v670_v54, %v797_v14 }
  0x57   :  { %607 = vmatprep.mubr.f32.mxu0 %v8236_v46  ;;  %546 = vmatprep.subr.mxu0 %v5246_v19  ;;  %8269 = vst [vmem:[#allocation63_spill] sm:$0xff] %v5737_v13  ;;  %v5751_v19 = vpack.c.bf16 %v787_v37, %v783_v57  ;;  %v667_v57 = vld [vmem:[%s7777_s4 + $0x190] sm:$0xff]  ;;  %v791_v39 = vand.u32 4294901760, %v665_v35  ;;  %v672_v37 = vld [vmem:[%s7777_s4 + $0x1b8] sm:$0xff]  ;;  %8277 = vst [vmem:[#allocation71_spill] sm:$0xff] %v5787_v32 }
  0x58   :  { %4317 = vmatpush1.bf16.msra.mxu1 %v5727_v3  ;;  %8272 = vst [vmem:[#allocation66_spill] sm:$0xff] %v5748_v17  ;;  %v795_v46 = vand.u32 4294901760, %v667_v57  ;;  %v801_v49 = vand.u32 4294901760, %v672_v37 }
  0x59   :  { %4319 = vmatprep.subr.bf16.mxu1 %v5731_v33  ;;  %8273 = vst [vmem:[#allocation67_spill] sm:$0xff] %v5751_v19  ;;  %v680_v33 = vld [vmem:[%s7777_s4 + $0x1f8] sm:$0xff]  ;;  %v5817_v3 = vsub.f32 %v665_v35, %v791_v39  ;;  %v5834_v35 = vsub.f32 %v671_v18, %v803_v30 }
  0x5a   :  { %548 = vmatpush1.msra.mxu0 %v5250_v21  ;;  %v666_v21 = vld [vmem:[%s7777_s4 + $0x188] sm:$0xff]  ;;  %v5769_v15 = vpack.c.bf16 %v795_v46, %v791_v39  ;;  %v5785_v12 = vpack.c.bf16 %v801_v49, %v797_v14  ;;  %v5838_v39 = vsub.f32 %v676_v28, %v809_v23  ;;  %v817_v14 = vand.u32 4294901760, %v680_v33 }
  0x5b   :  { %v789_v1 = vand.u32 4294901760, %v666_v21  ;;  %8280 = vst [vmem:[#allocation74_spill] sm:$0xff] %v5834_v35 }
  0x5c   :  { %4321 = vmatpush1.bf16.msra.mxu1 %v5737_v13  ;;  %8275 = vst [vmem:[#allocation69_spill] sm:$0xff] %v5769_v15  ;;  %8276 = vst [vmem:[#allocation70_spill] sm:$0xff] %v5785_v12  ;;  %v678_v13 = vld [vmem:[%s7777_s4 + $0x1e8] sm:$0xff]  ;;  %v5851_v30 = vsub.f32 %v680_v33, %v817_v14 }
  0x5d   :  { %609 = vmatmul.mubr.f32.vlgmr.msra.gmra.mrb[0].mxu0 %v5255_v25  ;;  %4323 = vmatprep.subr.bf16.mxu1 %v5740_v29  ;;  %v668_v25 = vld [vmem:[%s7777_s4 + $0x198] sm:$0xff] }
  0x5e   :  { %v793_v47 = vand.u32 4294901760, %v668_v25  ;;  %8283 = vst [vmem:[#allocation77_spill] sm:$0xff] %v5851_v30 }
  0x60   :  { %4325 = vmatpush1.bf16.msra.mxu1 %v5744_v10  ;;  %v5767_v56 = vpack.c.bf16 %v793_v47, %v789_v1  ;;  %v5805_v10 = vsub.f32 %v666_v21, %v789_v1  ;;  %v5807_v29 = vsub.f32 %v668_v25, %v793_v47  ;;  %v5823_v21 = vsub.f32 %v672_v37, %v801_v49  ;;  %v677_v25 = vld [vmem:[%s7777_s4 + $0x1e0] sm:$0xff]  ;;  %v679_v1 = vld [vmem:[%s7777_s4 + $0x1f0] sm:$0xff] }
  0x61   :  { %4327 = vmatprep.subr.bf16.mxu1 %v5748_v17  ;;  %v5803_v17 = vpack.c.bf16 %v809_v23, %v805_v31  ;;  %v5832_v47 = vsub.f32 %v669_v16, %v799_v38  ;;  %v813_v37 = vand.u32 4294901760, %v678_v13  ;;  %v815_v49 = vand.u32 4294901760, %v677_v25 }
  0x62   :  { %8274 = vst [vmem:[#allocation68_spill] sm:$0xff] %v5767_v56  ;;  %v7869_v16 = vand.u32 4294901760, %v5328_v4  ;;  %v77_v23 = vlaneseq }
  0x63   :  { %8278 = vst [vmem:[#allocation72_spill] sm:$0xff] %v5803_v17  ;;  %v5847_v18 = vpack.c.bf16 %v817_v14, %v813_v37  ;;  %v5849_v38 = vsub.f32 %v678_v13, %v813_v37 }
  0x64   :  { %4329 = vmatpush1.bf16.msra.mxu1 %v5751_v19  ;;  %v853_v28 = vsub.f32 %v5328_v4, %v7869_v16 }
  0x65   :  { %4331 = vmatprep.subr.bf16.mxu1 %v5767_v56  ;;  %v807_v56 = vand.u32 4294901760, %v673_v9  ;;  %8282 = vst [vmem:[#allocation76_spill] sm:$0xff] %v5847_v18 }
  0x66   :  { %v854_v13 = vand.u32 4294901760, %v853_v28  ;;  %v7876_v28 = vand.u32 4294901760, %v5343_v11 }
  0x68   :  { %4333 = vmatpush1.bf16.msra.mxu1 %v5769_v15  ;;  %v675_v15 = vld [vmem:[%s7777_s4 + $0x1d0] sm:$0xff] }
  0x69   :  { %4335 = vmatprep.subr.bf16.mxu1 %v5785_v12  ;;  %v811_v19 = vand.u32 4294901760, %v675_v15 }
  0x6b   :  { %v5809_v12 = vpack.c.bf16 %v811_v19, %v807_v56  ;;  %v5843_v54 = vsub.f32 %v675_v15, %v811_v19  ;;  %v841_v15 = vsub.f32 %v5315_v61, %v7870_v40  ;;  %v7887_v40 = vand.u32 4294901760, %v5361_v44 }
  0x6c   :  { %4337 = vmatpush1.bf16.msra.mxu1 %v5787_v32  ;;  %v5819_v32 = vsub.f32 %v667_v57, %v795_v46  ;;  %v5836_v57 = vsub.f32 %v674_v53, %v805_v31  ;;  %v5841_v46 = vsub.f32 %v673_v9, %v807_v56  ;;  %v5855_v56 = vsub.f32 %v677_v25, %v815_v49  ;;  %v75_v25 = vld [vmem:[%s7776_s3] sm:$0x3] }
  0x6d   :  { %8279 = vst [vmem:[#allocation73_spill] sm:$0xff] %v5809_v12  ;;  %4339 = vmatprep.subr.bf16.mxu1 %v5803_v17  ;;  %8281 = vst [vmem:[#allocation75_spill] sm:$0xff] %v5843_v54  ;;  %v819_v17 = vand.u32 4294901760, %v679_v1  ;;  %v842_v33 = vand.u32 4294901760, %v841_v15  ;;  %v5867_v9 = vshrl.u32 %v77_v23, 7  ;;  %v7882_v23 = vand.u32 4294901760, %v5349_v22 }
  0x6f   :  { %v5853_v53 = vpack.c.bf16 %v819_v17, %v815_v49  ;;  %v5857_v19 = vsub.f32 %v679_v1, %v819_v17  ;;  %v4346_v31 = vpack.c.bf16 %v854_v13, %v842_v33  ;;  %8286 = vst [vmem:[#allocation80_spill] sm:$0xff] %v5867_v9  ;;  %v7873_v17 = vsub.s32 0, %v5867_v9 }
  0x70   :  { %4341 = vmatpush1.bf16.msra.mxu1 %v5809_v12  ;;  %v7874_v1 = vsub.s32 1, %v5867_v9  ;;  %v7875_v49 = vand.u32 4294901760, %v5332_v6  ;;  %v8290_v9 = vand.u32 4294901760, %v5363_v45  ;;  %v7909_v12 = vand.u32 4294901760, %v5378_v52 }
  0x71   :  { %8284 = vst [vmem:[#allocation78_spill] sm:$0xff] %v5853_v53  ;;  %8285 = vst [vmem:[#allocation79_spill] sm:$0xff] %v5857_v19  ;;  %4343 = vmatprep.subr.bf16.mxu1 %v5847_v18  ;;  %v80_v37 = vrot.slane %v75_v25, %v7873_v17  ;;  %v7901_v18 = vand.u32 4294901760, %v5376_v51 }
  0x72   :  { %v84_v14 = vrot.slane %v75_v25, %v7874_v1  ;;  %v847_v17 = vsub.f32 %v5332_v6, %v7875_v49 }
  0x74   :  { %4345 = vmatpush1.bf16.msra.mxu1 %v5853_v53  ;;  %v848_v25 = vand.u32 4294901760, %v847_v17  ;;  %v8292_v17 = vand.u32 4294901760, %v5374_v50 }
  0x75   :  { %4347 = vmatprep.subr.bf16.mxu1 %v4346_v31  ;;  %v7879_v31 = vand.u32 4294901760, %v5347_v20 }
 0x130   :  { %v610_v15 = vpop.f32.mrb[0].mxu0 }
 0x131   :  { %v5050_v33 = vadd.f32 %v610_v15, %v80_v37  ;;  %v612_v13 = vpop.f32.mrb[1].mxu0  ;;  %v859_v37 = vsub.f32 %v5343_v11, %v7876_v28 }
 0x132   :  { %v5051_v16 = vadd.f32 %v612_v13, %v84_v14  ;;  %v865_v14 = vsub.f32 %v5347_v20, %v7879_v31  ;;  %v883_v31 = vsub.f32 %v5363_v45, %v8290_v9 }
 0x133   :  { %v615_v53 = vmax.f32 %v5050_v33, 0.0  ;;  %v877_v33 = vsub.f32 %v5349_v22, %v7882_v23  ;;  %v860_v13 = vand.u32 4294901760, %v859_v37  ;;  %v901_v37 = vsub.f32 %v5376_v51, %v7901_v18 }
 0x134   :  { %v616_v1 = vmax.f32 %v5051_v16, 0.0  ;;  %v871_v16 = vsub.f32 %v5361_v44, %v7887_v40  ;;  %v866_v43 = vand.u32 4294901760, %v865_v14  ;;  %v889_v44 = vsub.f32 %v5374_v50, %v8292_v17 }
 0x135   :  { %v5890_v15 = vand.u32 4294901760, %v615_v53  ;;  %v884_v17 = vand.u32 4294901760, %v883_v31  ;;  %v8293_v50 = vand.u32 4294901760, %v5393_v58 }
 0x136   :  { %v5899_v49 = vand.u32 4294901760, %v616_v1  ;;  %v872_v45 = vand.u32 4294901760, %v871_v16  ;;  %v895_v16 = vsub.f32 %v5378_v52, %v7909_v12  ;;  %v890_v18 = vand.u32 4294901760, %v889_v44 }
 0x137   :  { %8287 = vst [vmem:[#allocation81_spill] sm:$0xff] %v5890_v15  ;;  %v5905_v28 = vsub.f32 %v615_v53, %v5890_v15  ;;  %v878_v53 = vand.u32 4294901760, %v877_v33  ;;  %v8294_v12 = vand.u32 4294901760, %v5395_v59 }
 0x138   :  { %8288 = vst [vmem:[#allocation82_spill] sm:$0xff] %v5899_v49  ;;  %v5912_v23 = vsub.f32 %v616_v1, %v5899_v49  ;;  %v896_v44 = vand.u32 4294901760, %v895_v16  ;;  %v4352_v22 = vpack.c.bf16 %v884_v17, %v872_v45  ;;  %v8301_v16 = vand.u32 4294901760, %v5437_v41 }
 0x139   :  { %8289 = vst [vmem:[#allocation83_spill] sm:$0xff] %v5905_v28  ;;  %v7896_v40 = vand.u32 4294901760, %v5905_v28  ;;  %v4350_v15 = vpack.c.bf16 %v878_v53, %v866_v43  ;;  %v913_v52 = vsub.f32 %v5395_v59, %v8294_v12  ;;  %v8299_v12 = vld [vmem:[#allocation36_spill] sm:$0xff]  ;;  %v8302_v45 = vand.u32 4294901760, %v5439_v42 }
 0x13a   :  { %8291 = vst [vmem:[#allocation84_spill] sm:$0xff] %v5912_v23  ;;  %v7906_v9 = vand.u32 4294901760, %v5912_v23 }
 0x13b   :  { %v830_v1 = vsub.f32 %v5905_v28, %v7896_v40  ;;  %v907_v40 = vsub.f32 %v5393_v58, %v8293_v50  ;;  %v4348_v28 = vpack.c.bf16 %v860_v13, %v848_v25  ;;  %v8295_v50 = vand.u32 4294901760, %v5397_v60  ;;  %v8296_v13 = vld [vmem:[#allocation32_spill] sm:$0xff] }
 0x13c   :  { %v824_v33 = vsub.f32 %v5912_v23, %v7906_v9  ;;  %v902_v23 = vand.u32 4294901760, %v901_v37  ;;  %v7919_v53 = vand.u32 4294901760, %v8296_v13  ;;  %v8298_v37 = vld [vmem:[#allocation35_spill] sm:$0xff]  ;;  %v949_v17 = vsub.f32 %v5439_v42, %v8302_v45  ;;  %v8308_v42 = vld [vmem:[#allocation40_spill] sm:$0xff] }
 0x13d   :  { %v831_v9 = vand.u32 4294901760, %v830_v1  ;;  %v925_v43 = vsub.f32 %v5397_v60, %v8295_v50  ;;  %v908_v25 = vand.u32 4294901760, %v907_v40  ;;  %v919_v1 = vsub.f32 %v5430_v34, %v7914_v24  ;;  %v8309_v34 = vld [vmem:[#allocation41_spill] sm:$0xff] }
 0x13e   :  { %v825_v51 = vand.u32 4294901760, %v824_v33  ;;  %v8297_v33 = vld [vmem:[#allocation33_spill] sm:$0xff]  ;;  %v4354_v50 = vpack.c.bf16 %v902_v23, %v890_v18  ;;  %v914_v24 = vand.u32 4294901760, %v913_v52  ;;  %v8306_v23 = vld [vmem:[#allocation38_spill] sm:$0xff]  ;;  %v7940_v60 = vand.u32 4294901760, %v8309_v34 }
 0x13f   :  { %v7921_v14 = vand.u32 4294901760, %v8297_v33  ;;  %v926_v31 = vand.u32 4294901760, %v925_v43  ;;  %v4356_v59 = vpack.c.bf16 %v908_v25, %v896_v44  ;;  %v8305_v18 = vld [vmem:[#allocation37_spill] sm:$0xff]  ;;  %v7937_v43 = vand.u32 4294901760, %v8306_v23 }
 0x140   :  { %826 = vmatprep.mubr.f32.mxu1 %v825_v51  ;;  %v8300_v51 = vand.u32 4294901760, %v5432_v36  ;;  %v920_v44 = vand.u32 4294901760, %v919_v1 }
 0x141   :  { %832 = vmatmul.mubr.f32.vlgmr.msra.gmra.mrb[0].mxu1 %v831_v9  ;;  %v937_v9 = vsub.f32 %v5437_v41, %v8301_v16  ;;  %v8304_v41 = vand.u32 4294901760, %v8299_v12 }
 0x142   :  { %4349 = vmatpush1.bf16.msra.mxu1 %v4348_v28  ;;  %1223 = vmatprep.mubr.f32.mxu1 %v5899_v49  ;;  %v931_v40 = vsub.f32 %v5432_v36, %v8300_v51  ;;  %v943_v28 = vsub.f32 %v8296_v13, %v7919_v53  ;;  %v955_v51 = vsub.f32 %v8297_v33, %v7921_v14  ;;  %v8303_v49 = vand.u32 4294901760, %v8298_v37  ;;  %v8307_v14 = vld [vmem:[#allocation39_spill] sm:$0xff] }
 0x143   :  { %4351 = vmatprep.subr.bf16.mxu1 %v4350_v15  ;;  %v973_v15 = vsub.f32 %v8299_v12, %v8304_v41  ;;  %v938_v45 = vand.u32 4294901760, %v937_v9  ;;  %v950_v53 = vand.u32 4294901760, %v949_v17  ;;  %v4358_v13 = vpack.c.bf16 %v926_v31, %v914_v24  ;;  %v8310_v41 = vld [vmem:[#allocation44_spill] sm:$0xff] }
 0x144   :  { %v961_v16 = vsub.f32 %v8298_v37, %v8303_v49  ;;  %v932_v25 = vand.u32 4294901760, %v931_v40  ;;  %v7936_v33 = vand.u32 4294901760, %v8307_v14  ;;  %v7935_v36 = vand.u32 4294901760, %v8308_v42 }
 0x145   :  { %v944_v49 = vand.u32 4294901760, %v943_v28  ;;  %v956_v37 = vand.u32 4294901760, %v955_v51  ;;  %v7942_v12 = vand.u32 4294901760, %v8310_v41  ;;  %v974_v58 = vand.u32 4294901760, %v973_v15  ;;  %v8313_v51 = vld [vmem:[#allocation46_spill] sm:$0xff] }
 0x146   :  { %4353 = vmatpush1.bf16.msra.mxu1 %v4352_v22  ;;  %v962_v52 = vand.u32 4294901760, %v961_v16  ;;  %v8311_v22 = vand.u32 4294901760, %v8305_v18  ;;  %v979_v24 = vsub.f32 %v8306_v23, %v7937_v43  ;;  %v4360_v31 = vpack.c.bf16 %v932_v25, %v920_v44  ;;  %v8316_v43 = vld [vmem:[#allocation49_spill] sm:$0xff]  ;;  %v8317_v16 = vld [vmem:[#allocation51_spill] sm:$0xff] }
 0x147   :  { %4355 = vmatprep.subr.bf16.mxu1 %v4354_v50  ;;  %v4362_v40 = vpack.c.bf16 %v950_v53, %v938_v45  ;;  %v985_v9 = vsub.f32 %v8307_v14, %v7936_v33  ;;  %v997_v17 = vsub.f32 %v8308_v42, %v7935_v36  ;;  %v8312_v50 = vld [vmem:[#allocation45_spill] sm:$0xff]  ;;  %v991_v15 = vsub.f32 %v8309_v34, %v7940_v60  ;;  %v8314_v45 = vld [vmem:[#allocation47_spill] sm:$0xff]  ;;  %v8315_v36 = vld [vmem:[#allocation48_spill] sm:$0xff] }
 0x148   :  { %v967_v1 = vsub.f32 %v8305_v18, %v8311_v22  ;;  %v4366_v53 = vpack.c.bf16 %v974_v58, %v962_v52  ;;  %v980_v25 = vand.u32 4294901760, %v979_v24  ;;  %v8318_v34 = vand.u32 4294901760, %v8312_v50  ;;  %v8322_v22 = vld [vmem:[#allocation55_spill] sm:$0xff] }
 0x149   :  { %v986_v14 = vand.u32 4294901760, %v985_v9  ;;  %v998_v60 = vand.u32 4294901760, %v997_v17  ;;  %v8319_v58 = vand.u32 4294901760, %v8313_v51  ;;  %v992_v52 = vand.u32 4294901760, %v991_v15 }
 0x14a   :  { %4357 = vmatpush1.bf16.msra.mxu1 %v4356_v59  ;;  %v1003_v59 = vsub.f32 %v8310_v41, %v7942_v12  ;;  %v968_v44 = vand.u32 4294901760, %v967_v1  ;;  %v1009_v12 = vsub.f32 %v8312_v50, %v8318_v34  ;;  %v8320_v1 = vld [vmem:[#allocation52_spill] sm:$0xff]  ;;  %v8324_v17 = vand.u32 4294901760, %v8314_v45 }
 0x14b   :  { %4359 = vmatprep.subr.bf16.mxu1 %v4358_v13  ;;  %v4364_v13 = vpack.c.bf16 %v956_v37, %v944_v49  ;;  %v1021_v37 = vsub.f32 %v8313_v51, %v8319_v58  ;;  %v7947_v24 = vand.u32 4294901760, %v8320_v1  ;;  %v8325_v50 = vand.u32 4294901760, %v8315_v36 }
 0x14c   :  { %v1004_v49 = vand.u32 4294901760, %v1003_v59  ;;  %v4368_v28 = vpack.c.bf16 %v980_v25, %v968_v44  ;;  %v1015_v34 = vsub.f32 %v8314_v45, %v8324_v17  ;;  %v8326_v15 = vand.u32 4294901760, %v8316_v43 }
 0x14d   :  { %v1027_v58 = vsub.f32 %v8315_v36, %v8325_v50  ;;  %v8327_v33 = vand.u32 4294901760, %v8317_v16  ;;  %v4370_v25 = vpack.c.bf16 %v998_v60, %v986_v14  ;;  %v1010_v9 = vand.u32 4294901760, %v1009_v12 }
 0x14e   :  { %4361 = vmatpush1.bf16.msra.mxu1 %v4360_v31  ;;  %v8321_v31 = vld [vmem:[#allocation54_spill] sm:$0xff]  ;;  %v1033_v59 = vsub.f32 %v8316_v43, %v8326_v15  ;;  %v4372_v42 = vpack.c.bf16 %v1004_v49, %v992_v52  ;;  %v1039_v17 = vsub.f32 %v8320_v1, %v7947_v24  ;;  %v8329_v36 = vand.u32 4294901760, %v8322_v22 }
 0x14f   :  { %4363 = vmatprep.subr.bf16.mxu1 %v4362_v40  ;;  %v8323_v40 = vld [vmem:[#allocation56_spill] sm:$0xff]  ;;  %v1045_v44 = vsub.f32 %v8317_v16, %v8327_v33  ;;  %v8328_v45 = vand.u32 4294901760, %v8321_v31  ;;  %v7964_v14 = vand.u32 4294901760, %v5682_v7  ;;  %v1016_v12 = vand.u32 4294901760, %v1015_v34 }
 0x150   :  { %v1057_v15 = vsub.f32 %v8322_v22, %v8329_v36  ;;  %v8330_v43 = vand.u32 4294901760, %v8323_v40  ;;  %v7951_v24 = vand.u32 4294901760, %v5689_v0  ;;  %v1040_v36 = vand.u32 4294901760, %v1039_v17 }
 0x151   :  { %v1051_v50 = vsub.f32 %v8321_v31, %v8328_v45  ;;  %v1046_v52 = vand.u32 4294901760, %v1045_v44  ;;  %v7963_v45 = vand.u32 4294901760, %v5687_v55  ;;  %v7952_v31 = vand.u32 4294901760, %v5693_v62 }
 0x152   :  { %4365 = vmatpush1.bf16.msra.mxu1 %v4364_v13  ;;  %v1022_v13 = vand.u32 4294901760, %v1021_v37  ;;  %v1069_v33 = vsub.f32 %v8323_v40, %v8330_v43  ;;  %v1034_v37 = vand.u32 4294901760, %v1033_v59  ;;  %v7953_v43 = vand.u32 4294901760, %v5695_v27 }
 0x153   :  { %4367 = vmatprep.subr.bf16.mxu1 %v4366_v53  ;;  %v1028_v53 = vand.u32 4294901760, %v1027_v58  ;;  %v1052_v22 = vand.u32 4294901760, %v1051_v50  ;;  %v1058_v60 = vand.u32 4294901760, %v1057_v15  ;;  %v1081_v44 = vsub.f32 %v5687_v55, %v7963_v45 }
 0x154   :  { %v4374_v49 = vpack.c.bf16 %v1022_v13, %v1010_v9  ;;  %v1070_v40 = vand.u32 4294901760, %v1069_v33  ;;  %v1075_v9 = vsub.f32 %v5682_v7, %v7964_v14  ;;  %v4378_v59 = vpack.c.bf16 %v1046_v52, %v1034_v37 }
 0x155   :  { %v4376_v58 = vpack.c.bf16 %v1028_v53, %v1016_v12  ;;  %v7962_v13 = vand.u32 4294901760, %v5699_v8  ;;  %v7954_v17 = vand.u32 4294901760, %v5701_v5  ;;  %v1087_v50 = vsub.f32 %v5693_v62, %v7952_v31 }
 0x156   :  { %4369 = vmatpush1.bf16.msra.mxu1 %v4368_v28  ;;  %v8331_v28 = vand.u32 4294901760, %v5679_v2  ;;  %v4380_v15 = vpack.c.bf16 %v1052_v22, %v1040_v36  ;;  %v4382_v33 = vpack.c.bf16 %v1070_v40, %v1058_v60  ;;  %v1076_v53 = vand.u32 4294901760, %v1075_v9 }
 0x157   :  { %4371 = vmatprep.subr.bf16.mxu1 %v4370_v25  ;;  %v1093_v25 = vsub.f32 %v5689_v0, %v7951_v24  ;;  %v7955_v37 = vand.u32 4294901760, %v5703_v48  ;;  %v7956_v52 = vand.u32 4294901760, %v5712_v26  ;;  %v1082_v24 = vand.u32 4294901760, %v1081_v44 }
 0x158   :  { %v1063_v34 = vsub.f32 %v5679_v2, %v8331_v28  ;;  %v7960_v28 = vand.u32 4294901760, %v5807_v29  ;;  %v1117_v22 = vsub.f32 %v5701_v5, %v7954_v17  ;;  %v1088_v40 = vand.u32 4294901760, %v1087_v50 }
 0x159   :  { %v1094_v31 = vand.u32 4294901760, %v1093_v25  ;;  %v7958_v36 = vand.u32 4294901760, %v5817_v3  ;;  %v1111_v44 = vsub.f32 %v5703_v48, %v7955_v37  ;;  %v1123_v25 = vsub.f32 %v5712_v26, %v7956_v52 }
 0x15a   :  { %4373 = vmatpush1.bf16.msra.mxu1 %v4372_v42  ;;  %v1099_v42 = vsub.f32 %v5695_v27, %v7953_v43  ;;  %v1064_v12 = vand.u32 4294901760, %v1063_v34  ;;  %v1105_v43 = vsub.f32 %v5699_v8, %v7962_v13  ;;  %v7959_v34 = vand.u32 4294901760, %v5819_v32 }
 0x15b   :  { %4375 = vmatprep.subr.bf16.mxu1 %v4374_v49  ;;  %v7957_v49 = vand.u32 4294901760, %v5805_v10  ;;  %v1135_v37 = vsub.f32 %v5817_v3, %v7958_v36 }
 0x15c   :  { %v1100_v60 = vand.u32 4294901760, %v1099_v42  ;;  %v4384_v9 = vpack.c.bf16 %v1076_v53, %v1064_v12  ;;  %v1141_v42 = vsub.f32 %v5807_v29, %v7960_v28  ;;  %v4386_v12 = vpack.c.bf16 %v1094_v31, %v1082_v24 }
 0x15d   :  { %v1129_v50 = vsub.f32 %v5805_v10, %v7957_v49  ;;  %v1106_v53 = vand.u32 4294901760, %v1105_v43  ;;  %v1147_v52 = vsub.f32 %v5819_v32, %v7959_v34  ;;  %v7975_v24 = vand.u32 4294901760, %v5832_v47 }
 0x15e   :  { %4377 = vmatpush1.bf16.msra.mxu1 %v4376_v58  ;;  %v7961_v58 = vand.u32 4294901760, %v5821_v63  ;;  %v4388_v17 = vpack.c.bf16 %v1100_v60, %v1088_v40  ;;  %v7974_v31 = vand.u32 4294901760, %v5834_v35  ;;  %v1112_v43 = vand.u32 4294901760, %v1111_v44 }
 0x15f   :  { %4379 = vmatprep.subr.bf16.mxu1 %v4378_v59  ;;  %v7965_v59 = vand.u32 4294901760, %v5823_v21  ;;  %v1130_v40 = vand.u32 4294901760, %v1129_v50  ;;  %v1142_v60 = vand.u32 4294901760, %v1141_v42  ;;  %v7973_v34 = vand.u32 4294901760, %v5836_v57 }
 0x160   :  { %v1153_v49 = vsub.f32 %v5821_v63, %v7961_v58  ;;  %v7966_v28 = vand.u32 4294901760, %v5838_v39  ;;  %v1136_v58 = vand.u32 4294901760, %v1135_v37  ;;  %v1148_v13 = vand.u32 4294901760, %v1147_v52 }
 0x161   :  { %v7972_v50 = vand.u32 4294901760, %v5841_v46  ;;  %v7968_v42 = vand.u32 4294901760, %v5843_v54  ;;  %v1177_v37 = vsub.f32 %v5836_v57, %v7973_v34  ;;  %v8350_v34 = vld [vmem:[#allocation36_spill] sm:$0xff] }
 0x162   :  { %4381 = vmatpush1.bf16.msra.mxu1 %v4380_v15  ;;  %v1118_v15 = vand.u32 4294901760, %v1117_v22  ;;  %v1124_v22 = vand.u32 4294901760, %v1123_v25  ;;  %v1154_v45 = vand.u32 4294901760, %v1153_v49  ;;  %v4394_v25 = vpack.c.bf16 %v1142_v60, %v1130_v40 }
 0x163   :  { %4383 = vmatprep.subr.bf16.mxu1 %v4382_v33  ;;  %v1165_v33 = vsub.f32 %v5823_v21, %v7965_v59  ;;  %v1159_v59 = vsub.f32 %v5832_v47, %v7975_v24  ;;  %v1189_v52 = vsub.f32 %v5838_v39, %v7966_v28  ;;  %v7967_v49 = vand.u32 4294901760, %v5849_v38  ;;  %v8352_v24 = vld [vmem:[#allocation40_spill] sm:$0xff] }
 0x164   :  { %v4390_v36 = vpack.c.bf16 %v1118_v15, %v1106_v53  ;;  %v4392_v44 = vpack.c.bf16 %v1124_v22, %v1112_v43  ;;  %v1195_v43 = vsub.f32 %v5843_v54, %v7968_v42  ;;  %v7971_v22 = vand.u32 4294901760, %v5855_v56 }
 0x165   :  { %v1166_v14 = vand.u32 4294901760, %v1165_v33  ;;  %v1160_v15 = vand.u32 4294901760, %v1159_v59  ;;  %v7970_v40 = vand.u32 4294901760, %v5857_v19  ;;  %v1178_v60 = vand.u32 4294901760, %v1177_v37 }
 0x166   :  { %4385 = vmatpush1.bf16.msra.mxu1 %v4384_v9  ;;  %v1171_v9 = vsub.f32 %v5834_v35, %v7974_v31  ;;  %v1190_v28 = vand.u32 4294901760, %v1189_v52  ;;  %v1196_v59 = vand.u32 4294901760, %v1195_v43  ;;  %v8333_v43 = vld [vmem:[#allocation81_spill] sm:$0xff] }
 0x167   :  { %4387 = vmatprep.subr.bf16.mxu1 %v4386_v12  ;;  %v7969_v12 = vand.u32 4294901760, %v5851_v30  ;;  %v4398_v53 = vpack.c.bf16 %v1166_v14, %v1154_v45  ;;  %v1201_v14 = vsub.f32 %v5849_v38, %v7967_v49 }
 0x168   :  { %v1172_v33 = vand.u32 4294901760, %v1171_v9  ;;  %v1207_v9 = vsub.f32 %v5855_v56, %v7971_v22  ;;  %v8348_v22 = vld [vmem:[#allocation33_spill] sm:$0xff] }
 0x169   :  { %v1213_v45 = vsub.f32 %v5851_v30, %v7969_v12  ;;  %v1202_v37 = vand.u32 4294901760, %v1201_v14  ;;  %v8335_v14 = vld [vmem:[#allocation16_spill] sm:$0xff] }
 0x16a   :  { %4389 = vmatpush1.bf16.msra.mxu1 %v4388_v17  ;;  %v4396_v17 = vpack.c.bf16 %v1148_v13, %v1136_v58  ;;  %v4400_v13 = vpack.c.bf16 %v1172_v33, %v1160_v15  ;;  %v1208_v42 = vand.u32 4294901760, %v1207_v9  ;;  %v4410_v33 = vpack.c.bf16 %v5328_v4, %v5315_v61 }
 0x16b   :  { %4391 = vmatprep.subr.bf16.mxu1 %v4390_v36  ;;  %v1183_v36 = vsub.f32 %v5841_v46, %v7972_v50  ;;  %v1214_v52 = vand.u32 4294901760, %v1213_v45  ;;  %v8338_v45 = vld [vmem:[#allocation20_spill] sm:$0xff] }
 0x16d   :  { %v1184_v58 = vand.u32 4294901760, %v1183_v36  ;;  %v4412_v36 = vpack.c.bf16 %v5343_v11, %v5332_v6 }
 0x16e   :  { %4393 = vmatpush1.bf16.msra.mxu1 %v4392_v44  ;;  %v1219_v44 = vsub.f32 %v5857_v19, %v7970_v40 }
 0x16f   :  { %4395 = vmatprep.subr.bf16.mxu1 %v4394_v25  ;;  %v4402_v25 = vpack.c.bf16 %v1190_v28, %v1178_v60  ;;  %v4404_v49 = vpack.c.bf16 %v1196_v59, %v1184_v58  ;;  %v8332_v28 = vld [vmem:[#allocation14_spill] sm:$0xff]  ;;  %v8334_v60 = vld [vmem:[#allocation84_spill] sm:$0xff]  ;;  %v8339_v58 = vld [vmem:[#allocation21_spill] sm:$0xff] }
 0x170   :  { %v1220_v12 = vand.u32 4294901760, %v1219_v44  ;;  %v8340_v59 = vld [vmem:[#allocation22_spill] sm:$0xff]  ;;  %v8341_v44 = vld [vmem:[#allocation23_spill] sm:$0xff] }
 0x171   :  { %v4420_v9 = vpack.c.bf16 %v8340_v59, %v8339_v58 }
 0x172   :  { %4397 = vmatpush1.bf16.msra.mxu1 %v4396_v17  ;;  %v4406_v17 = vpack.c.bf16 %v1214_v52, %v1202_v37  ;;  %v4408_v15 = vpack.c.bf16 %v1220_v12, %v1208_v42  ;;  %v8337_v12 = vld [vmem:[#allocation19_spill] sm:$0xff] }
 0x173   :  { %4399 = vmatprep.subr.bf16.mxu1 %v4398_v53  ;;  %v4414_v53 = vpack.c.bf16 %v8332_v28, %v5347_v20  ;;  %v8343_v52 = vld [vmem:[#allocation27_spill] sm:$0xff] }
 0x176   :  { %4401 = vmatpush1.bf16.msra.mxu1 %v4400_v13  ;;  %v4418_v13 = vpack.c.bf16 %v8338_v45, %v8337_v12 }
 0x177   :  { %4403 = vmatprep.subr.bf16.mxu1 %v4402_v25  ;;  %v8342_v25 = vld [vmem:[#allocation24_spill] sm:$0xff] }
 0x178   :  { %v4422_v37 = vpack.c.bf16 %v8342_v25, %v8341_v44 }
 0x17a   :  { %4405 = vmatpush1.bf16.msra.mxu1 %v4404_v49  ;;  %v8336_v49 = vld [vmem:[#allocation17_spill] sm:$0xff] }
 0x17b   :  { %4407 = vmatprep.subr.bf16.mxu1 %v4406_v17  ;;  %v4416_v42 = vpack.c.bf16 %v8336_v49, %v8335_v14  ;;  %v8344_v17 = vld [vmem:[#allocation28_spill] sm:$0xff] }
 0x17e   :  { %4409 = vmatpush1.bf16.msra.mxu1 %v4408_v15  ;;  %v4424_v15 = vpack.c.bf16 %v8344_v17, %v8343_v52 }
 0x17f   :  { %4411 = vmatprep.subr.bf16.mxu1 %v4410_v33  ;;  %v8345_v33 = vld [vmem:[#allocation29_spill] sm:$0xff] }
 0x181   :  { %1225 = vmatmul.mubr.f32.vlgmr.msra.gmra.mrb[0].mxu1 %v8333_v43 }
 0x182   :  { %4413 = vmatpush1.bf16.msra.mxu1 %v4412_v36  ;;  %1425 = vmatprep.mubr.f32.mxu1 %v8334_v60  ;;  %v8346_v36 = vld [vmem:[#allocation30_spill] sm:$0xff] }
 0x183   :  { %4415 = vmatprep.subr.bf16.mxu1 %v4414_v53  ;;  %v4426_v40 = vpack.c.bf16 %v8346_v36, %v8345_v33  ;;  %v8347_v53 = vld [vmem:[#allocation32_spill] sm:$0xff] }
 0x184   :  { %v4428_v50 = vpack.c.bf16 %v8348_v22, %v8347_v53  ;;  %v8356_v53 = vld [vmem:[#allocation48_spill] sm:$0xff] }
 0x186   :  { %4417 = vmatpush1.bf16.msra.mxu1 %v4416_v42  ;;  %v8349_v42 = vld [vmem:[#allocation35_spill] sm:$0xff] }
 0x187   :  { %4419 = vmatprep.subr.bf16.mxu1 %v4418_v13  ;;  %v4430_v31 = vpack.c.bf16 %v8350_v34, %v8349_v42  ;;  %v4432_v13 = vpack.c.bf16 %v8306_v23, %v8305_v18 }
 0x18a   :  { %4421 = vmatpush1.bf16.msra.mxu1 %v4420_v9  ;;  %v8351_v9 = vld [vmem:[#allocation39_spill] sm:$0xff] }
 0x18b   :  { %4423 = vmatprep.subr.bf16.mxu1 %v4422_v37  ;;  %v4434_v43 = vpack.c.bf16 %v8352_v24, %v8351_v9  ;;  %v8353_v37 = vld [vmem:[#allocation41_spill] sm:$0xff]  ;;  %v8360_v9 = vld [vmem:[#allocation56_spill] sm:$0xff] }
 0x18c   :  { %v4436_v36 = vpack.c.bf16 %v8310_v41, %v8353_v37 }
 0x18e   :  { %4425 = vmatpush1.bf16.msra.mxu1 %v4424_v15  ;;  %v8354_v15 = vld [vmem:[#allocation45_spill] sm:$0xff] }
 0x18f   :  { %4427 = vmatprep.subr.bf16.mxu1 %v4426_v40  ;;  %v4438_v22 = vpack.c.bf16 %v8313_v51, %v8354_v15  ;;  %v8355_v40 = vld [vmem:[#allocation47_spill] sm:$0xff] }
 0x190   :  { %v4440_v34 = vpack.c.bf16 %v8356_v53, %v8355_v40 }
 0x192   :  { %4429 = vmatpush1.bf16.msra.mxu1 %v4428_v50  ;;  %v8357_v50 = vld [vmem:[#allocation49_spill] sm:$0xff] }
 0x193   :  { %4431 = vmatprep.subr.bf16.mxu1 %v4430_v31  ;;  %v4442_v23 = vpack.c.bf16 %v8317_v16, %v8357_v50  ;;  %v8358_v31 = vld [vmem:[#allocation54_spill] sm:$0xff] }
 0x194   :  { %v4444_v24 = vpack.c.bf16 %v8358_v31, %v8320_v1 }
 0x196   :  { %4433 = vmatpush1.bf16.msra.mxu1 %v4432_v13  ;;  %v8359_v13 = vld [vmem:[#allocation55_spill] sm:$0xff] }
 0x197   :  { %4435 = vmatprep.subr.bf16.mxu1 %v4434_v43  ;;  %v4446_v41 = vpack.c.bf16 %v8360_v9, %v8359_v13  ;;  %v4448_v43 = vpack.c.bf16 %v5682_v7, %v5679_v2 }
 0x19a   :  { %4437 = vmatpush1.bf16.msra.mxu1 %v4436_v36  ;;  %v4450_v36 = vpack.c.bf16 %v5689_v0, %v5687_v55 }
 0x19b   :  { %4439 = vmatprep.subr.bf16.mxu1 %v4438_v22  ;;  %v4452_v22 = vpack.c.bf16 %v5695_v27, %v5693_v62 }
 0x19e   :  { %4441 = vmatpush1.bf16.msra.mxu1 %v4440_v34  ;;  %v4454_v34 = vpack.c.bf16 %v5701_v5, %v5699_v8 }
 0x19f   :  { %4443 = vmatprep.subr.bf16.mxu1 %v4442_v23  ;;  %v4456_v23 = vpack.c.bf16 %v5712_v26, %v5703_v48 }
 0x1a2   :  { %4445 = vmatpush1.bf16.msra.mxu1 %v4444_v24  ;;  %v4458_v24 = vpack.c.bf16 %v5807_v29, %v5805_v10 }
 0x1a3   :  { %4447 = vmatprep.subr.bf16.mxu1 %v4446_v41  ;;  %v4460_v41 = vpack.c.bf16 %v5819_v32, %v5817_v3 }
 0x1a6   :  { %4449 = vmatpush1.bf16.msra.mxu1 %v4448_v43  ;;  %v4462_v43 = vpack.c.bf16 %v5823_v21, %v5821_v63 }
 0x1a7   :  { %4451 = vmatprep.subr.bf16.mxu1 %v4450_v36  ;;  %v4464_v36 = vpack.c.bf16 %v5834_v35, %v5832_v47  ;;  %v8363_v35 = vld [vmem:[#allocation12_spill] sm:$0xff] }
 0x1aa   :  { %4453 = vmatpush1.bf16.msra.mxu1 %v4452_v22  ;;  %v4466_v22 = vpack.c.bf16 %v5838_v39, %v5836_v57 }
 0x1ab   :  { %4455 = vmatprep.subr.bf16.mxu1 %v4454_v34  ;;  %v4468_v34 = vpack.c.bf16 %v5843_v54, %v5841_v46  ;;  %v8365_v54 = vld [vmem:[#allocation13_spill] sm:$0xff] }
 0x1ae   :  { %4457 = vmatpush1.bf16.msra.mxu1 %v4456_v23  ;;  %v4470_v23 = vpack.c.bf16 %v5851_v30, %v5849_v38  ;;  %v8367_v30 = vld [vmem:[#allocation18_spill] sm:$0xff] }
 0x1af   :  { %4459 = vmatprep.subr.bf16.mxu1 %v4458_v24  ;;  %v4472_v24 = vpack.c.bf16 %v5857_v19, %v5855_v56  ;;  %v8369_v19 = vld [vmem:[#allocation26_spill] sm:$0xff] }
 0x1b2   :  { %4461 = vmatpush1.bf16.msra.mxu1 %v4460_v41  ;;  %v8361_v41 = vld [vmem:[#allocation11_spill] sm:$0xff] }
 0x1b3   :  { %4463 = vmatprep.subr.bf16.mxu1 %v4462_v43  ;;  %v8362_v43 = vld [vmem:[#allocation83_spill] sm:$0xff] }
 0x1b6   :  { %4465 = vmatpush1.bf16.msra.mxu1 %v4464_v36  ;;  %v8364_v36 = vand.u32 4294901760, %v8334_v60  ;;  %v8374_v60 = vld [vmem:[#allocation50_spill] sm:$0xff] }
 0x1b7   :  { %4467 = vmatprep.subr.bf16.mxu1 %v4466_v22  ;;  %v8366_v22 = vld [vmem:[#allocation15_spill] sm:$0xff] }
 0x1ba   :  { %4469 = vmatpush1.bf16.msra.mxu1 %v4468_v34  ;;  %v8368_v34 = vld [vmem:[#allocation25_spill] sm:$0xff] }
 0x1bb   :  { %4471 = vmatprep.subr.bf16.mxu1 %v4470_v23  ;;  %v8370_v23 = vld [vmem:[#allocation31_spill] sm:$0xff] }
 0x1be   :  { %4473 = vmatpush1.bf16.msra.mxu1 %v4472_v24  ;;  %v8371_v24 = vld [vmem:[#allocation34_spill] sm:$0xff] }
 0x1bf   :  { %4475 = vmatprep.subr.bf16.mxu1 %v8361_v41  ;;  %v8372_v41 = vld [vmem:[#allocation42_spill] sm:$0xff] }
 0x1c1   :  { %1428 = vmatmul.mubr.f32.vlgmr.msra.gmra.mrb[0].mxu1 %v8362_v43 }
 0x1c2   :  { %4477 = vmatpush1.bf16.msra.mxu1 %v8363_v35  ;;  %1565 = vmatprep.mubr.f32.mxu1 %v8364_v36  ;;  %v8373_v35 = vld [vmem:[#allocation43_spill] sm:$0xff]  ;;  %v8375_v36 = vld [vmem:[#allocation53_spill] sm:$0xff] }
 0x1c3   :  { %4479 = vmatprep.subr.bf16.mxu1 %v8365_v54  ;;  %v8376_v54 = vld [vmem:[#allocation57_spill] sm:$0xff] }
 0x1c6   :  { %4481 = vmatpush1.bf16.msra.mxu1 %v8366_v22  ;;  %v8377_v22 = vld [vmem:[#allocation58_spill] sm:$0xff] }
 0x1c7   :  { %4483 = vmatprep.subr.bf16.mxu1 %v8367_v30  ;;  %v8378_v30 = vld [vmem:[#allocation59_spill] sm:$0xff] }
 0x1ca   :  { %4485 = vmatpush1.bf16.msra.mxu1 %v8368_v34  ;;  %v8379_v34 = vld [vmem:[#allocation60_spill] sm:$0xff] }
 0x1cb   :  { %4487 = vmatprep.subr.bf16.mxu1 %v8369_v19  ;;  %v8380_v19 = vld [vmem:[#allocation61_spill] sm:$0xff] }
 0x1ce   :  { %4489 = vmatpush1.bf16.msra.mxu1 %v8370_v23  ;;  %v8381_v23 = vld [vmem:[#allocation62_spill] sm:$0xff] }
 0x1cf   :  { %4491 = vmatprep.subr.bf16.mxu1 %v8371_v24  ;;  %v8382_v24 = vld [vmem:[#allocation63_spill] sm:$0xff] }
 0x1d2   :  { %4493 = vmatpush1.bf16.msra.mxu1 %v8372_v41  ;;  %v8383_v41 = vld [vmem:[#allocation64_spill] sm:$0xff] }
 0x1d3   :  { %4495 = vmatprep.subr.bf16.mxu1 %v8373_v35  ;;  %v8384_v35 = vld [vmem:[#allocation65_spill] sm:$0xff] }
 0x1d6   :  { %4497 = vmatpush1.bf16.msra.mxu1 %v8374_v60  ;;  %v8385_v60 = vld [vmem:[#allocation66_spill] sm:$0xff] }
 0x1d7   :  { %4499 = vmatprep.subr.bf16.mxu1 %v8375_v36  ;;  %v8386_v36 = vld [vmem:[#allocation67_spill] sm:$0xff] }
 0x1da   :  { %4501 = vmatpush1.bf16.msra.mxu1 %v8376_v54  ;;  %v8387_v54 = vld [vmem:[#allocation68_spill] sm:$0xff] }
 0x1db   :  { %4503 = vmatprep.subr.bf16.mxu1 %v8377_v22  ;;  %v8388_v22 = vld [vmem:[#allocation69_spill] sm:$0xff] }
 0x1de   :  { %4505 = vmatpush1.bf16.msra.mxu1 %v8378_v30  ;;  %v8389_v30 = vld [vmem:[#allocation70_spill] sm:$0xff] }
 0x1df   :  { %4507 = vmatprep.subr.bf16.mxu1 %v8379_v34  ;;  %v8390_v34 = vld [vmem:[#allocation71_spill] sm:$0xff] }
 0x1e2   :  { %4509 = vmatpush1.bf16.msra.mxu1 %v8380_v19  ;;  %v8391_v19 = vld [vmem:[#allocation72_spill] sm:$0xff] }
 0x1e3   :  { %4511 = vmatprep.subr.bf16.mxu1 %v8381_v23  ;;  %v8392_v23 = vld [vmem:[#allocation73_spill] sm:$0xff] }
 0x1e6   :  { %4513 = vmatpush1.bf16.msra.mxu1 %v8382_v24  ;;  %v8393_v24 = vld [vmem:[#allocation76_spill] sm:$0xff] }
 0x1e7   :  { %4515 = vmatprep.subr.bf16.mxu1 %v8383_v41 }
 0x1ea   :  { %4517 = vmatpush1.bf16.msra.mxu1 %v8384_v35  ;;  %v8394_v35 = vand.u32 4294901760, %v5315_v61  ;;  %v6263_v61 = vld [vmem:[%s7781_s8 + $0x80] sm:$0xff] }
 0x1eb   :  { %4519 = vmatprep.subr.bf16.mxu1 %v8385_v60  ;;  %v8395_v60 = vand.u32 4294901760, %v5328_v4  ;;  %v6268_v4 = vld [vmem:[%s7781_s8 + $0x88] sm:$0xff] }
 0x1ec   :  { %8402 = vst [vmem:[#allocation37_spill] sm:$0xff] %v6268_v4 }
 0x1ed   :  { %v4538_v41 = vpack.c.bf16 %v8395_v60, %v8394_v35  ;;  %v8406_v35 = vand.u32 4294901760, %v8336_v49  ;;  %v8410_v49 = vand.u32 4294901760, %v8337_v12  ;;  %v8418_v60 = vand.u32 4294901760, %v8340_v59 }
 0x1ee   :  { %4521 = vmatpush1.bf16.msra.mxu1 %v8386_v36  ;;  %v8396_v36 = vld [vmem:[#allocation78_spill] sm:$0xff] }
 0x1ef   :  { %4523 = vmatprep.subr.bf16.mxu1 %v8387_v54  ;;  %v8397_v54 = vand.u32 4294901760, %v5332_v6  ;;  %v6273_v6 = vld [vmem:[%s7781_s8] sm:$0xff] }
 0x1f0   :  { %8403 = vst [vmem:[#allocation46_spill] sm:$0xff] %v6273_v6 }
 0x1f2   :  { %4525 = vmatpush1.bf16.msra.mxu1 %v8388_v22  ;;  %v8398_v22 = vand.u32 4294901760, %v5343_v11  ;;  %v8404_v11 = vld [vmem:[#allocation82_spill] sm:$0xff] }
 0x1f3   :  { %4527 = vmatprep.subr.bf16.mxu1 %v8389_v30 }
 0x1f4   :  { %v4540_v30 = vpack.c.bf16 %v8398_v22, %v8397_v54  ;;  %v8411_v22 = vand.u32 4294901760, %v8338_v45 }
 0x1f6   :  { %4529 = vmatpush1.bf16.msra.mxu1 %v8390_v34  ;;  %v8399_v34 = vand.u32 4294901760, %v5347_v20  ;;  %v8405_v20 = vand.u32 4294901760, %v8335_v14  ;;  %v6296_v14 = vld [vmem:[%s7781_s8 + $0x98] sm:$0xff] }
 0x1f7   :  { %4531 = vmatprep.subr.bf16.mxu1 %v8391_v19  ;;  %v8400_v19 = vand.u32 4294901760, %v8332_v28  ;;  %v7984_v28 = vand.u32 4294901760, %v6268_v4  ;;  %8409 = vst [vmem:[#allocation14_spill] sm:$0xff] %v6296_v14 }
 0x1f8   :  { %v4544_v54 = vpack.c.bf16 %v8406_v35, %v8405_v20  ;;  %v6307_v20 = vld [vmem:[%s7781_s8 + $0x10] sm:$0xff]  ;;  %v6312_v35 = vld [vmem:[%s7781_s8 + $0x18] sm:$0xff] }
 0x1f9   :  { %8412 = vst [vmem:[#allocation84_spill] sm:$0xff] %v6307_v20  ;;  %8413 = vst [vmem:[#allocation16_spill] sm:$0xff] %v6312_v35  ;;  %v6322_v45 = vsub.f32 %v6268_v4, %v7984_v28 }
 0x1fa   :  { %4533 = vmatpush1.bf16.msra.mxu1 %v8392_v23  ;;  %v4542_v23 = vpack.c.bf16 %v8400_v19, %v8399_v34  ;;  %v7982_v19 = vand.u32 4294901760, %v6263_v61  ;;  %v4546_v34 = vpack.c.bf16 %v8411_v22, %v8410_v49  ;;  %v8417_v22 = vand.u32 4294901760, %v8339_v58 }
 0x1fb   :  { %4535 = vmatprep.subr.bf16.mxu1 %v8393_v24  ;;  %v8401_v24 = vand.u32 4294901760, %v8362_v43  ;;  %v7986_v43 = vand.u32 4294901760, %v6273_v6  ;;  %8415 = vst [vmem:[#allocation19_spill] sm:$0xff] %v6322_v45  ;;  %v8424_v49 = vand.u32 4294901760, %v8342_v25  ;;  %v8425_v58 = vand.u32 4294901760, %v6296_v14  ;;  %v1979_v25 = vld [vmem:[%s7779_s6] sm:$0xff] }
 0x1fc   :  { %v6317_v12 = vsub.f32 %v6263_v61, %v7982_v19 }
 0x1fd   :  { %v6351_v59 = vsub.f32 %v6296_v14, %v8425_v58  ;;  %v8436_v14 = vand.u32 4294901760, %v6312_v35 }
 0x1fe   :  { %4537 = vmatpush1.bf16.msra.mxu1 %v8396_v36  ;;  %8414 = vst [vmem:[#allocation17_spill] sm:$0xff] %v6317_v12 }
 0x1ff   :  { %4539 = vmatprep.subr.bf16.mxu1 %v4538_v41  ;;  %v6285_v41 = vld [vmem:[%s7781_s8 + $0x8] sm:$0xff]  ;;  %8426 = vst [vmem:[#allocation23_spill] sm:$0xff] %v6351_v59  ;;  %v6374_v59 = vld [vmem:[%s7781_s8 + $0xa0] sm:$0xff] }
 0x200   :  { %8407 = vst [vmem:[#allocation51_spill] sm:$0xff] %v6285_v41  ;;  %v8419_v19 = vand.u32 4294901760, %v6285_v41  ;;  %8429 = vst [vmem:[#allocation24_spill] sm:$0xff] %v6374_v59 }
 0x201   :  { %1569 = vmatmul.mubr.f32.vlgmr.msra.gmra.mrb[0].mxu1 %v8401_v24  ;;  %v4548_v24 = vpack.c.bf16 %v8418_v60, %v8417_v22  ;;  %v2019_v60 = vand.u32 4294901760, %v1979_v25 }
 0x202   :  { %4541 = vmatpush1.bf16.msra.mxu1 %v4540_v30  ;;  %1832 = vmatprep.mubr.f32.mxu1 %v8404_v11  ;;  %v6291_v30 = vld [vmem:[%s7781_s8 + $0x90] sm:$0xff]  ;;  %v6337_v12 = vsub.f32 %v6285_v41, %v8419_v19  ;;  %v1980_v19 = vld [vmem:[%s7779_s6 + $0x8] sm:$0xff] }
 0x203   :  { %8408 = vst [vmem:[#allocation52_spill] sm:$0xff] %v6291_v30  ;;  %4543 = vmatprep.subr.bf16.mxu1 %v4542_v23  ;;  %v6327_v23 = vsub.f32 %v6273_v6, %v7986_v43  ;;  %v8421_v28 = vand.u32 4294901760, %v6291_v30  ;;  %v8423_v43 = vand.u32 4294901760, %v8341_v44  ;;  %v1996_v44 = vld [vmem:[%s7779_s6 + $0x88] sm:$0xff]  ;;  %v2022_v41 = vand.u32 4294901760, %v1980_v19  ;;  %v6398_v6 = vld [vmem:[%s7781_s8 + $0x20] sm:$0xff] }
 0x204   :  { %8420 = vst [vmem:[#allocation21_spill] sm:$0xff] %v6337_v12  ;;  %v2070_v58 = vand.u32 4294901760, %v1996_v44 }
 0x205   :  { %8416 = vst [vmem:[#allocation20_spill] sm:$0xff] %v6327_v23  ;;  %v6342_v45 = vsub.f32 %v6291_v30, %v8421_v28  ;;  %v4550_v23 = vpack.c.bf16 %v8424_v49, %v8423_v43  ;;  %v1995_v28 = vld [vmem:[%s7779_s6 + $0x80] sm:$0xff]  ;;  %v8428_v43 = vand.u32 4294901760, %v8344_v17  ;;  %v8432_v17 = vld [vmem:[#allocation30_spill] sm:$0xff]  ;;  %v6393_v30 = vsub.f32 %v6312_v35, %v8436_v14 }
 0x206   :  { %4545 = vmatpush1.bf16.msra.mxu1 %v4544_v54  ;;  %v8427_v54 = vand.u32 4294901760, %v8343_v52  ;;  %v2067_v22 = vand.u32 4294901760, %v1995_v28  ;;  %v8431_v52 = vand.u32 4294901760, %v8345_v33  ;;  %v6403_v33 = vld [vmem:[%s7781_s8 + $0x28] sm:$0xff]  ;;  %v6413_v14 = vpack.c.bf16 %v2022_v41, %v2019_v60 }
 0x207   :  { %8422 = vst [vmem:[#allocation22_spill] sm:$0xff] %v6342_v45  ;;  %4547 = vmatprep.subr.bf16.mxu1 %v4546_v34  ;;  %v6379_v34 = vld [vmem:[%s7781_s8 + $0xa8] sm:$0xff]  ;;  %v8434_v45 = vand.u32 4294901760, %v6307_v20  ;;  %8437 = vst [vmem:[#allocation29_spill] sm:$0xff] %v6393_v30  ;;  %v6415_v30 = vsub.f32 %v1980_v19, %v2022_v41 }
 0x208   :  { %v4552_v49 = vpack.c.bf16 %v8428_v43, %v8427_v54  ;;  %8430 = vst [vmem:[#allocation27_spill] sm:$0xff] %v6379_v34  ;;  %v8433_v54 = vand.u32 4294901760, %v8432_v17  ;;  %8438 = vst [vmem:[#allocation35_spill] sm:$0xff] %v6403_v33  ;;  %v6409_v17 = vsub.f32 %v1996_v44, %v2070_v58 }
 0x209   :  { %v6388_v12 = vsub.f32 %v6307_v20, %v8434_v45  ;;  %v6407_v45 = vsub.f32 %v1995_v28, %v2067_v22  ;;  %8443 = vst [vmem:[#allocation49_spill] sm:$0xff] %v6413_v14  ;;  %8444 = vst [vmem:[#allocation54_spill] sm:$0xff] %v6415_v30  ;;  %v1997_v20 = vld [vmem:[%s7779_s6 + $0x90] sm:$0xff]  ;;  %v1998_v28 = vld [vmem:[%s7779_s6 + $0x98] sm:$0xff]  ;;  %v8451_v30 = vand.u32 4294901760, %v6379_v34 }
 0x20a   :  { %v4554_v43 = vpack.c.bf16 %v8433_v54, %v8431_v52  ;;  %v6405_v52 = vpack.c.bf16 %v2070_v58, %v2067_v22  ;;  %8441 = vst [vmem:[#allocation47_spill] sm:$0xff] %v6409_v17  ;;  %v6411_v54 = vsub.f32 %v1979_v25, %v2019_v60  ;;  %4549 = vmatpush1.bf16.msra.mxu1 %v4548_v24  ;;  %v1981_v24 = vld [vmem:[%s7779_s6 + $0x10] sm:$0xff]  ;;  %v2073_v19 = vand.u32 4294901760, %v1997_v20  ;;  %v1982_v25 = vld [vmem:[%s7779_s6 + $0x18] sm:$0xff]  ;;  %v8445_v58 = vld [vmem:[#allocation32_spill] sm:$0xff] }
 0x20b   :  { %8435 = vst [vmem:[#allocation28_spill] sm:$0xff] %v6388_v12  ;;  %8440 = vst [vmem:[#allocation45_spill] sm:$0xff] %v6407_v45  ;;  %4551 = vmatprep.subr.bf16.mxu1 %v4550_v23  ;;  %v2076_v44 = vand.u32 4294901760, %v1998_v28  ;;  %v6437_v22 = vld [vmem:[%s7781_s8 + $0xb0] sm:$0xff]  ;;  %v8446_v35 = vand.u32 4294901760, %v8445_v58  ;;  %v8447_v23 = vld [vmem:[#allocation33_spill] sm:$0xff] }
 0x20c   :  { %8439 = vst [vmem:[#allocation41_spill] sm:$0xff] %v6405_v52  ;;  %8442 = vst [vmem:[#allocation48_spill] sm:$0xff] %v6411_v54  ;;  %4667 = vmatprep.subr.bf16.mxu0 %v6405_v52  ;;  %v8448_v12 = vand.u32 4294901760, %v8447_v23  ;;  %v8449_v60 = vand.u32 4294901760, %v6374_v59  ;;  %v6452_v54 = vsub.f32 %v6379_v34, %v8451_v30  ;;  %v2025_v17 = vand.u32 4294901760, %v1981_v24  ;;  %v6457_v58 = vld [vmem:[%s7781_s8 + $0xb8] sm:$0xff] }
 0x20d   :  { %4669 = vmatpush3.bf16.msra.mxu0 %v6413_v14  ;;  %v8454_v30 = vld [vmem:[#allocation36_spill] sm:$0xff]  ;;  %v8458_v45 = vand.u32 4294901760, %v6403_v33  ;;  %v6485_v36 = vsub.f32 %v1997_v20, %v2073_v19  ;;  %v6487_v4 = vsub.f32 %v1998_v28, %v2076_v44  ;;  %v8467_v28 = vand.u32 4294901760, %v8305_v18  ;;  %v8468_v20 = vld [vmem:[#allocation38_spill] sm:$0xff]  ;;  %v6538_v18 = vld [vmem:[%s7781_s8 + $0xc8] sm:$0xff] }
 0x20e   :  { %v4556_v52 = vpack.c.bf16 %v8448_v12, %v8446_v35  ;;  %v6447_v41 = vsub.f32 %v6374_v59, %v8449_v60  ;;  %8452 = vst [vmem:[#allocation56_spill] sm:$0xff] %v6452_v54  ;;  %v6462_v35 = vld [vmem:[%s7781_s8 + $0x30] sm:$0xff]  ;;  %v6467_v12 = vld [vmem:[%s7781_s8 + $0x38] sm:$0xff]  ;;  %v8453_v60 = vand.u32 4294901760, %v8349_v42  ;;  %v8455_v23 = vand.u32 4294901760, %v8454_v30  ;;  %4553 = vmatpush1.bf16.msra.mxu1 %v4552_v49  ;;  %v1984_v49 = vld [vmem:[%s7779_s6 + $0x28] sm:$0xff] }
 0x20f   :  { %v8456_v54 = vand.u32 4294901760, %v6398_v6  ;;  %v6481_v34 = vsub.f32 %v6403_v33, %v8458_v45  ;;  %v6483_v59 = vpack.c.bf16 %v2076_v44, %v2073_v19  ;;  %8461 = vst [vmem:[#allocation32_spill] sm:$0xff] %v6485_v36  ;;  %8462 = vst [vmem:[#allocation33_spill] sm:$0xff] %v6487_v4  ;;  %v2028_v42 = vand.u32 4294901760, %v1982_v25  ;;  %4555 = vmatprep.subr.bf16.mxu1 %v4554_v43  ;;  %v6515_v45 = vld [vmem:[%s7781_s8 + $0xc0] sm:$0xff] }
 0x210   :  { %8450 = vst [vmem:[#allocation55_spill] sm:$0xff] %v6447_v41  ;;  %v4558_v14 = vpack.c.bf16 %v8455_v23, %v8453_v60  ;;  %v6489_v30 = vsub.f32 %v1981_v24, %v2025_v17  ;;  %v2000_v60 = vld [vmem:[%s7779_s6 + $0xa8] sm:$0xff]  ;;  %v1983_v24 = vld [vmem:[%s7779_s6 + $0x20] sm:$0xff]  ;;  %8466 = vst [vmem:[#allocation87_spill] sm:$0xff] %v6515_v45  ;;  %v8476_v36 = vand.u32 4294901760, %v6457_v58 }
 0x211   :  { %v6476_v41 = vsub.f32 %v6398_v6, %v8456_v54  ;;  %8459 = vst [vmem:[#allocation82_spill] sm:$0xff] %v6481_v34  ;;  %8460 = vst [vmem:[#allocation30_spill] sm:$0xff] %v6483_v59  ;;  %v1999_v54 = vld [vmem:[%s7779_s6 + $0xa0] sm:$0xff]  ;;  %4671 = vmatprep.subr.bf16.mxu0 %v6483_v59  ;;  %v6505_v19 = vpack.c.bf16 %v2028_v42, %v2025_v17  ;;  %v6507_v44 = vsub.f32 %v1982_v25, %v2028_v42  ;;  %v8470_v17 = vld [vmem:[#allocation39_spill] sm:$0xff] }
 0x212   :  { %8463 = vst [vmem:[#allocation36_spill] sm:$0xff] %v6489_v30  ;;  %v2079_v23 = vand.u32 4294901760, %v1999_v54  ;;  %v2082_v43 = vand.u32 4294901760, %v2000_v60  ;;  %v8469_v59 = vand.u32 4294901760, %v8468_v20  ;;  %v8472_v25 = vld [vmem:[#allocation40_spill] sm:$0xff]  ;;  %v8474_v30 = vand.u32 4294901760, %v6437_v22  ;;  %4557 = vmatpush1.bf16.msra.mxu1 %v4556_v52 }
 0x213   :  { %8457 = vst [vmem:[#allocation83_spill] sm:$0xff] %v6476_v41  ;;  %8464 = vst [vmem:[#allocation85_spill] sm:$0xff] %v6505_v19  ;;  %v8471_v41 = vand.u32 4294901760, %v8470_v17  ;;  %v8473_v42 = vand.u32 4294901760, %v8472_v25  ;;  %v6533_v33 = vsub.f32 %v6457_v58, %v8476_v36  ;;  %4673 = vmatpush3.bf16.msra.mxu0 %v6505_v19  ;;  %v8478_v36 = vand.u32 4294901760, %v6462_v35  ;;  %4559 = vmatprep.subr.bf16.mxu1 %v4558_v14  ;;  %v2002_v14 = vld [vmem:[%s7779_s6 + $0xb8] sm:$0xff] }
 0x214   :  { %8465 = vst [vmem:[#allocation86_spill] sm:$0xff] %v6507_v44  ;;  %v4560_v34 = vpack.c.bf16 %v8469_v59, %v8467_v28  ;;  %v6528_v4 = vsub.f32 %v6437_v22, %v8474_v30  ;;  %v6543_v59 = vld [vmem:[%s7781_s8 + $0x40] sm:$0xff]  ;;  %v8480_v20 = vand.u32 4294901760, %v6467_v12  ;;  %v6561_v17 = vpack.c.bf16 %v2082_v43, %v2079_v23 }
 0x215   :  { %v4562_v44 = vpack.c.bf16 %v8473_v42, %v8471_v41  ;;  %8477 = vst [vmem:[#allocation39_spill] sm:$0xff] %v6533_v33  ;;  %v6548_v41 = vld [vmem:[%s7781_s8 + $0x48] sm:$0xff]  ;;  %v6554_v30 = vsub.f32 %v6462_v35, %v8478_v36  ;;  %v2031_v25 = vand.u32 4294901760, %v1983_v24  ;;  %v2001_v42 = vld [vmem:[%s7779_s6 + $0xb0] sm:$0xff]  ;;  %v6566_v52 = vsub.f32 %v1999_v54, %v2079_v23 }
 0x216   :  { %8475 = vst [vmem:[#allocation38_spill] sm:$0xff] %v6528_v4  ;;  %v6559_v28 = vsub.f32 %v6467_v12, %v8480_v20  ;;  %8482 = vst [vmem:[#allocation89_spill] sm:$0xff] %v6561_v17  ;;  %v6568_v19 = vsub.f32 %v2000_v60, %v2082_v43  ;;  %v2034_v33 = vand.u32 4294901760, %v1984_v49  ;;  %v8027_v36 = vand.u32 4294901760, %v6515_v45  ;;  %4675 = vmatprep.subr.bf16.mxu0 %v6561_v17  ;;  %v1985_v54 = vld [vmem:[%s7779_s6 + $0x30] sm:$0xff]  ;;  %v1986_v4 = vld [vmem:[%s7779_s6 + $0x38] sm:$0xff] }
 0x217   :  { %8479 = vst [vmem:[#allocation40_spill] sm:$0xff] %v6554_v30  ;;  %8483 = vst [vmem:[#allocation90_spill] sm:$0xff] %v6566_v52  ;;  %v6572_v30 = vsub.f32 %v1983_v24, %v2031_v25  ;;  %v2085_v43 = vand.u32 4294901760, %v2001_v42  ;;  %4561 = vmatpush1.bf16.msra.mxu1 %v4560_v34  ;;  %v8493_v17 = vand.u32 4294901760, %v8313_v51  ;;  %v8496_v52 = vand.u32 4294901760, %v6543_v59 }
 0x218   :  { %8481 = vst [vmem:[#allocation88_spill] sm:$0xff] %v6559_v28  ;;  %8484 = vst [vmem:[#allocation91_spill] sm:$0xff] %v6568_v19  ;;  %v6583_v60 = vpack.c.bf16 %v2034_v33, %v2031_v25  ;;  %v6585_v23 = vsub.f32 %v1984_v49, %v2034_v33  ;;  %v6590_v24 = vsub.f32 %v6515_v45, %v8027_v36  ;;  %v6598_v28 = vld [vmem:[%s7781_s8 + $0xd0] sm:$0xff]  ;;  %v6603_v33 = vld [vmem:[%s7781_s8 + $0xd8] sm:$0xff]  ;;  %v8489_v49 = vand.u32 4294901760, %v8353_v37 }
 0x219   :  { %8485 = vst [vmem:[#allocation92_spill] sm:$0xff] %v6572_v30  ;;  %v8490_v25 = vld [vmem:[#allocation44_spill] sm:$0xff]  ;;  %v8494_v30 = vand.u32 4294901760, %v6538_v18  ;;  %v6621_v45 = vsub.f32 %v6543_v59, %v8496_v52  ;;  %v6626_v37 = vld [vmem:[%s7781_s8 + $0x50] sm:$0xff]  ;;  %4563 = vmatprep.subr.bf16.mxu1 %v4562_v44  ;;  %v8498_v51 = vand.u32 4294901760, %v6548_v41  ;;  %v2088_v34 = vand.u32 4294901760, %v2002_v14 }
 0x21a   :  { %8486 = vst [vmem:[#allocation93_spill] sm:$0xff] %v6583_v60  ;;  %8487 = vst [vmem:[#allocation94_spill] sm:$0xff] %v6585_v23  ;;  %v8491_v36 = vand.u32 4294901760, %v8490_v25  ;;  %4677 = vmatpush3.bf16.msra.mxu0 %v6583_v60  ;;  %v6639_v52 = vld [vmem:[%s7781_s8 + $0x58] sm:$0xff]  ;;  %v8501_v44 = vand.u32 4294901760, %v8356_v53  ;;  %v2998_v25 = vand.u32 4294901760, %v6598_v28 }
 0x21b   :  { %8488 = vst [vmem:[#allocation95_spill] sm:$0xff] %v6590_v24  ;;  %v8492_v24 = vand.u32 4294901760, %v8354_v15  ;;  %v6616_v19 = vsub.f32 %v6538_v18, %v8494_v30  ;;  %8497 = vst [vmem:[#allocation96_spill] sm:$0xff] %v6621_v45  ;;  %v6632_v15 = vsub.f32 %v6548_v41, %v8498_v51  ;;  %v6634_v30 = vsub.f32 %v2001_v42, %v2085_v43 }
 0x21c   :  { %v4564_v20 = vpack.c.bf16 %v8491_v36, %v8489_v49  ;;  %v8500_v36 = vand.u32 4294901760, %v8355_v40  ;;  %v2040_v49 = vand.u32 4294901760, %v1986_v4  ;;  %v3001_v51 = vand.u32 4294901760, %v6603_v33 }
 0x21d   :  { %v4566_v23 = vpack.c.bf16 %v8493_v17, %v8492_v24  ;;  %8495 = vst [vmem:[#allocation44_spill] sm:$0xff] %v6616_v19  ;;  %8499 = vst [vmem:[#allocation97_spill] sm:$0xff] %v6632_v15  ;;  %v2037_v17 = vand.u32 4294901760, %v1985_v54  ;;  %v6647_v15 = vpack.c.bf16 %v2088_v34, %v2085_v43  ;;  %v6649_v42 = vsub.f32 %v2002_v14, %v2088_v34 }
 0x21e   :  { %v4568_v24 = vpack.c.bf16 %v8501_v44, %v8500_v36  ;;  %v8041_v60 = vand.u32 4294901760, %v6626_v37  ;;  %4565 = vmatpush1.bf16.msra.mxu1 %v4564_v20  ;;  %v6656_v40 = vsub.f32 %v1986_v4, %v2040_v49  ;;  %v6661_v53 = vsub.f32 %v6598_v28, %v2998_v25 }
 0x21f   :  { %8502 = vst [vmem:[#allocation98_spill] sm:$0xff] %v6647_v15  ;;  %v6651_v45 = vsub.f32 %v1985_v54, %v2037_v17  ;;  %v6654_v19 = vpack.c.bf16 %v2040_v49, %v2037_v17  ;;  %v8042_v36 = vand.u32 4294901760, %v6639_v52  ;;  %4567 = vmatprep.subr.bf16.mxu1 %v4566_v23  ;;  %v8506_v14 = vand.u32 4294901760, %v8357_v50  ;;  %4679 = vmatprep.subr.bf16.mxu0 %v6647_v15 }
 0x220   :  { %8504 = vst [vmem:[#allocation100_spill] sm:$0xff] %v6656_v40  ;;  %8505 = vst [vmem:[#allocation101_spill] sm:$0xff] %v6661_v53  ;;  %v8507_v54 = vand.u32 4294901760, %v8317_v16  ;;  %v6672_v4 = vsub.f32 %v6603_v33, %v3001_v51  ;;  %v6677_v20 = vsub.f32 %v6626_v37, %v8041_v60  ;;  %v8511_v16 = vand.u32 4294901760, %v8320_v1 }
 0x221   :  { %8503 = vst [vmem:[#allocation99_spill] sm:$0xff] %v6654_v19  ;;  %4681 = vmatpush3.bf16.msra.mxu0 %v6654_v19  ;;  %v6683_v50 = vsub.f32 %v6639_v52, %v8042_v36  ;;  %v8512_v23 = vand.u32 4294901760, %v8358_v31  ;;  %v8513_v17 = vand.u32 4294901760, %v8359_v13  ;;  %v8514_v44 = vand.u32 4294901760, %v8360_v9 }
 0x222   :  { %v4570_v43 = vpack.c.bf16 %v8507_v54, %v8506_v14  ;;  %8508 = vst [vmem:[#allocation102_spill] sm:$0xff] %v6672_v4  ;;  %8509 = vst [vmem:[#allocation103_spill] sm:$0xff] %v6677_v20  ;;  %4569 = vmatpush1.bf16.msra.mxu1 %v4568_v24  ;;  %v8515_v14 = vand.u32 4294901760, %v5679_v2  ;;  %v8516_v54 = vand.u32 4294901760, %v5682_v7  ;;  %v8517_v24 = vand.u32 4294901760, %v5687_v55 }
 0x223   :  { %8510 = vst [vmem:[#allocation104_spill] sm:$0xff] %v6683_v50  ;;  %v4572_v34 = vpack.c.bf16 %v8512_v23, %v8511_v16  ;;  %v4574_v49 = vpack.c.bf16 %v8514_v44, %v8513_v17  ;;  %v8518_v1 = vand.u32 4294901760, %v5689_v0  ;;  %v8519_v31 = vand.u32 4294901760, %v5693_v62  ;;  %v8532_v17 = vld [vmem:[#allocation74_spill] sm:$0xff] }
 0x224   :  { %4571 = vmatprep.subr.bf16.mxu1 %v4570_v43  ;;  %v4576_v60 = vpack.c.bf16 %v8516_v54, %v8515_v14  ;;  %v8520_v13 = vand.u32 4294901760, %v5695_v27  ;;  %v8521_v9 = vand.u32 4294901760, %v5699_v8  ;;  %v8522_v2 = vand.u32 4294901760, %v5701_v5  ;;  %v8537_v14 = vld [vmem:[#allocation75_spill] sm:$0xff] }
 0x225   :  { %v4578_v36 = vpack.c.bf16 %v8518_v1, %v8517_v24  ;;  %v8523_v7 = vand.u32 4294901760, %v5703_v48  ;;  %v8524_v55 = vand.u32 4294901760, %v5712_v26  ;;  %v8525_v0 = vand.u32 4294901760, %v5805_v10  ;;  %v8540_v24 = vld [vmem:[#allocation77_spill] sm:$0xff] }
 0x226   :  { %4573 = vmatpush1.bf16.msra.mxu1 %v4572_v34  ;;  %v4580_v43 = vpack.c.bf16 %v8520_v13, %v8519_v31  ;;  %v4582_v16 = vpack.c.bf16 %v8522_v2, %v8521_v9  ;;  %v8526_v62 = vand.u32 4294901760, %v5807_v29  ;;  %v8527_v27 = vand.u32 4294901760, %v5817_v3  ;;  %v8543_v13 = vld [vmem:[#allocation79_spill] sm:$0xff]  ;;  %v8547_v9 = vld [vmem:[#allocation12_spill] sm:$0xff] }
 0x227   :  { %4575 = vmatprep.subr.bf16.mxu1 %v4574_v49  ;;  %v4584_v23 = vpack.c.bf16 %v8524_v55, %v8523_v7  ;;  %v8528_v8 = vand.u32 4294901760, %v5819_v32  ;;  %v8529_v5 = vand.u32 4294901760, %v5821_v63  ;;  %v8530_v48 = vand.u32 4294901760, %v5823_v21  ;;  %v8549_v2 = vld [vmem:[#allocation15_spill] sm:$0xff]  ;;  %v8552_v7 = vld [vmem:[#allocation26_spill] sm:$0xff] }
 0x228   :  { %v8531_v26 = vand.u32 4294901760, %v5832_v47  ;;  %v8533_v10 = vand.u32 4294901760, %v8532_v17  ;;  %v8534_v29 = vand.u32 4294901760, %v5836_v57  ;;  %v8535_v3 = vand.u32 4294901760, %v5838_v39  ;;  %v8545_v39 = vld [vmem:[#allocation11_spill] sm:$0xff]  ;;  %v8566_v17 = vld [vmem:[#allocation64_spill] sm:$0xff] }
 0x229   :  { %v4590_v34 = vpack.c.bf16 %v8530_v48, %v8529_v5  ;;  %v8536_v32 = vand.u32 4294901760, %v5841_v46  ;;  %v8538_v63 = vand.u32 4294901760, %v8537_v14  ;;  %v8539_v21 = vand.u32 4294901760, %v5849_v38  ;;  %v8546_v46 = vld [vmem:[#allocation81_spill] sm:$0xff]  ;;  %v8553_v55 = vld [vmem:[#allocation31_spill] sm:$0xff]  ;;  %v8562_v5 = vld [vmem:[#allocation60_spill] sm:$0xff] }
 0x22a   :  { %4577 = vmatpush1.bf16.msra.mxu1 %v4576_v60  ;;  %v4586_v60 = vpack.c.bf16 %v8526_v62, %v8525_v0  ;;  %v4592_v44 = vpack.c.bf16 %v8533_v10, %v8531_v26  ;;  %v4594_v49 = vpack.c.bf16 %v8535_v3, %v8534_v29  ;;  %v8541_v47 = vand.u32 4294901760, %v8540_v24  ;;  %v8548_v38 = vld [vmem:[#allocation13_spill] sm:$0xff]  ;;  %v8555_v0 = vld [vmem:[#allocation42_spill] sm:$0xff]  ;;  %v8556_v62 = vld [vmem:[#allocation43_spill] sm:$0xff] }
 0x22b   :  { %4579 = vmatprep.subr.bf16.mxu1 %v4578_v36  ;;  %v4588_v36 = vpack.c.bf16 %v8528_v8, %v8527_v27  ;;  %v4596_v54 = vpack.c.bf16 %v8538_v63, %v8536_v32  ;;  %v8542_v31 = vand.u32 4294901760, %v5855_v56  ;;  %v8544_v57 = vand.u32 4294901760, %v8543_v13  ;;  %v8551_v56 = vld [vmem:[#allocation25_spill] sm:$0xff]  ;;  %v8560_v8 = vld [vmem:[#allocation58_spill] sm:$0xff]  ;;  %v8565_v26 = vld [vmem:[#allocation63_spill] sm:$0xff] }
 0x22c   :  { %v4598_v1 = vpack.c.bf16 %v8541_v47, %v8539_v21  ;;  %v8559_v27 = vld [vmem:[#allocation57_spill] sm:$0xff]  ;;  %v8569_v29 = vld [vmem:[#allocation67_spill] sm:$0xff]  ;;  %v8570_v3 = vld [vmem:[#allocation68_spill] sm:$0xff]  ;;  %v8577_v24 = vand.u32 4294901760, %v6263_v61 }
 0x22d   :  { %v8563_v48 = vld [vmem:[#allocation61_spill] sm:$0xff]  ;;  %v8572_v32 = vld [vmem:[#allocation70_spill] sm:$0xff]  ;;  %v8573_v14 = vld [vmem:[#allocation71_spill] sm:$0xff] }
 0x22e   :  { %4581 = vmatpush1.bf16.msra.mxu1 %v4580_v43  ;;  %v4600_v43 = vpack.c.bf16 %v8544_v57, %v8542_v31  ;;  %v8567_v10 = vld [vmem:[#allocation65_spill] sm:$0xff]  ;;  %v8574_v63 = vld [vmem:[#allocation72_spill] sm:$0xff]  ;;  %v8581_v13 = vld [vmem:[#allocation78_spill] sm:$0xff] }
 0x22f   :  { %4583 = vmatprep.subr.bf16.mxu1 %v4582_v16  ;;  %v8550_v16 = vld [vmem:[#allocation18_spill] sm:$0xff]  ;;  %v8576_v21 = vld [vmem:[#allocation76_spill] sm:$0xff]  ;;  %v8578_v47 = vld [vmem:[#allocation37_spill] sm:$0xff] }
 0x230   :  { %v8582_v57 = vld [vmem:[#allocation46_spill] sm:$0xff]  ;;  %v8592_v61 = vld [vmem:[#allocation84_spill] sm:$0xff] }
 0x232   :  { %4585 = vmatpush1.bf16.msra.mxu1 %v4584_v23  ;;  %v8554_v23 = vld [vmem:[#allocation34_spill] sm:$0xff] }
 0x233   :  { %4587 = vmatprep.subr.bf16.mxu1 %v4586_v60  ;;  %v8557_v60 = vld [vmem:[#allocation50_spill] sm:$0xff] }
 0x236   :  { %4589 = vmatpush1.bf16.msra.mxu1 %v4588_v36  ;;  %v8561_v36 = vld [vmem:[#allocation59_spill] sm:$0xff] }
 0x237   :  { %4591 = vmatprep.subr.bf16.mxu1 %v4590_v34  ;;  %v8564_v34 = vld [vmem:[#allocation62_spill] sm:$0xff] }
 0x23a   :  { %4593 = vmatpush1.bf16.msra.mxu1 %v4592_v44  ;;  %v8568_v44 = vld [vmem:[#allocation66_spill] sm:$0xff] }
 0x23b   :  { %4595 = vmatprep.subr.bf16.mxu1 %v4594_v49  ;;  %v8571_v49 = vld [vmem:[#allocation69_spill] sm:$0xff] }
 0x23e   :  { %4597 = vmatpush1.bf16.msra.mxu1 %v4596_v54  ;;  %v8575_v54 = vld [vmem:[#allocation73_spill] sm:$0xff] }
 0x23f   :  { %4599 = vmatprep.subr.bf16.mxu1 %v4598_v1  ;;  %v8579_v1 = vand.u32 4294901760, %v8578_v47  ;;  %v2909_v47 = vld [vmem:[%s7781_s8 + $0xe8] sm:$0xff] }
 0x241   :  { %v6782_v31 = vpack.c.bf16 %v8579_v1, %v8577_v24 }
 0x242   :  { %4601 = vmatpush1.bf16.msra.mxu1 %v4600_v43  ;;  %v8583_v43 = vand.u32 4294901760, %v8582_v57  ;;  %v2893_v57 = vld [vmem:[%s7781_s8 + $0x68] sm:$0xff] }
 0x243   :  { %4603 = vmatprep.subr.bf16.mxu1 %v8545_v39  ;;  %8580 = vst [vmem:[#allocation74_spill] sm:$0xff] %v6782_v31  ;;  %v8584_v39 = vld [vmem:[#allocation51_spill] sm:$0xff] }
 0x245   :  { %1834 = vmatmul.mubr.f32.vlgmr.msra.gmra.mrb[0].mxu1 %v8546_v46 }
 0x246   :  { %4605 = vmatpush1.bf16.msra.mxu1 %v8547_v9  ;;  %1969 = vmatprep.mubr.f32.mxu1 %v8404_v11  ;;  %v8558_v11 = vld [vmem:[#allocation53_spill] sm:$0xff]  ;;  %v8585_v9 = vand.u32 4294901760, %v8584_v39  ;;  %v3007_v39 = vand.u32 4294901760, %v2909_v47 }
 0x247   :  { %4607 = vmatprep.subr.bf16.mxu1 %v8548_v38 }
 0x248   :  { %v6789_v38 = vpack.c.bf16 %v8585_v9, %v8583_v43 }
 0x24a   :  { %4609 = vmatpush1.bf16.msra.mxu1 %v8549_v2  ;;  %8586 = vst [vmem:[#allocation75_spill] sm:$0xff] %v6789_v38  ;;  %v8587_v2 = vld [vmem:[#allocation52_spill] sm:$0xff] }
 0x24b   :  { %4611 = vmatprep.subr.bf16.mxu1 %v8550_v16  ;;  %v8588_v16 = vand.u32 4294901760, %v8587_v2  ;;  %v2959_v2 = vand.u32 4294901760, %v2893_v57 }
 0x24e   :  { %4613 = vmatpush1.bf16.msra.mxu1 %v8551_v56  ;;  %v8589_v56 = vld [vmem:[#allocation14_spill] sm:$0xff] }
 0x24f   :  { %4615 = vmatprep.subr.bf16.mxu1 %v8552_v7  ;;  %v8590_v7 = vand.u32 4294901760, %v8589_v56  ;;  %v2005_v56 = vld [vmem:[%s7779_s6 + $0xd0] sm:$0xff] }
 0x252   :  { %4617 = vmatpush1.bf16.msra.mxu1 %v8553_v55  ;;  %v6796_v55 = vpack.c.bf16 %v8590_v7, %v8588_v16  ;;  %v2006_v7 = vld [vmem:[%s7779_s6 + $0xd8] sm:$0xff] }
 0x253   :  { %4619 = vmatprep.subr.bf16.mxu1 %v8554_v23  ;;  %v8593_v23 = vand.u32 4294901760, %v8592_v61 }
 0x254   :  { %8591 = vst [vmem:[#allocation77_spill] sm:$0xff] %v6796_v55 }
 0x256   :  { %4621 = vmatpush1.bf16.msra.mxu1 %v8555_v0  ;;  %v8594_v0 = vld [vmem:[#allocation16_spill] sm:$0xff] }
 0x257   :  { %4623 = vmatprep.subr.bf16.mxu1 %v8556_v62  ;;  %v8595_v62 = vand.u32 4294901760, %v8594_v0  ;;  %v2097_v0 = vand.u32 4294901760, %v2005_v56 }
 0x25a   :  { %4625 = vmatpush1.bf16.msra.mxu1 %v8557_v60  ;;  %v6804_v60 = vpack.c.bf16 %v8595_v62, %v8593_v23  ;;  %v1989_v62 = vld [vmem:[%s7779_s6 + $0x50] sm:$0xff] }
 0x25b   :  { %4627 = vmatprep.subr.bf16.mxu1 %v8558_v11  ;;  %v8597_v11 = vld [vmem:[#allocation24_spill] sm:$0xff] }
 0x25c   :  { %8596 = vst [vmem:[#allocation79_spill] sm:$0xff] %v6804_v60 }
 0x25e   :  { %4629 = vmatpush1.bf16.msra.mxu1 %v8559_v27  ;;  %v8598_v27 = vand.u32 4294901760, %v8597_v11  ;;  %v1990_v11 = vld [vmem:[%s7779_s6 + $0x58] sm:$0xff] }
 0x25f   :  { %4631 = vmatprep.subr.bf16.mxu1 %v8560_v8  ;;  %v8599_v8 = vld [vmem:[#allocation27_spill] sm:$0xff] }
 0x262   :  { %4633 = vmatpush1.bf16.msra.mxu1 %v8561_v36  ;;  %v8600_v36 = vand.u32 4294901760, %v8599_v8  ;;  %v2100_v8 = vand.u32 4294901760, %v2006_v7 }
 0x263   :  { %4635 = vmatprep.subr.bf16.mxu1 %v8562_v5 }
 0x264   :  { %v6811_v5 = vpack.c.bf16 %v8600_v36, %v8598_v27  ;;  %v2910_v27 = vld [vmem:[%s7781_s8 + $0xf0] sm:$0xff]  ;;  %v2049_v36 = vand.u32 4294901760, %v1989_v62 }
 0x266   :  { %4637 = vmatpush1.bf16.msra.mxu1 %v8563_v48  ;;  %8601 = vst [vmem:[#allocation11_spill] sm:$0xff] %v6811_v5  ;;  %v8603_v48 = vld [vmem:[#allocation35_spill] sm:$0xff] }
 0x267   :  { %4639 = vmatprep.subr.bf16.mxu1 %v8564_v34  ;;  %v8604_v34 = vand.u32 4294901760, %v8603_v48  ;;  %v2911_v48 = vld [vmem:[%s7781_s8 + $0xf8] sm:$0xff] }
 0x26a   :  { %4641 = vmatpush1.bf16.msra.mxu1 %v8565_v26 }
 0x26b   :  { %4643 = vmatprep.subr.bf16.mxu1 %v8566_v17  ;;  %v8606_v17 = vand.u32 4294901760, %v6437_v22  ;;  %v8616_v22 = vand.u32 4294901760, %v6543_v59  ;;  %v6867_v59 = vld [vmem:[%s7779_s6 + $0xc0] sm:$0xff] }
 0x26c   :  { %v8044_v28 = vand.u32 4294901760, %v6867_v59 }
 0x26e   :  { %4645 = vmatpush1.bf16.msra.mxu1 %v8567_v10  ;;  %v8607_v10 = vand.u32 4294901760, %v6457_v58  ;;  %v8617_v58 = vand.u32 4294901760, %v6548_v41  ;;  %v6872_v41 = vld [vmem:[%s7779_s6 + $0xc8] sm:$0xff] }
 0x26f   :  { %4647 = vmatprep.subr.bf16.mxu1 %v8568_v44  ;;  %v8043_v33 = vand.u32 4294901760, %v6872_v41 }
 0x270   :  { %v6825_v44 = vpack.c.bf16 %v8607_v10, %v8606_v17  ;;  %v2894_v17 = vld [vmem:[%s7781_s8 + $0x70] sm:$0xff]  ;;  %v3013_v10 = vand.u32 4294901760, %v2911_v48 }
 0x271   :  { %v6907_v43 = vpack.c.bf16 %v8043_v33, %v8044_v28  ;;  %v1991_v28 = vld [vmem:[%s7779_s6 + $0x60] sm:$0xff] }
 0x272   :  { %4649 = vmatpush1.bf16.msra.mxu1 %v8569_v29  ;;  %8608 = vst [vmem:[#allocation12_spill] sm:$0xff] %v6825_v44  ;;  %v8609_v29 = vand.u32 4294901760, %v6462_v35  ;;  %v6853_v35 = vpack.c.bf16 %v3001_v51, %v2998_v25  ;;  %v6889_v25 = vld [vmem:[%s7781_s8 + $0xe0] sm:$0xff] }
 0x273   :  { %4651 = vmatprep.subr.bf16.mxu1 %v8570_v3  ;;  %v8610_v3 = vand.u32 4294901760, %v6467_v12  ;;  %v8620_v12 = vand.u32 4294901760, %v6626_v37  ;;  %v6879_v37 = vld [vmem:[%s7779_s6 + $0x40] sm:$0xff]  ;;  %v3004_v1 = vand.u32 4294901760, %v6889_v25  ;;  %8623 = vst [vmem:[#allocation31_spill] sm:$0xff] %v6907_v43  ;;  %4683 = vmatprep.subr.bf16.mxu0 %v6907_v43 }
 0x274   :  { %8619 = vst [vmem:[#allocation25_spill] sm:$0xff] %v6853_v35  ;;  %v2043_v51 = vand.u32 4294901760, %v6879_v37 }
 0x275   :  { %v6918_v61 = vpack.c.bf16 %v3007_v39, %v3004_v1 }
 0x276   :  { %4653 = vmatpush1.bf16.msra.mxu1 %v8571_v49  ;;  %v6832_v49 = vpack.c.bf16 %v8610_v3, %v8609_v29  ;;  %v2895_v29 = vld [vmem:[%s7781_s8 + $0x78] sm:$0xff]  ;;  %v2962_v3 = vand.u32 4294901760, %v2894_v17 }
 0x277   :  { %4655 = vmatprep.subr.bf16.mxu1 %v8572_v32  ;;  %8625 = vst [vmem:[#allocation42_spill] sm:$0xff] %v6918_v61 }
 0x278   :  { %8611 = vst [vmem:[#allocation13_spill] sm:$0xff] %v6832_v49 }
 0x27a   :  { %4657 = vmatpush1.bf16.msra.mxu1 %v8573_v14  ;;  %v8614_v14 = vand.u32 4294901760, %v6538_v18  ;;  %v8621_v18 = vand.u32 4294901760, %v6639_v52  ;;  %v6884_v52 = vld [vmem:[%s7779_s6 + $0x48] sm:$0xff] }
 0x27b   :  { %4659 = vmatprep.subr.bf16.mxu1 %v8574_v63  ;;  %v2046_v24 = vand.u32 4294901760, %v6884_v52 }
 0x27d   :  { %v6909_v16 = vpack.c.bf16 %v2046_v24, %v2043_v51 }
 0x27e   :  { %4661 = vmatpush1.bf16.msra.mxu1 %v8575_v54  ;;  %v6846_v54 = vpack.c.bf16 %v8617_v58, %v8616_v22  ;;  %v2007_v22 = vld [vmem:[%s7779_s6 + $0xe0] sm:$0xff]  ;;  %v2008_v58 = vld [vmem:[%s7779_s6 + $0xe8] sm:$0xff] }
 0x27f   :  { %4663 = vmatprep.subr.bf16.mxu1 %v8576_v21  ;;  %v6860_v21 = vpack.c.bf16 %v8621_v18, %v8620_v12  ;;  %8624 = vst [vmem:[#allocation34_spill] sm:$0xff] %v6909_v16  ;;  %4685 = vmatpush3.bf16.msra.mxu0 %v6909_v16  ;;  %v2103_v18 = vand.u32 4294901760, %v2007_v22  ;;  %v2106_v33 = vand.u32 4294901760, %v2008_v58  ;;  %v6991_v16 = vsub.f32 %v6879_v37, %v2043_v51 }
 0x280   :  { %8618 = vst [vmem:[#allocation18_spill] sm:$0xff] %v6846_v54  ;;  %v7010_v37 = vsub.f32 %v1989_v62, %v2049_v36 }
 0x281   :  { %8622 = vst [vmem:[#allocation26_spill] sm:$0xff] %v6860_v21  ;;  %8639 = vst [vmem:[#allocation63_spill] sm:$0xff] %v6991_v16 }
 0x282   :  { %4665 = vmatpush1.bf16.msra.mxu1 %v8581_v13  ;;  %v2892_v13 = vld [vmem:[%s7781_s8 + $0x60] sm:$0xff]  ;;  %8647 = vst [vmem:[#allocation71_spill] sm:$0xff] %v7010_v37 }
 0x283   :  { %5019 = vmatprep.subr.bf16.mxu1 %v6782_v31  ;;  %v2956_v9 = vand.u32 4294901760, %v2892_v13 }
 0x285   :  { %1971 = vmatmul.mubr.f32.vlgmr.msra.gmra.mrb[0].mxu1 %v8546_v46  ;;  %v8602_v46 = vand.u32 4294901760, %v6398_v6  ;;  %v8612_v6 = vld [vmem:[#allocation87_spill] sm:$0xff]  ;;  %v6920_v23 = vpack.c.bf16 %v2959_v2, %v2956_v9  ;;  %v7001_v43 = vsub.f32 %v2892_v13, %v2956_v9 }
 0x286   :  { %5021 = vmatpush3.bf16.msra.mxu1 %v6789_v38  ;;  %v8613_v32 = vand.u32 4294901760, %v8612_v6  ;;  %v6943_v6 = vpack.c.bf16 %v2100_v8, %v2097_v0  ;;  %v6999_v38 = vsub.f32 %v2909_v47, %v3007_v39  ;;  %v7021_v47 = vsub.f32 %v2894_v17, %v2962_v3  ;;  %v1994_v13 = vld [vmem:[%s7779_s6 + $0x78] sm:$0xff] }
 0x287   :  { %5023 = vmatprep.subr.bf16.mxu1 %v6796_v55  ;;  %v6818_v26 = vpack.c.bf16 %v8604_v34, %v8602_v46  ;;  %8626 = vst [vmem:[#allocation43_spill] sm:$0xff] %v6920_v23  ;;  %v2052_v46 = vand.u32 4294901760, %v1990_v11  ;;  %v3010_v34 = vand.u32 4294901760, %v2910_v27  ;;  %v8634_v55 = vld [vmem:[#allocation47_spill] sm:$0xff]  ;;  %8643 = vst [vmem:[#allocation67_spill] sm:$0xff] %v7001_v43  ;;  %v7030_v39 = vsub.f32 %v2008_v58, %v2106_v33  ;;  %v8669_v58 = vld [vmem:[#allocation36_spill] sm:$0xff] }
 0x288   :  { %v6839_v63 = vpack.c.bf16 %v8614_v14, %v8613_v32  ;;  %8627 = vst [vmem:[#allocation50_spill] sm:$0xff] %v6943_v6  ;;  %v2965_v14 = vand.u32 4294901760, %v2895_v29  ;;  %4687 = vmatprep.subr.bf16.mxu0 %v6943_v6  ;;  %8642 = vst [vmem:[#allocation66_spill] sm:$0xff] %v6999_v38 }
 0x289   :  { %8605 = vst [vmem:[#allocation81_spill] sm:$0xff] %v6818_v26  ;;  %v6945_v32 = vpack.c.bf16 %v2052_v46, %v2049_v36  ;;  %v6953_v12 = vpack.c.bf16 %v3013_v10, %v3010_v34  ;;  %v7012_v51 = vsub.f32 %v1990_v11, %v2052_v46  ;;  %8651 = vst [vmem:[#allocation37_spill] sm:$0xff] %v7021_v47  ;;  %v2064_v11 = vand.u32 4294901760, %v1994_v13 }
 0x28a   :  { %5025 = vmatpush3.bf16.msra.mxu1 %v6804_v60  ;;  %8615 = vst [vmem:[#allocation15_spill] sm:$0xff] %v6839_v63  ;;  %v8633_v60 = vld [vmem:[#allocation45_spill] sm:$0xff]  ;;  %8654 = vst [vmem:[#allocation51_spill] sm:$0xff] %v7030_v39  ;;  %v8661_v36 = vand.u32 4294901760, %v8634_v55  ;;  %v8123_v43 = vand.u32 4294901760, %v7030_v39 }
 0x28b   :  { %5027 = vmatprep.subr.bf16.mxu1 %v6811_v5  ;;  %8628 = vst [vmem:[#allocation53_spill] sm:$0xff] %v6945_v32  ;;  %8629 = vst [vmem:[#allocation57_spill] sm:$0xff] %v6953_v12  ;;  %4689 = vmatpush3.bf16.msra.mxu0 %v6945_v32  ;;  %v8637_v32 = vand.u32 4294901760, %v6872_v41  ;;  %v4730_v53 = vpack.c.bf16 %v8634_v55, %v8633_v60 }
 0x28c   :  { %8648 = vst [vmem:[#allocation72_spill] sm:$0xff] %v7012_v51 }
 0x28d   :  { %v6988_v6 = vsub.f32 %v6872_v41, %v8637_v32  ;;  %v7008_v41 = vsub.f32 %v2006_v7, %v2100_v8 }
 0x28e   :  { %5029 = vmatpush3.bf16.msra.mxu1 %v6818_v26 }
 0x28f   :  { %5031 = vmatprep.subr.bf16.mxu1 %v6825_v44  ;;  %v2010_v44 = vld [vmem:[%s7779_s6 + $0xf8] sm:$0xff]  ;;  %8638 = vst [vmem:[#allocation62_spill] sm:$0xff] %v6988_v6  ;;  %8646 = vst [vmem:[#allocation70_spill] sm:$0xff] %v7008_v41  ;;  %v8111_v47 = vand.u32 4294901760, %v6988_v6 }
 0x290   :  { %v2112_v5 = vand.u32 4294901760, %v2010_v44 }
 0x292   :  { %5033 = vmatpush3.bf16.msra.mxu1 %v6832_v49  ;;  %v2009_v49 = vld [vmem:[%s7779_s6 + $0xf0] sm:$0xff] }
 0x293   :  { %5035 = vmatprep.subr.bf16.mxu1 %v6839_v63  ;;  %v2109_v26 = vand.u32 4294901760, %v2009_v49 }
 0x295   :  { %v7038_v7 = vsub.f32 %v2009_v49, %v2109_v26 }
 0x296   :  { %5037 = vmatpush3.bf16.msra.mxu1 %v6846_v54  ;;  %v6966_v54 = vpack.c.bf16 %v2106_v33, %v2103_v18  ;;  %v2253_v33 = vsub.f32 %v8634_v55, %v8661_v36 }
 0x297   :  { %5039 = vmatprep.subr.bf16.mxu1 %v6853_v35  ;;  %8658 = vst [vmem:[#allocation16_spill] sm:$0xff] %v7038_v7 }
 0x298   :  { %8631 = vst [vmem:[#allocation59_spill] sm:$0xff] %v6966_v54  ;;  %4691 = vmatprep.subr.bf16.mxu0 %v6966_v54  ;;  %v6994_v54 = vsub.f32 %v6884_v52, %v2046_v24  ;;  %v1993_v52 = vld [vmem:[%s7779_s6 + $0x70] sm:$0xff]  ;;  %v7019_v24 = vsub.f32 %v2911_v48, %v3013_v10  ;;  %v2254_v10 = vand.u32 4294901760, %v2253_v33 }
 0x299   :  { %v2061_v62 = vand.u32 4294901760, %v1993_v52 }
 0x29a   :  { %5041 = vmatpush3.bf16.msra.mxu1 %v6860_v21  ;;  %v2055_v21 = vand.u32 4294901760, %v1991_v28  ;;  %8640 = vst [vmem:[#allocation64_spill] sm:$0xff] %v6994_v54  ;;  %8650 = vst [vmem:[#allocation76_spill] sm:$0xff] %v7019_v24 }
 0x29b   :  { %5043 = vmatprep.subr.bf16.mxu1 %v6918_v61  ;;  %v6962_v61 = vpack.c.bf16 %v2965_v14, %v2962_v3  ;;  %v7055_v48 = vpack.c.bf16 %v2064_v11, %v2061_v62 }
 0x29c   :  { %v7032_v9 = vsub.f32 %v1991_v28, %v2055_v21 }
 0x29d   :  { %8630 = vst [vmem:[#allocation58_spill] sm:$0xff] %v6962_v61  ;;  %8667 = vst [vmem:[#allocation35_spill] sm:$0xff] %v7055_v48 }
 0x29e   :  { %5045 = vmatpush3.bf16.msra.mxu1 %v6920_v23  ;;  %v1992_v23 = vld [vmem:[%s7779_s6 + $0x68] sm:$0xff]  ;;  %8655 = vst [vmem:[#allocation52_spill] sm:$0xff] %v7032_v9 }
 0x29f   :  { %v2058_v35 = vand.u32 4294901760, %v1992_v23  ;;  %5047 = vmatprep.subr.bf16.mxu1 %v6953_v12  ;;  %v6997_v12 = vsub.f32 %v6889_v25, %v3004_v1  ;;  %v7017_v25 = vsub.f32 %v2910_v27, %v3010_v34  ;;  %v7023_v1 = vsub.f32 %v2895_v29, %v2965_v14 }
 0x2a0   :  { %v8660_v27 = vand.u32 4294901760, %v8633_v60  ;;  %v7057_v34 = vsub.f32 %v1994_v13, %v2064_v11 }
 0x2a1   :  { %v6969_v63 = vpack.c.bf16 %v2058_v35, %v2055_v21  ;;  %8641 = vst [vmem:[#allocation65_spill] sm:$0xff] %v6997_v12  ;;  %8649 = vst [vmem:[#allocation73_spill] sm:$0xff] %v7017_v25  ;;  %v8662_v21 = vld [vmem:[#allocation48_spill] sm:$0xff] }
 0x2a2   :  { %5049 = vmatpush3.bf16.msra.mxu1 %v6962_v61  ;;  %v8635_v61 = vand.u32 4294901760, %v6867_v59  ;;  %8652 = vst [vmem:[#allocation78_spill] sm:$0xff] %v7023_v1  ;;  %v2246_v8 = vsub.f32 %v8633_v60, %v8660_v27  ;;  %v8090_v28 = vand.u32 4294901760, %v8662_v21  ;;  %8668 = vst [vmem:[#allocation87_spill] sm:$0xff] %v7057_v34 }
 0x2a3   :  { %8632 = vst [vmem:[#allocation60_spill] sm:$0xff] %v6969_v63  ;;  %4693 = vmatpush3.bf16.msra.mxu0 %v6969_v63 }
 0x2a4   :  { %v6983_v31 = vsub.f32 %v6867_v59, %v8635_v61  ;;  %v7003_v59 = vsub.f32 %v2893_v57, %v2959_v2  ;;  %v7006_v61 = vsub.f32 %v2005_v56, %v2097_v0  ;;  %v7028_v57 = vsub.f32 %v2007_v22, %v2103_v18 }
 0x2a5   :  { %v7034_v2 = vsub.f32 %v1992_v23, %v2058_v35  ;;  %v7036_v56 = vpack.c.bf16 %v2112_v5, %v2109_v26  ;;  %v7040_v0 = vsub.f32 %v2010_v44, %v2112_v5  ;;  %v7050_v35 = vsub.f32 %v1993_v52, %v2061_v62  ;;  %v8664_v26 = vld [vmem:[#allocation54_spill] sm:$0xff]  ;;  %v8665_v5 = vld [vmem:[#allocation32_spill] sm:$0xff]  ;;  %v8666_v23 = vld [vmem:[#allocation33_spill] sm:$0xff] }
 0x2a6   :  { %8636 = vst [vmem:[#allocation61_spill] sm:$0xff] %v6983_v31  ;;  %8644 = vst [vmem:[#allocation68_spill] sm:$0xff] %v7003_v59  ;;  %v8089_v49 = vand.u32 4294901760, %v8664_v26  ;;  %v8087_v44 = vand.u32 4294901760, %v8665_v5  ;;  %v8088_v46 = vand.u32 4294901760, %v8666_v23  ;;  %v2247_v17 = vand.u32 4294901760, %v2246_v8 }
 0x2a7   :  { %8645 = vst [vmem:[#allocation69_spill] sm:$0xff] %v7006_v61  ;;  %8653 = vst [vmem:[#allocation46_spill] sm:$0xff] %v7028_v57  ;;  %4695 = vmatprep.subr.bf16.mxu0 %v7036_v56  ;;  %v2134_v29 = vsub.f32 %v8662_v21, %v8090_v28  ;;  %v8093_v18 = vand.u32 4294901760, %v8669_v58  ;;  %v8670_v52 = vld [vmem:[#allocation86_spill] sm:$0xff] }
 0x2a8   :  { %8656 = vst [vmem:[#allocation14_spill] sm:$0xff] %v7034_v2  ;;  %8657 = vst [vmem:[#allocation84_spill] sm:$0xff] %v7036_v56  ;;  %v2141_v3 = vsub.f32 %v8664_v26, %v8089_v49  ;;  %v2260_v32 = vsub.f32 %v8665_v5, %v8087_v44  ;;  %v2267_v14 = vsub.f32 %v8666_v23, %v8088_v46  ;;  %4697 = vmatpush3.bf16.msra.mxu0 %v7055_v48  ;;  %v8671_v62 = vld [vmem:[#allocation90_spill] sm:$0xff] }
 0x2a9   :  { %8659 = vst [vmem:[#allocation24_spill] sm:$0xff] %v7040_v0  ;;  %8663 = vst [vmem:[#allocation27_spill] sm:$0xff] %v7050_v35  ;;  %v4698_v22 = vpack.c.bf16 %v2254_v10, %v2247_v17  ;;  %v8096_v13 = vand.u32 4294901760, %v8670_v52  ;;  %v8097_v11 = vand.u32 4294901760, %v8671_v62  ;;  %v2135_v27 = vand.u32 4294901760, %v2134_v29  ;;  %v8672_v10 = vld [vmem:[#allocation91_spill] sm:$0xff] }
 0x2aa   :  { %v2142_v8 = vand.u32 4294901760, %v2141_v3  ;;  %v2261_v36 = vand.u32 4294901760, %v2260_v32  ;;  %v2268_v33 = vand.u32 4294901760, %v2267_v14  ;;  %v2148_v44 = vsub.f32 %v8669_v58, %v8093_v18  ;;  %v8673_v3 = vld [vmem:[#allocation92_spill] sm:$0xff]  ;;  %v8674_v14 = vld [vmem:[#allocation94_spill] sm:$0xff] }
 0x2ab   :  { %4699 = vmatprep.subr.bf16.mxu0 %v4698_v22  ;;  %v2155_v46 = vsub.f32 %v8670_v52, %v8096_v13  ;;  %v2274_v17 = vsub.f32 %v8671_v62, %v8097_v11  ;;  %v8098_v49 = vand.u32 4294901760, %v8672_v10  ;;  %v8101_v32 = vand.u32 4294901760, %v8673_v3 }
 0x2ac   :  { %v7085_v28 = vpack.c.bf16 %v2142_v8, %v2135_v27  ;;  %v7087_v29 = vpack.c.bf16 %v2268_v33, %v2261_v36  ;;  %v8102_v22 = vand.u32 4294901760, %v8674_v14  ;;  %v2149_v48 = vand.u32 4294901760, %v2148_v44 }
 0x2ad   :  { %v2156_v18 = vand.u32 4294901760, %v2155_v46  ;;  %v2275_v56 = vand.u32 4294901760, %v2274_v17  ;;  %v2281_v13 = vsub.f32 %v8672_v10, %v8098_v49  ;;  %v2162_v11 = vsub.f32 %v8673_v3, %v8101_v32 }
 0x2ae   :  { %v2169_v27 = vsub.f32 %v8674_v14, %v8102_v22  ;;  %v8104_v8 = vand.u32 4294901760, %v6634_v30  ;;  %v8107_v36 = vand.u32 4294901760, %v6649_v42  ;;  %v8108_v46 = vand.u32 4294901760, %v6651_v45 }
 0x2af   :  { %v7102_v33 = vpack.c.bf16 %v2156_v18, %v2149_v48  ;;  %v2282_v44 = vand.u32 4294901760, %v2281_v13  ;;  %v8109_v17 = vand.u32 4294901760, %v6656_v40  ;;  %v2163_v49 = vand.u32 4294901760, %v2162_v11 }
 0x2b0   :  { %v2170_v63 = vand.u32 4294901760, %v2169_v27  ;;  %v2288_v32 = vsub.f32 %v6634_v30, %v8104_v8  ;;  %v2295_v22 = vsub.f32 %v6649_v42, %v8107_v36  ;;  %v2176_v48 = vsub.f32 %v6651_v45, %v8108_v46 }
 0x2b1   :  { %v7112_v1 = vpack.c.bf16 %v2282_v44, %v2275_v56  ;;  %v2183_v18 = vsub.f32 %v6656_v40, %v8109_v17  ;;  %v8110_v13 = vand.u32 4294901760, %v6983_v31  ;;  %v8112_v44 = vand.u32 4294901760, %v6991_v16 }
 0x2b2   :  { %v7121_v11 = vpack.c.bf16 %v2170_v63, %v2163_v49  ;;  %v2289_v27 = vand.u32 4294901760, %v2288_v32  ;;  %v2296_v8 = vand.u32 4294901760, %v2295_v22  ;;  %v2177_v24 = vand.u32 4294901760, %v2176_v48 }
 0x2b3   :  { %v2184_v36 = vand.u32 4294901760, %v2183_v18  ;;  %v2302_v56 = vsub.f32 %v6983_v31, %v8110_v13  ;;  %v2309_v17 = vsub.f32 %v6988_v6, %v8111_v47  ;;  %v8115_v63 = vand.u32 4294901760, %v6994_v54 }
 0x2b4   :  { %v7128_v46 = vpack.c.bf16 %v2296_v8, %v2289_v27  ;;  %v8116_v49 = vand.u32 4294901760, %v7006_v61  ;;  %v2190_v48 = vsub.f32 %v6991_v16, %v8112_v44  ;;  %v8117_v18 = vand.u32 4294901760, %v7008_v41 }
 0x2b5   :  { %v7135_v32 = vpack.c.bf16 %v2184_v36, %v2177_v24  ;;  %v2303_v22 = vand.u32 4294901760, %v2302_v56  ;;  %v2310_v13 = vand.u32 4294901760, %v2309_v17  ;;  %v2197_v8 = vsub.f32 %v6994_v54, %v8115_v63 }
 0x2b6   :  { %v2316_v27 = vsub.f32 %v7006_v61, %v8116_v49  ;;  %v8120_v47 = vand.u32 4294901760, %v7010_v37  ;;  %v2191_v24 = vand.u32 4294901760, %v2190_v48  ;;  %v2323_v36 = vsub.f32 %v7008_v41, %v8117_v18 }
 0x2b7   :  { %v8121_v56 = vand.u32 4294901760, %v7012_v51  ;;  %v8122_v44 = vand.u32 4294901760, %v7028_v57  ;;  %v7153_v17 = vpack.c.bf16 %v2310_v13, %v2303_v22  ;;  %v2198_v25 = vand.u32 4294901760, %v2197_v8 }
 0x2b8   :  { %v2317_v59 = vand.u32 4294901760, %v2316_v27  ;;  %v2204_v63 = vsub.f32 %v7010_v37, %v8120_v47  ;;  %v2324_v49 = vand.u32 4294901760, %v2323_v36  ;;  %v8125_v22 = vand.u32 4294901760, %v7032_v9 }
 0x2b9   :  { %v2211_v48 = vsub.f32 %v7012_v51, %v8121_v56  ;;  %v2330_v18 = vsub.f32 %v7028_v57, %v8122_v44  ;;  %v7165_v38 = vpack.c.bf16 %v2198_v25, %v2191_v24  ;;  %v8126_v8 = vand.u32 4294901760, %v7034_v2 }
 0x2ba   :  { %v2205_v13 = vand.u32 4294901760, %v2204_v63  ;;  %v7169_v27 = vpack.c.bf16 %v2324_v49, %v2317_v59  ;;  %v2337_v56 = vsub.f32 %v7030_v39, %v8123_v43  ;;  %v2218_v44 = vsub.f32 %v7032_v9, %v8125_v22 }
 0x2bb   :  { %v2212_v36 = vand.u32 4294901760, %v2211_v48  ;;  %v2331_v47 = vand.u32 4294901760, %v2330_v18  ;;  %v2225_v25 = vsub.f32 %v7034_v2, %v8126_v8  ;;  %v8132_v63 = vand.u32 4294901760, %v7038_v7 }
 0x2bc   :  { %v8136_v24 = vand.u32 4294901760, %v7040_v0  ;;  %v2338_v49 = vand.u32 4294901760, %v2337_v56  ;;  %v8134_v18 = vand.u32 4294901760, %v7050_v35  ;;  %v8135_v48 = vand.u32 4294901760, %v7057_v34 }
 0x2bd   :  { %v7182_v59 = vpack.c.bf16 %v2212_v36, %v2205_v13  ;;  %v2219_v43 = vand.u32 4294901760, %v2218_v44  ;;  %v2226_v12 = vand.u32 4294901760, %v2225_v25  ;;  %v2344_v22 = vsub.f32 %v7038_v7, %v8132_v63 }
 0x2be   :  { %v2351_v8 = vsub.f32 %v7040_v0, %v8136_v24  ;;  %v4722_v50 = vpack.c.bf16 %v2338_v49, %v2331_v47  ;;  %v2232_v13 = vsub.f32 %v7050_v35, %v8134_v18  ;;  %v2239_v56 = vsub.f32 %v7057_v34, %v8135_v48 }
 0x2bf   :  { %v4724_v36 = vpack.c.bf16 %v2226_v12, %v2219_v43  ;;  %v2345_v44 = vand.u32 4294901760, %v2344_v22  ;;  %v4732_v47 = vpack.c.bf16 %v8664_v26, %v8662_v21  ;;  %v4734_v49 = vpack.c.bf16 %v8666_v23, %v8665_v5 }
 0x2c0   :  { %v2352_v25 = vand.u32 4294901760, %v2351_v8  ;;  %v2233_v20 = vand.u32 4294901760, %v2232_v13  ;;  %v2240_v19 = vand.u32 4294901760, %v2239_v56  ;;  %v4736_v18 = vpack.c.bf16 %v8670_v52, %v8669_v58 }
 0x2c1   :  { %v4738_v43 = vpack.c.bf16 %v8672_v10, %v8671_v62  ;;  %v4740_v12 = vpack.c.bf16 %v8674_v14, %v8673_v3  ;;  %v4746_v22 = vpack.c.bf16 %v6988_v6, %v6983_v31  ;;  %v4748_v8 = vpack.c.bf16 %v6994_v54, %v6991_v16  ;;  %v681_v54 = vld [vmem:[%s7778_s5] sm:$0x3] }
 0x2c2   :  { %v4726_v4 = vpack.c.bf16 %v2352_v25, %v2345_v44  ;;  %v4728_v63 = vpack.c.bf16 %v2240_v19, %v2233_v20  ;;  %v4742_v19 = vpack.c.bf16 %v6649_v42, %v6634_v30  ;;  %v4744_v20 = vpack.c.bf16 %v6656_v40, %v6651_v45 }
 0x2c3   :  { %v4750_v13 = vpack.c.bf16 %v7008_v41, %v7006_v61  ;;  %v4752_v56 = vpack.c.bf16 %v7012_v51, %v7010_v37  ;;  %v4754_v44 = vpack.c.bf16 %v7030_v39, %v7028_v57  ;;  %v4756_v25 = vpack.c.bf16 %v7034_v2, %v7032_v9  ;;  %v8675_v41 = vld [vmem:[#allocation80_spill] sm:$0xff] }
 0x2c4   :  { %v4758_v48 = vpack.c.bf16 %v7040_v0, %v7038_v7  ;;  %v8676_v61 = vsub.s32 0, %v8675_v41  ;;  %v8677_v51 = vsub.s32 1, %v8675_v41 }
 0x2c6   :  { %v686_v16 = vrot.slane %v681_v54, %v8676_v61  ;;  %v690_v37 = vrot.slane %v681_v54, %v8677_v51 }
 0x358   :  { %v1972_v39 = vpop.f32.mrb[0].mxu1 }
 0x359   :  { %v5052_v57 = vadd.f32 %v1972_v39, %v686_v16  ;;  %v1974_v6 = vpop.f32.mrb[1].mxu1 }
 0x35a   :  { %v5053_v2 = vadd.f32 %v1974_v6, %v690_v37  ;;  %v8688_v37 = vld [vmem:[#allocation20_spill] sm:$0xff] }
 0x35b   :  { %v1977_v9 = vmax.f32 %v5052_v57, 0.0  ;;  %v8158_v51 = vand.u32 4294901760, %v8688_v37 }
 0x35c   :  { %v1978_v31 = vmax.f32 %v5053_v2, 0.0 }
 0x35d   :  { %v7237_v0 = vand.u32 4294901760, %v1977_v9  ;;  %v3035_v2 = vsub.f32 %v8688_v37, %v8158_v51 }
 0x35e   :  { %v7239_v7 = vand.u32 4294901760, %v1978_v31 }
 0x35f   :  { %8678 = vst [vmem:[#allocation45_spill] sm:$0xff] %v7237_v0  ;;  %v7242_v24 = vsub.f32 %v1977_v9, %v7237_v0 }
 0x360   :  { %8679 = vst [vmem:[#allocation47_spill] sm:$0xff] %v7239_v7  ;;  %v7245_v40 = vsub.f32 %v1978_v31, %v7239_v7  ;;  %3774 = vmatprep.mubr.f32.mxu1 %v7239_v7 }
 0x361   :  { %8680 = vst [vmem:[#allocation48_spill] sm:$0xff] %v7242_v24  ;;  %v7249_v54 = vand.u32 4294901760, %v7242_v24  ;;  %3776 = vmatmul.mubr.f32.vlgmr.msra.gmra.mrb[2].mxu1 %v7237_v0 }
 0x362   :  { %8681 = vst [vmem:[#allocation54_spill] sm:$0xff] %v7245_v40  ;;  %v7253_v16 = vand.u32 4294901760, %v7245_v40 }
 0x363   :  { %8682 = vst [vmem:[#allocation32_spill] sm:$0xff] %v7249_v54  ;;  %v2123_v6 = vsub.f32 %v7242_v24, %v7249_v54 }
 0x364   :  { %8683 = vst [vmem:[#allocation33_spill] sm:$0xff] %v7253_v16  ;;  %v2117_v61 = vsub.f32 %v7245_v40, %v7253_v16 }
 0x365   :  { %v7261_v31 = vand.u32 4294901760, %v2123_v6  ;;  %v8699_v6 = vld [vmem:[#allocation56_spill] sm:$0xff] }
 0x366   :  { %v7259_v41 = vand.u32 4294901760, %v2117_v61  ;;  %v8159_v61 = vand.u32 4294901760, %v8699_v6 }
 0x367   :  { %8685 = vst [vmem:[#allocation86_spill] sm:$0xff] %v7261_v31 }
 0x368   :  { %8684 = vst [vmem:[#allocation36_spill] sm:$0xff] %v7259_v41  ;;  %2119 = vmatprep.mubr.f32.mxu0 %v7259_v41  ;;  %v8723_v41 = vld [vmem:[#allocation99_spill] sm:$0xff] }
 0x369   :  { %2125 = vmatmul.mubr.f32.vlgmr.msra.gmra.mrb[2].mxu0 %v7261_v31 }
 0x36a   :  { %4701 = vmatpush3.bf16.msra.mxu0 %v7085_v28  ;;  %2355 = vmatprep.mubr.f32.mxu0 %v7239_v7 }
 0x36b   :  { %4703 = vmatprep.subr.bf16.mxu0 %v7087_v29 }
 0x36e   :  { %4705 = vmatpush3.bf16.msra.mxu0 %v7102_v33 }
 0x36f   :  { %4707 = vmatprep.subr.bf16.mxu0 %v7112_v1  ;;  %v8689_v1 = vld [vmem:[#allocation21_spill] sm:$0xff] }
 0x370   :  { %v8157_v57 = vand.u32 4294901760, %v8689_v1 }
 0x372   :  { %4709 = vmatpush3.bf16.msra.mxu0 %v7121_v11  ;;  %v3042_v28 = vsub.f32 %v8689_v1, %v8157_v57  ;;  %v8708_v57 = vld [vmem:[#allocation85_spill] sm:$0xff] }
 0x373   :  { %4711 = vmatprep.subr.bf16.mxu0 %v7128_v46  ;;  %v8690_v46 = vld [vmem:[#allocation22_spill] sm:$0xff] }
 0x374   :  { %v8155_v11 = vand.u32 4294901760, %v8690_v46 }
 0x376   :  { %4713 = vmatpush3.bf16.msra.mxu0 %v7135_v32  ;;  %v8691_v32 = vld [vmem:[#allocation23_spill] sm:$0xff] }
 0x377   :  { %4715 = vmatprep.subr.bf16.mxu0 %v7153_v17  ;;  %v8154_v17 = vand.u32 4294901760, %v8691_v32 }
 0x37a   :  { %4717 = vmatpush3.bf16.msra.mxu0 %v7165_v38  ;;  %v8687_v38 = vld [vmem:[#allocation19_spill] sm:$0xff] }
 0x37b   :  { %4719 = vmatprep.subr.bf16.mxu0 %v7169_v27  ;;  %v8692_v27 = vpack.c.bf16 %v7057_v34, %v7050_v35 }
 0x37e   :  { %4721 = vmatpush3.bf16.msra.mxu0 %v7182_v59  ;;  %v3043_v59 = vand.u32 4294901760, %v3042_v28  ;;  %v8701_v28 = vld [vmem:[#allocation83_spill] sm:$0xff] }
 0x37f   :  { %4723 = vmatprep.subr.bf16.mxu0 %v4722_v50  ;;  %v8686_v50 = vld [vmem:[#allocation17_spill] sm:$0xff] }
 0x382   :  { %4725 = vmatpush3.bf16.msra.mxu0 %v4724_v36  ;;  %v8694_v36 = vld [vmem:[#allocation29_spill] sm:$0xff] }
 0x383   :  { %4727 = vmatprep.subr.bf16.mxu0 %v4726_v4  ;;  %v8161_v4 = vand.u32 4294901760, %v8686_v50 }
 0x385   :  { %v3147_v39 = vsub.f32 %v8686_v50, %v8161_v4 }
 0x386   :  { %4729 = vmatpush3.bf16.msra.mxu0 %v4728_v63  ;;  %v3036_v63 = vand.u32 4294901760, %v3035_v2 }
 0x387   :  { %4731 = vmatprep.subr.bf16.mxu0 %v4730_v53  ;;  %v8160_v53 = vand.u32 4294901760, %v8687_v38  ;;  %v3148_v29 = vand.u32 4294901760, %v3147_v39  ;;  %v8700_v39 = vld [vmem:[#allocation49_spill] sm:$0xff] }
 0x389   :  { %2357 = vmatmul.mubr.f32.vlgmr.msra.gmra.mrb[4].mxu0 %v7237_v0  ;;  %v3154_v9 = vsub.f32 %v8687_v38, %v8160_v53  ;;  %v8710_v53 = vld [vmem:[#allocation88_spill] sm:$0xff]  ;;  %v8734_v0 = vld [vmem:[#allocation50_spill] sm:$0xff] }
 0x38a   :  { %4733 = vmatpush3.bf16.msra.mxu0 %v4732_v47  ;;  %2492 = vmatprep.mubr.f32.mxu0 %v7245_v40  ;;  %v8152_v47 = vand.u32 4294901760, %v8694_v36  ;;  %v8170_v4 = vand.u32 4294901760, %v8710_v53 }
 0x38b   :  { %4735 = vmatprep.subr.bf16.mxu0 %v4734_v49  ;;  %v3155_v33 = vand.u32 4294901760, %v3154_v9  ;;  %v8695_v49 = vld [vmem:[#allocation41_spill] sm:$0xff] }
 0x38e   :  { %4737 = vmatpush3.bf16.msra.mxu0 %v4736_v18  ;;  %v8693_v18 = vld [vmem:[#allocation28_spill] sm:$0xff] }
 0x38f   :  { %4739 = vmatprep.subr.bf16.mxu0 %v4738_v43  ;;  %v7303_v43 = vpack.c.bf16 %v3155_v33, %v3148_v29  ;;  %v8163_v29 = vand.u32 4294901760, %v8701_v28  ;;  %v8702_v33 = vld [vmem:[#allocation82_spill] sm:$0xff] }
 0x391   :  { %8696 = vst [vmem:[#allocation90_spill] sm:$0xff] %v7303_v43  ;;  %v8722_v43 = vld [vmem:[#allocation102_spill] sm:$0xff] }
 0x392   :  { %4741 = vmatpush3.bf16.msra.mxu0 %v4740_v12  ;;  %v3161_v12 = vsub.f32 %v8690_v46, %v8155_v11  ;;  %v8707_v11 = vld [vmem:[#allocation39_spill] sm:$0xff] }
 0x393   :  { %4743 = vmatprep.subr.bf16.mxu0 %v4742_v19  ;;  %v3168_v19 = vsub.f32 %v8691_v32, %v8154_v17 }
 0x396   :  { %4745 = vmatpush3.bf16.msra.mxu0 %v4744_v20  ;;  %v7311_v20 = vpack.c.bf16 %v3043_v59, %v3036_v63  ;;  %v8703_v63 = vld [vmem:[#allocation30_spill] sm:$0xff] }
 0x397   :  { %4747 = vmatprep.subr.bf16.mxu0 %v4746_v22 }
 0x398   :  { %8697 = vst [vmem:[#allocation91_spill] sm:$0xff] %v7311_v20 }
 0x39a   :  { %4749 = vmatpush3.bf16.msra.mxu0 %v4748_v8  ;;  %v3056_v8 = vsub.f32 %v8694_v36, %v8152_v47 }
 0x39b   :  { %4751 = vmatprep.subr.bf16.mxu0 %v4750_v13  ;;  %v3162_v13 = vand.u32 4294901760, %v3161_v12 }
 0x39c   :  { %v3057_v2 = vand.u32 4294901760, %v3056_v8 }
 0x39e   :  { %4753 = vmatpush3.bf16.msra.mxu0 %v4752_v56  ;;  %v3169_v56 = vand.u32 4294901760, %v3168_v19  ;;  %v3182_v19 = vsub.f32 %v8699_v6, %v8159_v61 }
 0x39f   :  { %4755 = vmatprep.subr.bf16.mxu0 %v4754_v44  ;;  %v8698_v44 = vld [vmem:[#allocation55_spill] sm:$0xff] }
 0x3a0   :  { %v7327_v59 = vpack.c.bf16 %v3169_v56, %v3162_v13  ;;  %v3183_v56 = vand.u32 4294901760, %v3182_v19 }
 0x3a2   :  { %4757 = vmatpush3.bf16.msra.mxu0 %v4756_v25  ;;  %v8156_v25 = vand.u32 4294901760, %v8698_v44  ;;  %8704 = vst [vmem:[#allocation92_spill] sm:$0xff] %v7327_v59 }
 0x3a3   :  { %4759 = vmatprep.subr.bf16.mxu0 %v4758_v48  ;;  %v8153_v48 = vand.u32 4294901760, %v8693_v18 }
 0x3a4   :  { %v3175_v12 = vsub.f32 %v8698_v44, %v8156_v25  ;;  %v8168_v25 = vand.u32 4294901760, %v8707_v11 }
 0x3a5   :  { %v3049_v22 = vsub.f32 %v8693_v18, %v8153_v48  ;;  %v8706_v48 = vld [vmem:[#allocation38_spill] sm:$0xff] }
 0x3a6   :  { %4761 = vmatpush3.bf16.msra.mxu0 %v8692_v27  ;;  %v8164_v27 = vand.u32 4294901760, %v8702_v33  ;;  %v3176_v13 = vand.u32 4294901760, %v3175_v12  ;;  %v8167_v17 = vand.u32 4294901760, %v8706_v48  ;;  %v3196_v19 = vsub.f32 %v8707_v11, %v8168_v25 }
 0x3a7   :  { %4763 = vmatprep.subr.bf16.mxu0 %v8695_v49  ;;  %v3050_v9 = vand.u32 4294901760, %v3049_v22  ;;  %v3063_v22 = vsub.f32 %v8701_v28, %v8163_v29  ;;  %v8739_v49 = vld [vmem:[#allocation53_spill] sm:$0xff] }
 0x3a8   :  { %v3070_v8 = vsub.f32 %v8702_v33, %v8164_v27  ;;  %v7349_v29 = vpack.c.bf16 %v3183_v56, %v3176_v13  ;;  %v3189_v12 = vsub.f32 %v8706_v48, %v8167_v17  ;;  %v3197_v56 = vand.u32 4294901760, %v3196_v19 }
 0x3a9   :  { %2495 = vmatmul.mubr.f32.vlgmr.msra.gmra.mrb[6].mxu0 %v7242_v24  ;;  %v7335_v47 = vpack.c.bf16 %v3057_v2, %v3050_v9  ;;  %v3064_v51 = vand.u32 4294901760, %v3063_v22  ;;  %v8709_v9 = vld [vmem:[#allocation40_spill] sm:$0xff]  ;;  %v8714_v24 = vld [vmem:[#allocation95_spill] sm:$0xff] }
 0x3aa   :  { %4765 = vmatpush3.bf16.msra.mxu0 %v8700_v39  ;;  %2599 = vmatprep.mubr.f32.mxu0 %v7253_v16  ;;  %v3071_v61 = vand.u32 4294901760, %v3070_v8  ;;  %v8169_v2 = vand.u32 4294901760, %v8709_v9  ;;  %v8711_v16 = vld [vmem:[#allocation89_spill] sm:$0xff]  ;;  %8712 = vst [vmem:[#allocation80_spill] sm:$0xff] %v7349_v29  ;;  %v3084_v8 = vsub.f32 %v8710_v53, %v8170_v4  ;;  %v3190_v13 = vand.u32 4294901760, %v3189_v12  ;;  %v8715_v29 = vld [vmem:[#allocation44_spill] sm:$0xff] }
 0x3ab   :  { %4767 = vmatprep.subr.bf16.mxu0 %v8703_v63  ;;  %8705 = vst [vmem:[#allocation94_spill] sm:$0xff] %v7335_v47  ;;  %v8172_v40 = vand.u32 4294901760, %v8714_v24  ;;  %v8175_v17 = vand.u32 4294901760, %v8715_v29  ;;  %v8716_v47 = vld [vmem:[#allocation93_spill] sm:$0xff] }
 0x3ac   :  { %v7357_v27 = vpack.c.bf16 %v3071_v61, %v3064_v51  ;;  %v3077_v22 = vsub.f32 %v8709_v9, %v8169_v2  ;;  %v3085_v25 = vand.u32 4294901760, %v3084_v8  ;;  %v8717_v51 = vld [vmem:[#allocation96_spill] sm:$0xff]  ;;  %v7371_v2 = vpack.c.bf16 %v3197_v56, %v3190_v13 }
 0x3ad   :  { %v8176_v61 = vand.u32 4294901760, %v8717_v51  ;;  %v3203_v12 = vsub.f32 %v8714_v24, %v8172_v40  ;;  %v3210_v19 = vsub.f32 %v8715_v29, %v8175_v17  ;;  %v8179_v40 = vand.u32 4294901760, %v8722_v43 }
 0x3ae   :  { %4769 = vmatpush3.bf16.msra.mxu0 %v8708_v57  ;;  %8713 = vst [vmem:[#allocation17_spill] sm:$0xff] %v7357_v27  ;;  %v3078_v59 = vand.u32 4294901760, %v3077_v22  ;;  %v8718_v27 = vld [vmem:[#allocation97_spill] sm:$0xff]  ;;  %8719 = vst [vmem:[#allocation19_spill] sm:$0xff] %v7371_v2  ;;  %v8731_v57 = vld [vmem:[#allocation34_spill] sm:$0xff] }
 0x3af   :  { %4771 = vmatprep.subr.bf16.mxu0 %v8711_v16  ;;  %v8177_v20 = vand.u32 4294901760, %v8718_v27  ;;  %v3091_v22 = vsub.f32 %v8717_v51, %v8176_v61  ;;  %v3204_v13 = vand.u32 4294901760, %v3203_v12  ;;  %v3211_v56 = vand.u32 4294901760, %v3210_v19  ;;  %v8721_v2 = vld [vmem:[#allocation101_spill] sm:$0xff]  ;;  %v8726_v16 = vld [vmem:[#allocation31_spill] sm:$0xff] }
 0x3b0   :  { %v7379_v4 = vpack.c.bf16 %v3085_v25, %v3078_v59  ;;  %v8178_v31 = vand.u32 4294901760, %v8721_v2  ;;  %v8724_v25 = vld [vmem:[#allocation103_spill] sm:$0xff]  ;;  %v3224_v19 = vsub.f32 %v8722_v43, %v8179_v40 }
 0x3b1   :  { %v3098_v8 = vsub.f32 %v8718_v27, %v8177_v20  ;;  %v8182_v59 = vand.u32 4294901760, %v8724_v25  ;;  %v7393_v61 = vpack.c.bf16 %v3211_v56, %v3204_v13 }
 0x3b2   :  { %4773 = vmatpush3.bf16.msra.mxu0 %v8716_v47  ;;  %8720 = vst [vmem:[#allocation20_spill] sm:$0xff] %v7379_v4  ;;  %v8725_v4 = vld [vmem:[#allocation104_spill] sm:$0xff]  ;;  %v3217_v12 = vsub.f32 %v8721_v2, %v8178_v31  ;;  %v3225_v56 = vand.u32 4294901760, %v3224_v19 }
 0x3b3   :  { %4775 = vmatprep.subr.bf16.mxu0 %v6647_v15  ;;  %v3092_v15 = vand.u32 4294901760, %v3091_v22  ;;  %v3099_v17 = vand.u32 4294901760, %v3098_v8  ;;  %v8183_v47 = vand.u32 4294901760, %v8725_v4  ;;  %8727 = vst [vmem:[#allocation21_spill] sm:$0xff] %v7393_v61  ;;  %v3105_v22 = vsub.f32 %v8724_v25, %v8182_v59  ;;  %v8729_v61 = vld [vmem:[#allocation65_spill] sm:$0xff] }
 0x3b4   :  { %v3218_v13 = vand.u32 4294901760, %v3217_v12 }
 0x3b5   :  { %v7401_v20 = vpack.c.bf16 %v3099_v17, %v3092_v15  ;;  %v3112_v8 = vsub.f32 %v8725_v4, %v8183_v47  ;;  %v3106_v63 = vand.u32 4294901760, %v3105_v22  ;;  %v8732_v15 = vld [vmem:[#allocation67_spill] sm:$0xff] }
 0x3b6   :  { %4777 = vmatpush3.bf16.msra.mxu0 %v8723_v41  ;;  %v8730_v41 = vld [vmem:[#allocation66_spill] sm:$0xff]  ;;  %v8189_v17 = vand.u32 4294901760, %v8732_v15  ;;  %v7415_v59 = vpack.c.bf16 %v3225_v56, %v3218_v13 }
 0x3b7   :  { %4779 = vmatprep.subr.bf16.mxu0 %v8726_v16  ;;  %8728 = vst [vmem:[#allocation22_spill] sm:$0xff] %v7401_v20  ;;  %v8184_v16 = vand.u32 4294901760, %v8729_v61  ;;  %v8186_v31 = vand.u32 4294901760, %v8730_v41  ;;  %v3113_v40 = vand.u32 4294901760, %v3112_v8  ;;  %v8733_v20 = vld [vmem:[#allocation68_spill] sm:$0xff] }
 0x3b8   :  { %v8190_v39 = vand.u32 4294901760, %v8733_v20  ;;  %8735 = vst [vmem:[#allocation23_spill] sm:$0xff] %v7415_v59  ;;  %v3119_v22 = vsub.f32 %v8732_v15, %v8189_v17  ;;  %v8737_v59 = vld [vmem:[#allocation73_spill] sm:$0xff] }
 0x3b9   :  { %v3231_v12 = vsub.f32 %v8729_v61, %v8184_v16  ;;  %v3238_v19 = vsub.f32 %v8730_v41, %v8186_v31  ;;  %v7423_v47 = vpack.c.bf16 %v3113_v40, %v3106_v63  ;;  %v8740_v40 = vld [vmem:[#allocation37_spill] sm:$0xff]  ;;  %v8742_v41 = vld [vmem:[#allocation59_spill] sm:$0xff] }
 0x3ba   :  { %4781 = vmatpush3.bf16.msra.mxu0 %v8731_v57  ;;  %v3126_v8 = vsub.f32 %v8733_v20, %v8190_v39  ;;  %v8738_v57 = vld [vmem:[#allocation76_spill] sm:$0xff]  ;;  %v3120_v34 = vand.u32 4294901760, %v3119_v22  ;;  %v8193_v63 = vand.u32 4294901760, %v8740_v40 }
 0x3bb   :  { %4783 = vmatprep.subr.bf16.mxu0 %v8734_v0  ;;  %8736 = vst [vmem:[#allocation28_spill] sm:$0xff] %v7423_v47  ;;  %v3232_v13 = vand.u32 4294901760, %v3231_v12  ;;  %v3239_v56 = vand.u32 4294901760, %v3238_v19  ;;  %v8191_v0 = vand.u32 4294901760, %v8737_v59  ;;  %v8192_v16 = vand.u32 4294901760, %v8738_v57  ;;  %v8741_v47 = vld [vmem:[#allocation78_spill] sm:$0xff] }
 0x3bc   :  { %v3127_v31 = vand.u32 4294901760, %v3126_v8  ;;  %v8195_v35 = vand.u32 4294901760, %v8741_v47  ;;  %v3133_v22 = vsub.f32 %v8740_v40, %v8193_v63  ;;  %v8749_v40 = vld [vmem:[#allocation35_spill] sm:$0xff] }
 0x3bd   :  { %v7437_v17 = vpack.c.bf16 %v3239_v56, %v3232_v13  ;;  %v3245_v12 = vsub.f32 %v8737_v59, %v8191_v0  ;;  %v3252_v19 = vsub.f32 %v8738_v57, %v8192_v16  ;;  %v8747_v16 = vand.u32 4294901760, %v8633_v60 }
 0x3be   :  { %4785 = vmatpush3.bf16.msra.mxu0 %v8739_v49  ;;  %v7445_v39 = vpack.c.bf16 %v3127_v31, %v3120_v34  ;;  %v3140_v8 = vsub.f32 %v8741_v47, %v8195_v35  ;;  %v8746_v49 = vld [vmem:[#allocation84_spill] sm:$0xff]  ;;  %v8748_v34 = vand.u32 4294901760, %v8634_v55 }
 0x3bf   :  { %4787 = vmatprep.subr.bf16.mxu0 %v8742_v41  ;;  %8743 = vst [vmem:[#allocation29_spill] sm:$0xff] %v7437_v17  ;;  %v3246_v13 = vand.u32 4294901760, %v3245_v12  ;;  %v3253_v56 = vand.u32 4294901760, %v3252_v19  ;;  %v8745_v17 = vld [vmem:[#allocation60_spill] sm:$0xff]  ;;  %v3134_v41 = vand.u32 4294901760, %v3133_v22  ;;  %v8750_v12 = vand.u32 4294901760, %v8662_v21 }
 0x3c0   :  { %8744 = vst [vmem:[#allocation55_spill] sm:$0xff] %v7445_v39  ;;  %v3141_v0 = vand.u32 4294901760, %v3140_v8  ;;  %v4794_v31 = vpack.c.bf16 %v8748_v34, %v8747_v16  ;;  %v8751_v19 = vand.u32 4294901760, %v8664_v26  ;;  %v8752_v22 = vand.u32 4294901760, %v8665_v5  ;;  %v8838_v55 = vld [vmem:[#allocation20_spill] sm:$0xff] }
 0x3c1   :  { %v7459_v39 = vpack.c.bf16 %v3253_v56, %v3246_v13  ;;  %v8753_v8 = vand.u32 4294901760, %v8666_v23  ;;  %v8754_v21 = vand.u32 4294901760, %v8669_v58  ;;  %v8755_v26 = vand.u32 4294901760, %v8670_v52  ;;  %v8836_v52 = vld [vmem:[#allocation17_spill] sm:$0xff]  ;;  %v8837_v56 = vld [vmem:[#allocation19_spill] sm:$0xff] }
 0x3c2   :  { %4789 = vmatpush3.bf16.msra.mxu0 %v8745_v17  ;;  %v7461_v63 = vpack.c.bf16 %v3141_v0, %v3134_v41  ;;  %v4796_v35 = vpack.c.bf16 %v8751_v19, %v8750_v12  ;;  %v8756_v23 = vand.u32 4294901760, %v8671_v62  ;;  %v8757_v41 = vand.u32 4294901760, %v8672_v10  ;;  %v8835_v10 = vld [vmem:[#allocation80_spill] sm:$0xff] }
 0x3c3   :  { %4791 = vmatprep.subr.bf16.mxu0 %v8746_v49  ;;  %v4798_v60 = vpack.c.bf16 %v8753_v8, %v8752_v22  ;;  %v4800_v16 = vpack.c.bf16 %v8755_v26, %v8754_v21  ;;  %v8759_v58 = vand.u32 4294901760, %v8674_v14  ;;  %v8761_v62 = vand.u32 4294901760, %v6649_v42  ;;  %v8763_v22 = vld [vmem:[#allocation100_spill] sm:$0xff]  ;;  %v8767_v26 = vld [vmem:[#allocation62_spill] sm:$0xff] }
 0x3c4   :  { %v4802_v13 = vpack.c.bf16 %v8757_v41, %v8756_v23  ;;  %v8762_v19 = vand.u32 4294901760, %v6651_v45  ;;  %v8769_v23 = vld [vmem:[#allocation63_spill] sm:$0xff]  ;;  %v8833_v42 = vld [vmem:[#allocation92_spill] sm:$0xff]  ;;  %v8834_v14 = vld [vmem:[#allocation94_spill] sm:$0xff] }
 0x3c5   :  { %v8770_v41 = vand.u32 4294901760, %v8769_v23 }
 0x3c6   :  { %4793 = vmatpush3.bf16.msra.mxu0 %v8749_v40 }
 0x3c7   :  { %4795 = vmatprep.subr.bf16.mxu0 %v4794_v31  ;;  %v8760_v31 = vand.u32 4294901760, %v6634_v30  ;;  %v8768_v30 = vand.u32 4294901760, %v8767_v26 }
 0x3c9   :  { %2603 = vmatmul.mubr.f32.vlgmr.msra.gmra.mrb[8].mxu0 %v7249_v54  ;;  %v4806_v12 = vpack.c.bf16 %v8761_v62, %v8760_v31  ;;  %v8775_v62 = vld [vmem:[#allocation70_spill] sm:$0xff] }
 0x3ca   :  { %4797 = vmatpush3.bf16.msra.mxu0 %v4796_v35  ;;  %2769 = vmatprep.mubr.f32.mxu0 %v7239_v7  ;;  %v8758_v35 = vand.u32 4294901760, %v8673_v3  ;;  %v8764_v3 = vand.u32 4294901760, %v8763_v22 }
 0x3cb   :  { %4799 = vmatprep.subr.bf16.mxu0 %v4798_v60  ;;  %v8765_v60 = vld [vmem:[#allocation61_spill] sm:$0xff] }
 0x3cc   :  { %v4804_v34 = vpack.c.bf16 %v8759_v58, %v8758_v35  ;;  %v4808_v8 = vpack.c.bf16 %v8764_v3, %v8762_v19  ;;  %v8766_v21 = vand.u32 4294901760, %v8765_v60  ;;  %v8777_v3 = vld [vmem:[#allocation71_spill] sm:$0xff]  ;;  %v8779_v60 = vld [vmem:[#allocation72_spill] sm:$0xff] }
 0x3cd   :  { %v8832_v58 = vld [vmem:[#allocation91_spill] sm:$0xff] }
 0x3ce   :  { %4801 = vmatpush3.bf16.msra.mxu0 %v4800_v16  ;;  %v4810_v16 = vpack.c.bf16 %v8768_v30, %v8766_v21  ;;  %v8780_v21 = vand.u32 4294901760, %v8779_v60  ;;  %v8781_v30 = vld [vmem:[#allocation46_spill] sm:$0xff]  ;;  %v8791_v60 = vld [vmem:[#allocation24_spill] sm:$0xff] }
 0x3cf   :  { %4803 = vmatprep.subr.bf16.mxu0 %v4802_v13  ;;  %v8771_v13 = vld [vmem:[#allocation64_spill] sm:$0xff]  ;;  %v8782_v23 = vand.u32 4294901760, %v8781_v30 }
 0x3d0   :  { %v8772_v45 = vand.u32 4294901760, %v8771_v13 }
 0x3d2   :  { %4805 = vmatpush3.bf16.msra.mxu0 %v4804_v34  ;;  %v4812_v35 = vpack.c.bf16 %v8772_v45, %v8770_v41  ;;  %v8773_v34 = vld [vmem:[#allocation69_spill] sm:$0xff]  ;;  %v8783_v41 = vld [vmem:[#allocation51_spill] sm:$0xff] }
 0x3d3   :  { %4807 = vmatprep.subr.bf16.mxu0 %v4806_v12  ;;  %v8774_v31 = vand.u32 4294901760, %v8773_v34  ;;  %v8776_v12 = vand.u32 4294901760, %v8775_v62  ;;  %v8784_v13 = vand.u32 4294901760, %v8783_v41  ;;  %v8787_v62 = vld [vmem:[#allocation14_spill] sm:$0xff]  ;;  %v8794_v34 = vld [vmem:[#allocation27_spill] sm:$0xff] }
 0x3d4   :  { %v8796_v45 = vld [vmem:[#allocation87_spill] sm:$0xff]  ;;  %v8831_v41 = vld [vmem:[#allocation86_spill] sm:$0xff] }
 0x3d5   :  { %v4814_v19 = vpack.c.bf16 %v8776_v12, %v8774_v31  ;;  %v8785_v31 = vld [vmem:[#allocation52_spill] sm:$0xff]  ;;  %v8788_v12 = vand.u32 4294901760, %v8787_v62  ;;  %v8828_v62 = vld [vmem:[#allocation57_spill] sm:$0xff] }
 0x3d6   :  { %4809 = vmatpush3.bf16.msra.mxu0 %v4808_v8  ;;  %v8778_v8 = vand.u32 4294901760, %v8777_v3 }
 0x3d7   :  { %4811 = vmatprep.subr.bf16.mxu0 %v4810_v16  ;;  %v4818_v16 = vpack.c.bf16 %v8784_v13, %v8782_v23  ;;  %v8793_v23 = vld [vmem:[#allocation66_spill] sm:$0xff] }
 0x3d8   :  { %v4816_v26 = vpack.c.bf16 %v8780_v21, %v8778_v8  ;;  %v8789_v8 = vld [vmem:[#allocation16_spill] sm:$0xff]  ;;  %v8792_v21 = vand.u32 4294901760, %v8791_v60  ;;  %v8805_v60 = vld [vmem:[#allocation93_spill] sm:$0xff]  ;;  %v8830_v13 = vld [vmem:[#allocation90_spill] sm:$0xff] }
 0x3da   :  { %4813 = vmatpush3.bf16.msra.mxu0 %v4812_v35  ;;  %v8786_v35 = vand.u32 4294901760, %v8785_v31  ;;  %v8797_v31 = vand.u32 4294901760, %v8796_v45  ;;  %v8803_v45 = vld [vmem:[#allocation85_spill] sm:$0xff] }
 0x3db   :  { %4815 = vmatprep.subr.bf16.mxu0 %v4814_v19  ;;  %v8790_v19 = vand.u32 4294901760, %v8789_v8  ;;  %v8800_v8 = vld [vmem:[#allocation45_spill] sm:$0xff] }
 0x3dc   :  { %v4820_v3 = vpack.c.bf16 %v8788_v12, %v8786_v35  ;;  %v8798_v35 = vld [vmem:[#allocation37_spill] sm:$0xff] }
 0x3dd   :  { %v4822_v30 = vpack.c.bf16 %v8792_v21, %v8790_v19  ;;  %v8799_v12 = vld [vmem:[#allocation41_spill] sm:$0xff]  ;;  %v8806_v21 = vld [vmem:[#allocation98_spill] sm:$0xff] }
 0x3de   :  { %4817 = vmatpush3.bf16.msra.mxu0 %v4816_v26  ;;  %v8795_v26 = vand.u32 4294901760, %v8794_v34  ;;  %v8801_v19 = vld [vmem:[#allocation49_spill] sm:$0xff]  ;;  %v8802_v34 = vld [vmem:[#allocation30_spill] sm:$0xff] }
 0x3df   :  { %4819 = vmatprep.subr.bf16.mxu0 %v4818_v16  ;;  %v8829_v16 = vld [vmem:[#allocation58_spill] sm:$0xff] }
 0x3e0   :  { %v4824_v22 = vpack.c.bf16 %v8797_v31, %v8795_v26  ;;  %v8809_v26 = vld [vmem:[#allocation34_spill] sm:$0xff] }
 0x3e1   :  { %v8810_v31 = vld [vmem:[#allocation50_spill] sm:$0xff] }
 0x3e2   :  { %4821 = vmatpush3.bf16.msra.mxu0 %v4820_v3  ;;  %v8804_v3 = vld [vmem:[#allocation89_spill] sm:$0xff] }
 0x3e3   :  { %4823 = vmatprep.subr.bf16.mxu0 %v4822_v30  ;;  %v8807_v30 = vld [vmem:[#allocation99_spill] sm:$0xff] }
 0x3e6   :  { %4825 = vmatpush3.bf16.msra.mxu0 %v4824_v22  ;;  %v8808_v22 = vld [vmem:[#allocation31_spill] sm:$0xff] }
 0x3e7   :  { %4827 = vmatprep.subr.bf16.mxu0 %v8799_v12  ;;  %v8811_v12 = vld [vmem:[#allocation53_spill] sm:$0xff] }
 0x3e9   :  { %2771 = vmatmul.mubr.f32.vlgmr.msra.gmra.mrb[10].mxu0 %v8800_v8 }
 0x3ea   :  { %4829 = vmatpush3.bf16.msra.mxu0 %v8801_v19  ;;  %2873 = vmatprep.mubr.f32.mxu0 %v7239_v7  ;;  %v8812_v19 = vld [vmem:[#allocation59_spill] sm:$0xff] }
 0x3eb   :  { %4831 = vmatprep.subr.bf16.mxu0 %v8802_v34  ;;  %v8813_v34 = vld [vmem:[#allocation74_spill] sm:$0xff] }
 0x3ee   :  { %4833 = vmatpush3.bf16.msra.mxu0 %v8803_v45  ;;  %v8814_v45 = vld [vmem:[#allocation75_spill] sm:$0xff] }
 0x3ef   :  { %4835 = vmatprep.subr.bf16.mxu0 %v8804_v3  ;;  %v8815_v3 = vld [vmem:[#allocation36_spill] sm:$0xff] }
 0x3f2   :  { %4837 = vmatpush3.bf16.msra.mxu0 %v8805_v60  ;;  %v8816_v60 = vld [vmem:[#allocation77_spill] sm:$0xff] }
 0x3f3   :  { %4839 = vmatprep.subr.bf16.mxu0 %v8806_v21  ;;  %v8817_v21 = vld [vmem:[#allocation79_spill] sm:$0xff] }
 0x3f6   :  { %4841 = vmatpush3.bf16.msra.mxu0 %v8807_v30  ;;  %v8818_v30 = vld [vmem:[#allocation11_spill] sm:$0xff] }
 0x3f7   :  { %4843 = vmatprep.subr.bf16.mxu0 %v8808_v22  ;;  %v8819_v22 = vld [vmem:[#allocation81_spill] sm:$0xff] }
 0x3fa   :  { %4845 = vmatpush3.bf16.msra.mxu0 %v8809_v26  ;;  %v8823_v26 = vld [vmem:[#allocation18_spill] sm:$0xff] }
 0x3fb   :  { %4847 = vmatprep.subr.bf16.mxu0 %v8810_v31  ;;  %v8824_v31 = vld [vmem:[#allocation25_spill] sm:$0xff] }
 0x3fe   :  { %4849 = vmatpush3.bf16.msra.mxu0 %v8811_v12  ;;  %v8825_v12 = vld [vmem:[#allocation26_spill] sm:$0xff] }
 0x3ff   :  { %4851 = vmatprep.subr.bf16.mxu0 %v8812_v19  ;;  %v8826_v19 = vld [vmem:[#allocation42_spill] sm:$0xff] }
 0x402   :  { %4853 = vmatpush3.bf16.msra.mxu0 %v8745_v17  ;;  %v8820_v17 = vld [vmem:[#allocation12_spill] sm:$0xff] }
 0x403   :  { %4855 = vmatprep.subr.bf16.mxu0 %v8746_v49  ;;  %v8821_v49 = vld [vmem:[#allocation13_spill] sm:$0xff] }
 0x406   :  { %4857 = vmatpush3.bf16.msra.mxu0 %v8749_v40  ;;  %v8822_v40 = vld [vmem:[#allocation15_spill] sm:$0xff] }
 0x407   :  { %4859 = vmatprep.subr.bf16.mxu0 %v8813_v34 }
 0x409   :  { %2875 = vmatmul.mubr.f32.vlgmr.msra.gmra.mrb[12].mxu0 %v8800_v8 }
 0x40a   :  { %4861 = vmatpush3.bf16.msra.mxu0 %v8814_v45  ;;  %3020 = vmatprep.mubr.f32.mxu0 %v8815_v3  ;;  %v8827_v3 = vld [vmem:[#allocation43_spill] sm:$0xff] }
 0x40b   :  { %4863 = vmatprep.subr.bf16.mxu0 %v8816_v60 }
 0x40e   :  { %4865 = vmatpush3.bf16.msra.mxu0 %v8817_v21 }
 0x40f   :  { %4867 = vmatprep.subr.bf16.mxu0 %v8818_v30 }
 0x412   :  { %4869 = vmatpush3.bf16.msra.mxu0 %v8819_v22 }
 0x413   :  { %4871 = vmatprep.subr.bf16.mxu0 %v8820_v17 }
 0x416   :  { %4873 = vmatpush3.bf16.msra.mxu0 %v8821_v49 }
 0x417   :  { %4875 = vmatprep.subr.bf16.mxu0 %v8822_v40 }
 0x41a   :  { %4877 = vmatpush3.bf16.msra.mxu0 %v8823_v26 }
 0x41b   :  { %4879 = vmatprep.subr.bf16.mxu0 %v8824_v31 }
 0x41e   :  { %4881 = vmatpush3.bf16.msra.mxu0 %v8825_v12 }
 0x41f   :  { %4883 = vmatprep.subr.bf16.mxu0 %v8826_v19 }
 0x422   :  { %4885 = vmatpush3.bf16.msra.mxu0 %v8827_v3 }
 0x423   :  { %4887 = vmatprep.subr.bf16.mxu0 %v8828_v62 }
 0x426   :  { %4889 = vmatpush3.bf16.msra.mxu0 %v8829_v16 }
 0x427   :  { %4891 = vmatprep.subr.bf16.mxu0 %v8830_v13 }
 0x429   :  { %3026 = vmatmul.mubr.f32.vlgmr.msra.gmra.mrb[14].mxu0 %v8831_v41  ;;  %v8839_v41 = vld [vmem:[#allocation21_spill] sm:$0xff] }
 0x42a   :  { %4893 = vmatpush3.bf16.msra.mxu0 %v8832_v58  ;;  %3256 = vmatprep.mubr.f32.mxu0 %v7239_v7  ;;  %v8840_v58 = vld [vmem:[#allocation22_spill] sm:$0xff]  ;;  %v8841_v7 = vld [vmem:[#allocation23_spill] sm:$0xff] }
 0x42b   :  { %4895 = vmatprep.subr.bf16.mxu0 %v8833_v42 }
 0x42e   :  { %4897 = vmatpush3.bf16.msra.mxu0 %v8834_v14 }
 0x42f   :  { %4899 = vmatprep.subr.bf16.mxu0 %v8835_v10  ;;  %v8842_v10 = vld [vmem:[#allocation28_spill] sm:$0xff] }
 0x432   :  { %4901 = vmatpush3.bf16.msra.mxu0 %v8836_v52  ;;  %v8843_v52 = vld [vmem:[#allocation29_spill] sm:$0xff] }
 0x433   :  { %4903 = vmatprep.subr.bf16.mxu0 %v8837_v56  ;;  %v8844_v56 = vld [vmem:[#allocation55_spill] sm:$0xff] }
 0x434   :  { %v4255_v5 = vpop.f32.mrb[2].mxu1 }
 0x435   :  { %v4256_v0 = vpop.f32.mrb[3].mxu1 }
 0x436   :  { %4905 = vmatpush3.bf16.msra.mxu0 %v8838_v55  ;;  %v7604_v13 = vadd.f32 %v4256_v0, %v4255_v5  ;;  %v8845_v55 = vpack.c.bf16 %v8687_v38, %v8686_v50  ;;  %v8847_v0 = vld [vmem:[#allocation54_spill] sm:$0xff]  ;;  %v8848_v5 = vpack.c.bf16 %v8691_v32, %v8690_v46 }
 0x437   :  { %4907 = vmatprep.subr.bf16.mxu0 %v8839_v41  ;;  %v8851_v41 = vpack.c.bf16 %v8702_v33, %v8701_v28 }
 0x43a   :  { %4909 = vmatpush3.bf16.msra.mxu0 %v8840_v58  ;;  %v8852_v58 = vpack.c.bf16 %v8707_v11, %v8706_v48 }
 0x43b   :  { %4911 = vmatprep.subr.bf16.mxu0 %v8841_v7  ;;  %v8846_v7 = vpack.c.bf16 %v8689_v1, %v8688_v37 }
 0x43c   :  { %v3870_v42 = vpop.f32.mrb[2].mxu0 }
 0x43d   :  { %v3871_v14 = vpop.f32.mrb[3].mxu0 }
 0x43e   :  { %v3872_v54 = vadd.f32 %v3871_v14, %v3870_v42  ;;  %4913 = vmatpush3.bf16.msra.mxu0 %v8842_v10  ;;  %v8853_v42 = vpack.c.bf16 %v8710_v53, %v8709_v9  ;;  %v8854_v14 = vpack.c.bf16 %v8715_v29, %v8714_v24  ;;  %v8855_v10 = vpack.c.bf16 %v8718_v27, %v8717_v51 }
 0x43f   :  { %4915 = vmatprep.subr.bf16.mxu0 %v8843_v52  ;;  %v3835_v52 = vld [vmem:[%s7780_s7] ss:$0 sm:$0xff]  ;;  %s3834_s7 = sld [smem:[#allocation2 + $0x2]] }
 0x442   :  { %4917 = vmatpush3.bf16.msra.mxu0 %v8844_v56  ;;  %v8856_v56 = vpack.c.bf16 %v8722_v43, %v8721_v2 }
 0x443   :  { %4919 = vmatprep.subr.bf16.mxu0 %v7459_v39  ;;  %v8849_v39 = vpack.c.bf16 %v8694_v36, %v8693_v18 }
 0x446   :  { %4921 = vmatpush3.bf16.msra.mxu0 %v7461_v63  ;;  %v8850_v63 = vpack.c.bf16 %v8699_v6, %v8698_v44 }
 0x447   :  { %4923 = vmatprep.subr.bf16.mxu0 %v8845_v55 }
 0x449   :  { %3258 = vmatmul.mubr.f32.vlgmr.msra.gmra.mrb[16].mxu0 %v8800_v8 }
 0x44a   :  { %4925 = vmatpush3.bf16.msra.mxu0 %v8846_v7  ;;  %3393 = vmatprep.mubr.f32.mxu0 %v8847_v0  ;;  %v2127_v0 = vadd.f32 %v3872_v54, %v3835_v52  ;;  %v8861_v54 = vpack.c.bf16 %v8741_v47, %v8798_v35 }
 0x44b   :  { %4927 = vmatprep.subr.bf16.mxu0 %v8848_v5 }
 0x44e   :  { %4929 = vmatpush3.bf16.msra.mxu0 %v8849_v39  ;;  %v8857_v39 = vpack.c.bf16 %v8725_v4, %v8724_v25 }
 0x44f   :  { %4931 = vmatprep.subr.bf16.mxu0 %v8850_v63  ;;  %v8858_v63 = vpack.c.bf16 %v8793_v23, %v8729_v61 }
 0x452   :  { %4933 = vmatpush3.bf16.msra.mxu0 %v8851_v41 }
 0x453   :  { %4935 = vmatprep.subr.bf16.mxu0 %v8852_v58  ;;  %v8859_v58 = vpack.c.bf16 %v8733_v20, %v8732_v15 }
 0x456   :  { %4937 = vmatpush3.bf16.msra.mxu0 %v8853_v42  ;;  %v8860_v42 = vpack.c.bf16 %v8738_v57, %v8737_v59 }
 0x457   :  { %4939 = vmatprep.subr.bf16.mxu0 %v8854_v14  ;;  %v8862_v14 = vld [vmem:[#allocation48_spill] sm:$0xff] }
 0x45a   :  { %4941 = vmatpush3.bf16.msra.mxu0 %v8855_v10  ;;  %v8863_v10 = vld [vmem:[#allocation33_spill] sm:$0xff] }
 0x45b   :  { %4943 = vmatprep.subr.bf16.mxu0 %v8856_v56 }
 0x45c   :  { %v3905_v55 = vpop.f32.mrb[4].mxu0 }
 0x45d   :  { %v3906_v7 = vpop.f32.mrb[5].mxu0 }
 0x45e   :  { %v3907_v5 = vadd.f32 %v3906_v7, %v3905_v55  ;;  %4945 = vmatpush3.bf16.msra.mxu0 %v8857_v39  ;;  %v8878_v55 = vand.u32 4294901760, %v8706_v48  ;;  %v8885_v48 = vand.u32 4294901760, %v8718_v27 }
 0x45f   :  { %4947 = vmatprep.subr.bf16.mxu0 %v8858_v63 }
 0x460   :  { %v2359_v41 = vadd.f32 %v3907_v5, %v2127_v0 }
 0x462   :  { %4949 = vmatpush3.bf16.msra.mxu0 %v8859_v58 }
 0x463   :  { %4951 = vmatprep.subr.bf16.mxu0 %v8860_v42 }
 0x466   :  { %4953 = vmatpush3.bf16.msra.mxu0 %v8861_v54 }
 0x467   :  { %4955 = vmatprep.subr.bf16.mxu0 %v8813_v34 }
 0x469   :  { %3396 = vmatmul.mubr.f32.vlgmr.msra.gmra.mrb[18].mxu0 %v8862_v14 }
 0x46a   :  { %4957 = vmatpush3.bf16.msra.mxu0 %v8814_v45  ;;  %3500 = vmatprep.mubr.f32.mxu0 %v8863_v10 }
 0x46b   :  { %4959 = vmatprep.subr.bf16.mxu0 %v8816_v60 }
 0x46e   :  { %4961 = vmatpush3.bf16.msra.mxu0 %v8817_v21  ;;  %v8864_v21 = vand.u32 4294901760, %v8686_v50  ;;  %v8871_v50 = vld [vmem:[#allocation47_spill] sm:$0xff] }
 0x46f   :  { %4963 = vmatprep.subr.bf16.mxu0 %v8818_v30  ;;  %v8865_v30 = vand.u32 4294901760, %v8687_v38  ;;  %v8872_v38 = vand.u32 4294901760, %v8693_v18  ;;  %v8879_v18 = vand.u32 4294901760, %v8707_v11  ;;  %v8886_v11 = vand.u32 4294901760, %v8721_v2 }
 0x470   :  { %v8892_v2 = vand.u32 4294901760, %v8732_v15 }
 0x471   :  { %v4998_v7 = vpack.c.bf16 %v8879_v18, %v8878_v55 }
 0x472   :  { %4965 = vmatpush3.bf16.msra.mxu0 %v8819_v22  ;;  %v4986_v22 = vpack.c.bf16 %v8865_v30, %v8864_v21 }
 0x473   :  { %4967 = vmatprep.subr.bf16.mxu0 %v8820_v17  ;;  %v8866_v17 = vand.u32 4294901760, %v8688_v37  ;;  %v8874_v37 = vand.u32 4294901760, %v8698_v44  ;;  %v8881_v44 = vand.u32 4294901760, %v8710_v53  ;;  %v8888_v53 = vand.u32 4294901760, %v8724_v25 }
 0x474   :  { %v8894_v25 = vand.u32 4294901760, %v8737_v59 }
 0x476   :  { %4969 = vmatpush3.bf16.msra.mxu0 %v8821_v49  ;;  %v8867_v49 = vand.u32 4294901760, %v8689_v1  ;;  %v8875_v1 = vand.u32 4294901760, %v8699_v6  ;;  %v8882_v6 = vand.u32 4294901760, %v8714_v24  ;;  %v8889_v24 = vand.u32 4294901760, %v8725_v4 }
 0x477   :  { %4971 = vmatprep.subr.bf16.mxu0 %v8822_v40  ;;  %v8895_v4 = vand.u32 4294901760, %v8738_v57 }
 0x478   :  { %v4988_v40 = vpack.c.bf16 %v8867_v49, %v8866_v17 }
 0x479   :  { %v5014_v10 = vpack.c.bf16 %v8895_v4, %v8894_v25 }
 0x47a   :  { %4973 = vmatpush3.bf16.msra.mxu0 %v8823_v26  ;;  %v8868_v26 = vand.u32 4294901760, %v8690_v46  ;;  %v8876_v46 = vand.u32 4294901760, %v8701_v28  ;;  %v8883_v28 = vand.u32 4294901760, %v8715_v29  ;;  %v8890_v29 = vand.u32 4294901760, %v8729_v61 }
 0x47b   :  { %4975 = vmatprep.subr.bf16.mxu0 %v8824_v31  ;;  %v8869_v31 = vand.u32 4294901760, %v8691_v32  ;;  %v8877_v32 = vand.u32 4294901760, %v8702_v33  ;;  %v8884_v33 = vand.u32 4294901760, %v8717_v51  ;;  %v8891_v51 = vand.u32 4294901760, %v8793_v23 }
 0x47c   :  { %v3940_v34 = vpop.f32.mrb[6].mxu0  ;;  %v5002_v5 = vpack.c.bf16 %v8883_v28, %v8882_v6  ;;  %v8896_v61 = vand.u32 4294901760, %v8798_v35  ;;  %v8897_v23 = vand.u32 4294901760, %v8741_v47 }
 0x47d   :  { %v3941_v45 = vpop.f32.mrb[7].mxu0  ;;  %v4996_v56 = vpack.c.bf16 %v8877_v32, %v8876_v46  ;;  %v5004_v39 = vpack.c.bf16 %v8885_v48, %v8884_v33  ;;  %v5010_v58 = vpack.c.bf16 %v8891_v51, %v8890_v29 }
 0x47e   :  { %v3942_v52 = vadd.f32 %v3941_v45, %v3940_v34  ;;  %4977 = vmatpush3.bf16.msra.mxu0 %v8825_v12  ;;  %v4990_v12 = vpack.c.bf16 %v8869_v31, %v8868_v26  ;;  %v5016_v45 = vpack.c.bf16 %v8897_v23, %v8896_v61 }
 0x47f   :  { %4979 = vmatprep.subr.bf16.mxu0 %v8826_v19  ;;  %v8870_v19 = vld [vmem:[#allocation32_spill] sm:$0xff] }
 0x480   :  { %v2497_v60 = vadd.f32 %v3942_v52, %v2359_v41  ;;  %v5008_v41 = vpack.c.bf16 %v8889_v24, %v8888_v53 }
 0x482   :  { %4981 = vmatpush3.bf16.msra.mxu0 %v8827_v3  ;;  %v4994_v3 = vpack.c.bf16 %v8875_v1, %v8874_v37 }
 0x483   :  { %4983 = vmatprep.subr.bf16.mxu0 %v8828_v62 }
 0x486   :  { %4985 = vmatpush3.bf16.msra.mxu0 %v8829_v16  ;;  %v8873_v16 = vand.u32 4294901760, %v8694_v36  ;;  %v8880_v36 = vand.u32 4294901760, %v8709_v9  ;;  %v8887_v9 = vand.u32 4294901760, %v8722_v43  ;;  %v8893_v43 = vand.u32 4294901760, %v8733_v20 }
 0x487   :  { %4987 = vmatprep.subr.bf16.mxu0 %v4986_v22 }
 0x488   :  { %v4992_v62 = vpack.c.bf16 %v8873_v16, %v8872_v38  ;;  %v5000_v0 = vpack.c.bf16 %v8881_v44, %v8880_v36  ;;  %v5006_v63 = vpack.c.bf16 %v8887_v9, %v8886_v11  ;;  %v5012_v14 = vpack.c.bf16 %v8893_v43, %v8892_v2 }
 0x489   :  { %3504 = vmatmul.mubr.f32.vlgmr.msra.gmra.mrb[20].mxu0 %v8870_v19  ;;  %v3783_v9 = vstv %s3833_s23 }
 0x48a   :  { %4989 = vmatpush3.bf16.msra.mxu0 %v4988_v40  ;;  %3670 = vmatprep.mubr.f32.mxu0 %v8871_v50 }
 0x48b   :  { %4991 = vmatprep.subr.bf16.mxu0 %v4990_v12 }
 0x48e   :  { %4993 = vmatpush3.bf16.msra.mxu0 %v4992_v62 }
 0x48f   :  { %4995 = vmatprep.subr.bf16.mxu0 %v4994_v3 }
 0x492   :  { %4997 = vmatpush3.bf16.msra.mxu0 %v4996_v56 }
 0x493   :  { %4999 = vmatprep.subr.bf16.mxu0 %v4998_v7 }
 0x496   :  { %5001 = vmatpush3.bf16.msra.mxu0 %v5000_v0 }
 0x497   :  { %5003 = vmatprep.subr.bf16.mxu0 %v5002_v5 }
 0x49a   :  { %5005 = vmatpush3.bf16.msra.mxu0 %v5004_v39 }
 0x49b   :  { %5007 = vmatprep.subr.bf16.mxu0 %v5006_v63 }
 0x49c   :  { %v3975_v27 = vpop.f32.mrb[8].mxu0 }
 0x49d   :  { %v3976_v42 = vpop.f32.mrb[9].mxu0 }
 0x49e   :  { %v3977_v54 = vadd.f32 %v3976_v42, %v3975_v27  ;;  %5009 = vmatpush3.bf16.msra.mxu0 %v5008_v41 }
 0x49f   :  { %5011 = vmatprep.subr.bf16.mxu0 %v5010_v58 }
 0x4a0   :  { %v2605_v34 = vadd.f32 %v3977_v54, %v2497_v60  ;;  %v3804_v60 = vstv %s3834_s7 }
 0x4a2   :  { %5013 = vmatpush3.bf16.msra.mxu0 %v5012_v14 }
 0x4a3   :  { %5015 = vmatprep.subr.bf16.mxu0 %v5014_v10 }
 0x4a6   :  { %5017 = vmatpush3.bf16.msra.mxu0 %v5016_v45 }
 0x4a9   :  { %3672 = vmatmul.mubr.f32.vlgmr.msra.gmra.mrb[22].mxu0 %v8800_v8  ;;  %v3836_v8 = vld [vmem:[%s7782_s9] ss:$0 sm:$0xff]  ;;  %s65_s9 = sld [smem:[#allocation2]] }
 0x4af   :  { %v3781_v48 = vstv %s65_s9 }
 0x4bc   :  { %v4010_v15 = vpop.f32.mrb[10].mxu0 }
 0x4bd   :  { %v4011_v20 = vpop.f32.mrb[11].mxu0 }
 0x4be   :  { %v4012_v52 = vadd.f32 %v4011_v20, %v4010_v15 }
 0x4c0   :  { %v2773_v21 = vadd.f32 %v4012_v52, %v2605_v34 }
 0x4dc   :  { %v4045_v30 = vpop.f32.mrb[12].mxu0 }
 0x4dd   :  { %v4046_v59 = vpop.f32.mrb[13].mxu0 }
 0x4de   :  { %v4047_v22 = vadd.f32 %v4046_v59, %v4045_v30 }
 0x4e0   :  { %v2877_v57 = vadd.f32 %v4047_v22, %v2773_v21 }
 0x4e2   :  { %5080 = vtanh.f32 %v2877_v57  ;;  %v3790_v1 = vmul.f32 -2.0, %v2877_v57  ;;  %v3800_v51 = vsub.f32 0.6931472, %v2877_v57 }
 0x4e4   :  { %v3792_v3 = vand.u32 2147483647, %v3790_v1  ;;  %v3791_v53 = vmax.f32 %v3790_v1, 0.0 }
 0x4e6   :  { %v3793_v46 = vsub.f32 0.0, %v3792_v3 }
 0x4e8   :  { %v3794_v18 = vmul.f32 1.442695, %v3793_v46 }
 0x4ea   :  { %5082 = vpow2.f32 %v3794_v18 }
 0x4ec   :  { %v5081_v17 = vpop.eup %5080 }
 0x4ed   :  { %v3805_v35 = vmul.f32 %v5081_v17, %v3804_v60 }
 0x4ef   :  { %3807 = vst.msk [vmem:[#allocation7] sm:$0xff] %vm3806_vm2, %v3805_v35 }
 0x4f4   :  { %v5083_v36 = vpop.eup %5082 }
 0x4f5   :  { %v3796_v44 = vadd.f32 1.0, %v5083_v36 }
 0x4f7   :  { %5084 = vlog2.f32 %v3796_v44 }
 0x4fc   :  { %v4080_v47 = vpop.f32.mrb[14].mxu0 }
 0x4fd   :  { %v4081_v49 = vpop.f32.mrb[15].mxu0 }
 0x4fe   :  { %v4082_v40 = vadd.f32 %v4081_v49, %v4080_v47 }
 0x500   :  { %v3028_v12 = vadd.f32 %v4082_v40, %v3836_v8 }
 0x501   :  { %v5085_v5 = vpop.eup %5084 }
 0x502   :  { %v3798_v11 = vmul.f32 0.6931472, %v5085_v5 }
 0x504   :  { %v3799_v41 = vadd.f32 %v3798_v11, %v3791_v53 }
 0x506   :  { %v3801_v27 = vsub.f32 %v3800_v51, %v3799_v41 }
 0x508   :  { %v3802_v2 = vmul.f32 2.0, %v3801_v27 }
 0x51c   :  { %v4115_v26 = vpop.f32.mrb[16].mxu0 }
 0x51d   :  { %v4116_v31 = vpop.f32.mrb[17].mxu0 }
 0x51e   :  { %v4117_v19 = vadd.f32 %v4116_v31, %v4115_v26 }
 0x520   :  { %v3260_v50 = vadd.f32 %v4117_v19, %v3028_v12 }
 0x53c   :  { %v4150_v38 = vpop.f32.mrb[18].mxu0 }
 0x53d   :  { %v4151_v16 = vpop.f32.mrb[19].mxu0 }
 0x53e   :  { %v4152_v62 = vadd.f32 %v4151_v16, %v4150_v38 }
 0x540   :  { %v3398_v37 = vadd.f32 %v4152_v62, %v3260_v50 }
 0x55c   :  { %v4185_v32 = vpop.f32.mrb[20].mxu0 }
 0x55d   :  { %v4186_v56 = vpop.f32.mrb[21].mxu0 }
 0x55e   :  { %v4187_v55 = vadd.f32 %v4186_v56, %v4185_v32 }
 0x560   :  { %v3506_v7 = vadd.f32 %v4187_v55, %v3398_v37 }
 0x57c   :  { %v4220_v0 = vpop.f32.mrb[22].mxu0 }
 0x57d   :  { %v4221_v6 = vpop.f32.mrb[23].mxu0 }
 0x57e   :  { %v4222_v28 = vadd.f32 %v4221_v6, %v4220_v0 }
 0x580   :  { %v3674_v33 = vadd.f32 %v4222_v28, %v3506_v7 }
 0x582   :  { %v3778_v39 = vadd.f32 %v7604_v13, %v3674_v33 }
 0x584   :  { %v3782_v63 = vmul.f32 %v3781_v48, %v3778_v39 }
 0x586   :  { %v3784_v24 = vadd.f32 %v3783_v9, %v3782_v63 }
 0x588   :  { %v3785_v29 = vmax.f32 %v3784_v24, -20.0 }
 0x58a   :  { %v3786_v58 = vmin.f32 %v3785_v29, 2.0 }
 0x58c   :  { %v3787_v42 = vsub.f32 0.0, %v3786_v58 }
 0x58e   :  { %v3837_v54 = vadd.f32 -0.9189385, %v3787_v42 }
 0x590   :  { %v3803_v43 = vsub.f32 %v3837_v54, %v3802_v2 }
 0x592   :  { %v3808_v14 = vsel %vm3806_vm2, %v3803_v43, 0.0 }
 0x593   :  { %3809 = vadd.xlane.f32.xlu0 %v3808_v14 }
 0x594   :  { %5131 = shalt.err (!%p5128_p3)
}
 0x595   :  { %s5132_s0 = scalar_lea.hbm %s7783_s10, 128 }
 0x596   :  { %p5133_p4 = scmp.ne.s32.totalorder %s7783_s10, %s5132_s0  ;;  %p5136_p5 = scmp.lt.u32.totalorder %s5132_s0, %s7783_s10 }
 0x598   :  { %p5138_p6 = pnand %p5136_p5, %p5133_p4 }
 0x59a   :  { %5141 = shalt.err (!%p5138_p6)
}
 0x59b   :  { %3822 = dma.vmem_to_hbm [thread:$0]  %s3820_s25, 128, %s7783_s10, [#allocation4]   ;;  %vm3811_vm3 = vcmask 7168  }
 0x620   :  { %v3810_v13 = vpop.xlane.xlu0 %3809 }
 0x621   :  { %3812 = vst.msk [vmem:[%s7784_s11] sm:$0xff] %vm3811_vm3, %v3810_v13 }
 0x622   :  { %5146 = dma.done.wait [#allocation4], 128  }
 0x623   :  { %5147 = vsyncadd [#allocation4], 4294967168 }
 0x624   :  { %3830 = vsyncpa [#allocation3], 1 }
 0x625   :  { %3831 = vsyncpa [#allocation4], 1 }
 0x626   :  { %3832 = vsyncpa [#allocation5], 1 }

</bundles_post_ra>
